<compile_context>
chip_gen: v5e
topology: v5e:2x2
jax: 0.10.0
libtpu: 0.0.40
codegen_flags: <defaults>
</compile_context>

<pallas_src>
import jax
import jax.numpy as jnp
from jax.experimental import pallas as pl
from jax.experimental.pallas import tpu as pltpu


def _se_basic_block_kernel(xpad_ref, w1_ref, s1_ref, b1_ref,
                           w2_ref, s2_ref, b2_ref,
                           sew1_ref, sew2_ref,
                           o_ref, pad_scr):
    """Processes one image (one grid step along the batch axis)."""
    Hp, Wp, C = xpad_ref.shape
    H, W = Hp - 2, Wp - 2
    HW = H * W

    xp = xpad_ref[...]                                    # (H+2, W+2, C) f32

    # ---- conv1: im2col-lite (9 shifted taps fused along K) + one bf16 MXU dot
    taps1 = [xp[dh:dh + H, dw:dw + W, :].reshape(HW, C)
             for dh in range(3) for dw in range(3)]
    p1 = jnp.concatenate(taps1, axis=1).astype(jnp.bfloat16)      # (HW, 9C)
    acc1 = jnp.dot(p1, w1_ref[...], preferred_element_type=jnp.float32)

    # ---- bn1 (folded scale/bias) + ReLU (f32) ----
    out1 = jnp.maximum(acc1 * s1_ref[...] + b1_ref[...], 0.0)     # (HW, C)

    # ---- conv2 input: padded VMEM scratch; zero only the 1-px halo ring ----
    zrow = jnp.zeros((1, Wp, C), jnp.float32)
    zcol = jnp.zeros((Hp, 1, C), jnp.float32)
    pad_scr[0:1, :, :] = zrow
    pad_scr[Hp - 1:Hp, :, :] = zrow
    pad_scr[:, 0:1, :] = zcol
    pad_scr[:, Wp - 1:Wp, :] = zcol
    pad_scr[1:1 + H, 1:1 + W, :] = out1.reshape(H, W, C)

    # ---- conv2: same fused im2col + bf16 MXU dot ----
    taps2 = [pad_scr[dh:dh + H, dw:dw + W, :].reshape(HW, C)
             for dh in range(3) for dw in range(3)]
    p2 = jnp.concatenate(taps2, axis=1).astype(jnp.bfloat16)      # (HW, 9C)
    acc2 = jnp.dot(p2, w2_ref[...], preferred_element_type=jnp.float32)

    # ---- SE gate (tiny; kept f32): avgpool(bn2(conv2)) -> fc1 -> ReLU -> fc2 -> sigmoid
    # mean(acc2*s2 + b2) == mean(acc2)*s2 + b2, so pool acc2 directly.
    pooled = jnp.sum(acc2, axis=0, keepdims=True) * (1.0 / HW)    # (1, C)
    pooled = pooled * s2_ref[...] + b2_ref[...]
    hidden = jnp.maximum(
        jnp.dot(pooled, sew1_ref[...], preferred_element_type=jnp.float32), 0.0)
    gate = jax.nn.sigmoid(
        jnp.dot(hidden, sew2_ref[...], preferred_element_type=jnp.float32))   # (1, C)

    # ---- bn2 + SE scale folded into one per-channel affine, + residual + ReLU
    eff_s = s2_ref[...] * gate                                    # (1, C)
    eff_b = b2_ref[...] * gate
    resid = xp[1:1 + H, 1:1 + W, :].reshape(HW, C)                # residual = x
    o_ref[...] = jnp.maximum(acc2 * eff_s + eff_b + resid, 0.0).astype(o_ref.dtype)


@jax.jit
def se_basic_block(x_nchw,
                   conv1_w, bn1_scale, bn1_bias,
                   conv2_w, bn2_scale, bn2_bias,
                   se_w1, se_w2):
    """SEBasicBlock forward (stride=1, no downsample, inference-mode BN).

    x_nchw         : [N, C, H, W]        (PyTorch layout)
    conv*_w        : [Cout, Cin, 3, 3]   (PyTorch conv weight layout)
    bn*_scale/bias : [C]  folded BN: scale = gamma/sqrt(var+eps),
                           bias = beta - mean*scale
    se_w1          : [C, C//r]  (fc1 weight transposed: y = pooled @ se_w1)
    se_w2          : [C//r, C]  (fc2 weight transposed)
    Returns        : [N, C, H, W]
    """
    N, C, H, W = x_nchw.shape
    if conv1_w.shape[0] != C:
        raise NotImplementedError("downsample=None requires inplanes == planes")
    Cr = se_w1.shape[1]

    # NCHW -> NHWC + zero pad (channels live on the lane axis inside the kernel).
    x_nhwc = jnp.transpose(x_nchw, (0, 2, 3, 1)).astype(jnp.float32)
    x_pad = jnp.pad(x_nhwc, ((0, 0), (1, 1), (1, 1), (0, 0)))

    # Conv weights [Cout, Cin, 3, 3] -> [(kh*kw)*Cin, Cout], bf16 for the MXU.
    w1 = jnp.transpose(conv1_w, (2, 3, 1, 0)).reshape(9 * C, C).astype(jnp.bfloat16)
    w2 = jnp.transpose(conv2_w, (2, 3, 1, 0)).reshape(9 * C, C).astype(jnp.bfloat16)

    s1 = bn1_scale.reshape(1, C).astype(jnp.float32)
    b1 = bn1_bias.reshape(1, C).astype(jnp.float32)
    s2 = bn2_scale.reshape(1, C).astype(jnp.float32)
    b2 = bn2_bias.reshape(1, C).astype(jnp.float32)
    sew1 = se_w1.astype(jnp.float32)
    sew2 = se_w2.astype(jnp.float32)

    flops = (4 * N * H * W * (9 * C) * C      # two 3x3 convs as matmuls
             + 4 * N * C * Cr                 # SE fc1 + fc2
             + 8 * N * H * W * C)             # epilogue elementwise
    bytes_accessed = ((x_pad.size + N * H * W * C + 4 * C) * 4
                      + (w1.size + w2.size) * 2
                      + (sew1.size + sew2.size) * 4)
    cost = pl.CostEstimate(flops=flops,
                           transcendentals=N * C,
                           bytes_accessed=bytes_accessed)

    out_flat = pl.pallas_call(
        _se_basic_block_kernel,
        out_shape=jax.ShapeDtypeStruct((N, H * W, C), jnp.float32),
        grid=(N,),
        in_specs=[
            pl.BlockSpec((None, H + 2, W + 2, C), lambda n: (n, 0, 0, 0)),
            pl.BlockSpec((9 * C, C), lambda n: (0, 0)),
            pl.BlockSpec((1, C), lambda n: (0, 0)),
            pl.BlockSpec((1, C), lambda n: (0, 0)),
            pl.BlockSpec((9 * C, C), lambda n: (0, 0)),
            pl.BlockSpec((1, C), lambda n: (0, 0)),
            pl.BlockSpec((1, C), lambda n: (0, 0)),
            pl.BlockSpec((C, Cr), lambda n: (0, 0)),
            pl.BlockSpec((Cr, C), lambda n: (0, 0)),
        ],
        out_specs=pl.BlockSpec((None, H * W, C), lambda n: (n, 0, 0)),
        scratch_shapes=[pltpu.VMEM((H + 2, W + 2, C), jnp.float32)],
        compiler_params=pltpu.CompilerParams(
            dimension_semantics=("parallel",)),
        cost_estimate=cost,
    )(x_pad, w1, s1, b1, w2, s2, b2, sew1, sew2)

    # (N, H*W, C) -> NCHW (glue).
    return jnp.transpose(out_flat.reshape(N, H, W, C), (0, 3, 1, 2))


def _reference(x, conv1_w, bn1_scale, bn1_bias, conv2_w, bn2_scale, bn2_bias,
               se_w1, se_w2):
    """Pure-JAX (XLA) reference of the same forward pass, in f32."""
    dn = jax.lax.conv_dimension_numbers(x.shape, conv1_w.shape,
                                        ("NCHW", "OIHW", "NCHW"))
    hi = jax.lax.Precision.HIGHEST
    out = jax.lax.conv_general_dilated(x, conv1_w, (1, 1), ((1, 1), (1, 1)),
                                       dimension_numbers=dn, precision=hi)
    out = jnp.maximum(out * bn1_scale[None, :, None, None]
                      + bn1_bias[None, :, None, None], 0.0)
    out = jax.lax.conv_general_dilated(out, conv2_w, (1, 1), ((1, 1), (1, 1)),
                                       dimension_numbers=dn, precision=hi)
    out = out * bn2_scale[None, :, None, None] + bn2_bias[None, :, None, None]
    pooled = jnp.mean(out, axis=(2, 3))                           # (N, C)
    hidden = jnp.maximum(jnp.dot(pooled, se_w1, precision=hi), 0.0)
    gate = jax.nn.sigmoid(jnp.dot(hidden, se_w2, precision=hi))   # (N, C)
    out = out * gate[:, :, None, None]
    return jnp.maximum(out + x, 0.0)


def _make_params(inplanes, planes, reduction, key):
    """Deterministic synthetic parameters matching SEBasicBlock.__init__ shapes."""
    k1, k2, k3, k4 = jax.random.split(key, 4)
    eps = 1e-5
    hidden = planes // reduction

    conv1_w = 0.05 * jax.random.normal(k1, (planes, inplanes, 3, 3), jnp.float32)
    conv2_w = 0.05 * jax.random.normal(k2, (planes, planes, 3, 3), jnp.float32)

    # BatchNorm2d params (inference mode), deterministic non-trivial values.
    c_idx = jnp.arange(planes, dtype=jnp.float32)
    gamma1 = 1.0 + 0.01 * c_idx
    beta1 = 0.02 * c_idx
    mean1 = 0.005 * c_idx
    var1 = 1.0 + 0.03 * c_idx
    gamma2 = 1.0 - 0.005 * c_idx
    beta2 = -0.01 * c_idx
    mean2 = -0.002 * c_idx
    var2 = 0.8 + 0.02 * c_idx

    bn1_scale = gamma1 / jnp.sqrt(var1 + eps)
    bn1_bias = beta1 - mean1 * bn1_scale
    bn2_scale = gamma2 / jnp.sqrt(var2 + eps)
    bn2_bias = beta2 - mean2 * bn2_scale

    # SE fc weights (nn.Linear stores [out, in]; kernel uses transposed form).
    fc1_w = 0.1 * jax.random.normal(k3, (hidden, planes), jnp.float32)
    fc2_w = 0.1 * jax.random.normal(k4, (planes, hidden), jnp.float32)
    se_w1 = fc1_w.T   # [C, C//r]
    se_w2 = fc2_w.T   # [C//r, C]

    return (conv1_w, bn1_scale, bn1_bias,
            conv2_w, bn2_scale, bn2_bias,
            se_w1, se_w2)


if __name__ == "__main__":
    N, C, H, W = 2, 32, 16, 16        # inplanes = planes = 32, reduction = 16
    reduction = 16

    key = jax.random.PRNGKey(0)
    kx, kp = jax.random.split(key)
    x = jax.random.normal(kx, (N, C, H, W), jnp.float32)
    params = _make_params(C, C, reduction, kp)

    out = se_basic_block(x, *params)
    out = jax.block_until_ready(out)

    assert out.shape == (N, C, H, W)
    assert bool(jnp.all(jnp.isfinite(out)))
    assert bool(jnp.all(out >= 0.0))          # final ReLU

    ref = _reference(x, *params)
    max_err = float(jnp.max(jnp.abs(out - ref)))
    assert max_err < 8e-2, f"max abs error vs reference too large: {max_err}"

    print("KERNEL_OK")
</pallas_src>

<mosaic_0001>
module attributes {stable_mosaic.version = 11 : i64} {
  func.func @_se_basic_block_kernel(%arg0: i32, %arg1: memref<1x18x18x32xf32, #tpu.memory_space<vmem>>, %arg2: memref<288x32xbf16, #tpu.memory_space<vmem>>, %arg3: memref<1x32xf32, #tpu.memory_space<vmem>>, %arg4: memref<1x32xf32, #tpu.memory_space<vmem>>, %arg5: memref<288x32xbf16, #tpu.memory_space<vmem>>, %arg6: memref<1x32xf32, #tpu.memory_space<vmem>>, %arg7: memref<1x32xf32, #tpu.memory_space<vmem>>, %arg8: memref<32x2xf32, #tpu.memory_space<vmem>>, %arg9: memref<2x32xf32, #tpu.memory_space<vmem>>, %arg10: memref<1x256x32xf32, #tpu.memory_space<vmem>>, %arg11: memref<18x18x32xf32, #tpu.memory_space<vmem>>) attributes {dimension_semantics = [#tpu.dimension_semantics<parallel>], iteration_bounds = array<i64: 2>, scalar_prefetch = 0 : i64, scratch_operands = 1 : i64, tpu.core_type = #tpu.core_type<tc>, window_params = [{transform_indices = @transform_0, window_bounds = array<i64: 1, 18, 18, 32>}, {pipeline_mode = #tpu.pipeline_mode<synchronous>, transform_indices = @transform_1, window_bounds = array<i64: 288, 32>}, {pipeline_mode = #tpu.pipeline_mode<synchronous>, transform_indices = @transform_2, window_bounds = array<i64: 1, 32>}, {pipeline_mode = #tpu.pipeline_mode<synchronous>, transform_indices = @transform_3, window_bounds = array<i64: 1, 32>}, {pipeline_mode = #tpu.pipeline_mode<synchronous>, transform_indices = @transform_4, window_bounds = array<i64: 288, 32>}, {pipeline_mode = #tpu.pipeline_mode<synchronous>, transform_indices = @transform_5, window_bounds = array<i64: 1, 32>}, {pipeline_mode = #tpu.pipeline_mode<synchronous>, transform_indices = @transform_6, window_bounds = array<i64: 1, 32>}, {pipeline_mode = #tpu.pipeline_mode<synchronous>, transform_indices = @transform_7, window_bounds = array<i64: 32, 2>}, {pipeline_mode = #tpu.pipeline_mode<synchronous>, transform_indices = @transform_8, window_bounds = array<i64: 2, 32>}, {transform_indices = @transform_9, window_bounds = array<i64: 1, 256, 32>}]} {
    %c0 = arith.constant 0 : index
    %c0_0 = arith.constant 0 : index
    %c0_1 = arith.constant 0 : index
    %c0_2 = arith.constant 0 : index
    %0 = vector.load %arg1[%c0, %c0_0, %c0_1, %c0_2] : memref<1x18x18x32xf32, #tpu.memory_space<vmem>>, vector<1x18x18x32xf32>
    %1 = vector.shape_cast %0 : vector<1x18x18x32xf32> to vector<18x18x32xf32>
    %2 = vector.extract_strided_slice %1 {offsets = [0, 0, 0], sizes = [16, 16, 32], strides = [1, 1, 1]} : vector<18x18x32xf32> to vector<16x16x32xf32>
    %3 = vector.shape_cast %2 : vector<16x16x32xf32> to vector<256x32xf32>
    %4 = vector.extract_strided_slice %1 {offsets = [0, 1, 0], sizes = [16, 16, 32], strides = [1, 1, 1]} : vector<18x18x32xf32> to vector<16x16x32xf32>
    %5 = vector.shape_cast %4 : vector<16x16x32xf32> to vector<256x32xf32>
    %6 = vector.extract_strided_slice %1 {offsets = [0, 2, 0], sizes = [16, 16, 32], strides = [1, 1, 1]} : vector<18x18x32xf32> to vector<16x16x32xf32>
    %7 = vector.shape_cast %6 : vector<16x16x32xf32> to vector<256x32xf32>
    %8 = vector.extract_strided_slice %1 {offsets = [1, 0, 0], sizes = [16, 16, 32], strides = [1, 1, 1]} : vector<18x18x32xf32> to vector<16x16x32xf32>
    %9 = vector.shape_cast %8 : vector<16x16x32xf32> to vector<256x32xf32>
    %10 = vector.extract_strided_slice %1 {offsets = [1, 1, 0], sizes = [16, 16, 32], strides = [1, 1, 1]} : vector<18x18x32xf32> to vector<16x16x32xf32>
    %11 = vector.shape_cast %10 : vector<16x16x32xf32> to vector<256x32xf32>
    %12 = vector.extract_strided_slice %1 {offsets = [1, 2, 0], sizes = [16, 16, 32], strides = [1, 1, 1]} : vector<18x18x32xf32> to vector<16x16x32xf32>
    %13 = vector.shape_cast %12 : vector<16x16x32xf32> to vector<256x32xf32>
    %14 = vector.extract_strided_slice %1 {offsets = [2, 0, 0], sizes = [16, 16, 32], strides = [1, 1, 1]} : vector<18x18x32xf32> to vector<16x16x32xf32>
    %15 = vector.shape_cast %14 : vector<16x16x32xf32> to vector<256x32xf32>
    %16 = vector.extract_strided_slice %1 {offsets = [2, 1, 0], sizes = [16, 16, 32], strides = [1, 1, 1]} : vector<18x18x32xf32> to vector<16x16x32xf32>
    %17 = vector.shape_cast %16 : vector<16x16x32xf32> to vector<256x32xf32>
    %18 = vector.extract_strided_slice %1 {offsets = [2, 2, 0], sizes = [16, 16, 32], strides = [1, 1, 1]} : vector<18x18x32xf32> to vector<16x16x32xf32>
    %19 = vector.shape_cast %18 : vector<16x16x32xf32> to vector<256x32xf32>
    %20 = tpu.concatenate %3, %5, %7, %9, %11, %13, %15, %17, %19 in 1 : vector<256x32xf32>, vector<256x32xf32>, vector<256x32xf32>, vector<256x32xf32>, vector<256x32xf32>, vector<256x32xf32>, vector<256x32xf32>, vector<256x32xf32>, vector<256x32xf32> -> vector<256x288xf32>
    %21 = arith.truncf %20 : vector<256x288xf32> to vector<256x288xbf16>
    %c0_3 = arith.constant 0 : index
    %c0_4 = arith.constant 0 : index
    %22 = vector.load %arg2[%c0_3, %c0_4] : memref<288x32xbf16, #tpu.memory_space<vmem>>, vector<288x32xbf16>
    %cst = arith.constant dense<0.000000e+00> : vector<256x32xf32>
    %23 = tpu.matmul %21, %22, %cst {dimension_numbers = #tpu.dot_dimension_numbers<[1], [0], [0], [1], [0, 0, 1, 1], [], []>} : vector<256x288xbf16>, vector<288x32xbf16>, vector<256x32xf32> -> vector<256x32xf32>
    %c0_5 = arith.constant 0 : index
    %c0_6 = arith.constant 0 : index
    %24 = vector.load %arg3[%c0_5, %c0_6] : memref<1x32xf32, #tpu.memory_space<vmem>>, vector<1x32xf32>
    %25 = vector.broadcast %24 : vector<1x32xf32> to vector<256x32xf32>
    %26 = arith.mulf %23, %25 : vector<256x32xf32>
    %c0_7 = arith.constant 0 : index
    %c0_8 = arith.constant 0 : index
    %27 = vector.load %arg4[%c0_7, %c0_8] : memref<1x32xf32, #tpu.memory_space<vmem>>, vector<1x32xf32>
    %28 = vector.broadcast %27 : vector<1x32xf32> to vector<256x32xf32>
    %29 = arith.addf %26, %28 : vector<256x32xf32>
    %cst_9 = arith.constant 0.000000e+00 : f32
    %30 = vector.broadcast %cst_9 : f32 to vector<256x32xf32>
    %31 = arith.maximumf %29, %30 : vector<256x32xf32>
    %cst_10 = arith.constant 0.000000e+00 : f32
    %32 = vector.broadcast %cst_10 : f32 to vector<1x18x32xf32>
    %cst_11 = arith.constant 0.000000e+00 : f32
    %33 = vector.broadcast %cst_11 : f32 to vector<18x1x32xf32>
    %c0_12 = arith.constant 0 : index
    %c0_13 = arith.constant 0 : index
    %c0_14 = arith.constant 0 : index
    %34 = vector.load %arg11[%c0_12, %c0_13, %c0_14] : memref<18x18x32xf32, #tpu.memory_space<vmem>>, vector<1x18x32xf32>
    tpu.vector_store %arg11[%c0_12, %c0_13, %c0_14], %32 {strides = array<i32>} : memref<18x18x32xf32, #tpu.memory_space<vmem>>, vector<1x18x32xf32>,
    %c17 = arith.constant 17 : index
    %c0_15 = arith.constant 0 : index
    %c0_16 = arith.constant 0 : index
    %35 = vector.load %arg11[%c17, %c0_15, %c0_16] : memref<18x18x32xf32, #tpu.memory_space<vmem>>, vector<1x18x32xf32>
    tpu.vector_store %arg11[%c17, %c0_15, %c0_16], %32 {strides = array<i32>} : memref<18x18x32xf32, #tpu.memory_space<vmem>>, vector<1x18x32xf32>,
    %c0_17 = arith.constant 0 : index
    %c0_18 = arith.constant 0 : index
    %c0_19 = arith.constant 0 : index
    %36 = vector.load %arg11[%c0_17, %c0_18, %c0_19] : memref<18x18x32xf32, #tpu.memory_space<vmem>>, vector<18x1x32xf32>
    tpu.vector_store %arg11[%c0_17, %c0_18, %c0_19], %33 {strides = array<i32>} : memref<18x18x32xf32, #tpu.memory_space<vmem>>, vector<18x1x32xf32>,
    %c0_20 = arith.constant 0 : index
    %c17_21 = arith.constant 17 : index
    %c0_22 = arith.constant 0 : index
    %37 = vector.load %arg11[%c0_20, %c17_21, %c0_22] : memref<18x18x32xf32, #tpu.memory_space<vmem>>, vector<18x1x32xf32>
    tpu.vector_store %arg11[%c0_20, %c17_21, %c0_22], %33 {strides = array<i32>} : memref<18x18x32xf32, #tpu.memory_space<vmem>>, vector<18x1x32xf32>,
    %38 = vector.shape_cast %31 : vector<256x32xf32> to vector<16x16x32xf32>
    %c1 = arith.constant 1 : index
    %c1_23 = arith.constant 1 : index
    %c0_24 = arith.constant 0 : index
    %39 = vector.load %arg11[%c1, %c1_23, %c0_24] : memref<18x18x32xf32, #tpu.memory_space<vmem>>, vector<16x16x32xf32>
    tpu.vector_store %arg11[%c1, %c1_23, %c0_24], %38 {strides = array<i32>} : memref<18x18x32xf32, #tpu.memory_space<vmem>>, vector<16x16x32xf32>,
    %c0_25 = arith.constant 0 : index
    %c0_26 = arith.constant 0 : index
    %c0_27 = arith.constant 0 : index
    %40 = vector.load %arg11[%c0_25, %c0_26, %c0_27] : memref<18x18x32xf32, #tpu.memory_space<vmem>>, vector<16x16x32xf32>
    %41 = vector.shape_cast %40 : vector<16x16x32xf32> to vector<256x32xf32>
    %c0_28 = arith.constant 0 : index
    %c1_29 = arith.constant 1 : index
    %c0_30 = arith.constant 0 : index
    %42 = vector.load %arg11[%c0_28, %c1_29, %c0_30] : memref<18x18x32xf32, #tpu.memory_space<vmem>>, vector<16x16x32xf32>
    %43 = vector.shape_cast %42 : vector<16x16x32xf32> to vector<256x32xf32>
    %c0_31 = arith.constant 0 : index
    %c2 = arith.constant 2 : index
    %c0_32 = arith.constant 0 : index
    %44 = vector.load %arg11[%c0_31, %c2, %c0_32] : memref<18x18x32xf32, #tpu.memory_space<vmem>>, vector<16x16x32xf32>
    %45 = vector.shape_cast %44 : vector<16x16x32xf32> to vector<256x32xf32>
    %c1_33 = arith.constant 1 : index
    %c0_34 = arith.constant 0 : index
    %c0_35 = arith.constant 0 : index
    %46 = vector.load %arg11[%c1_33, %c0_34, %c0_35] : memref<18x18x32xf32, #tpu.memory_space<vmem>>, vector<16x16x32xf32>
    %47 = vector.shape_cast %46 : vector<16x16x32xf32> to vector<256x32xf32>
    %c1_36 = arith.constant 1 : index
    %c1_37 = arith.constant 1 : index
    %c0_38 = arith.constant 0 : index
    %48 = vector.load %arg11[%c1_36, %c1_37, %c0_38] : memref<18x18x32xf32, #tpu.memory_space<vmem>>, vector<16x16x32xf32>
    %49 = vector.shape_cast %48 : vector<16x16x32xf32> to vector<256x32xf32>
    %c1_39 = arith.constant 1 : index
    %c2_40 = arith.constant 2 : index
    %c0_41 = arith.constant 0 : index
    %50 = vector.load %arg11[%c1_39, %c2_40, %c0_41] : memref<18x18x32xf32, #tpu.memory_space<vmem>>, vector<16x16x32xf32>
    %51 = vector.shape_cast %50 : vector<16x16x32xf32> to vector<256x32xf32>
    %c2_42 = arith.constant 2 : index
    %c0_43 = arith.constant 0 : index
    %c0_44 = arith.constant 0 : index
    %52 = vector.load %arg11[%c2_42, %c0_43, %c0_44] : memref<18x18x32xf32, #tpu.memory_space<vmem>>, vector<16x16x32xf32>
    %53 = vector.shape_cast %52 : vector<16x16x32xf32> to vector<256x32xf32>
    %c2_45 = arith.constant 2 : index
    %c1_46 = arith.constant 1 : index
    %c0_47 = arith.constant 0 : index
    %54 = vector.load %arg11[%c2_45, %c1_46, %c0_47] : memref<18x18x32xf32, #tpu.memory_space<vmem>>, vector<16x16x32xf32>
    %55 = vector.shape_cast %54 : vector<16x16x32xf32> to vector<256x32xf32>
    %c2_48 = arith.constant 2 : index
    %c2_49 = arith.constant 2 : index
    %c0_50 = arith.constant 0 : index
    %56 = vector.load %arg11[%c2_48, %c2_49, %c0_50] : memref<18x18x32xf32, #tpu.memory_space<vmem>>, vector<16x16x32xf32>
    %57 = vector.shape_cast %56 : vector<16x16x32xf32> to vector<256x32xf32>
    %58 = tpu.concatenate %41, %43, %45, %47, %49, %51, %53, %55, %57 in 1 : vector<256x32xf32>, vector<256x32xf32>, vector<256x32xf32>, vector<256x32xf32>, vector<256x32xf32>, vector<256x32xf32>, vector<256x32xf32>, vector<256x32xf32>, vector<256x32xf32> -> vector<256x288xf32>
    %59 = arith.truncf %58 : vector<256x288xf32> to vector<256x288xbf16>
    %c0_51 = arith.constant 0 : index
    %c0_52 = arith.constant 0 : index
    %60 = vector.load %arg5[%c0_51, %c0_52] : memref<288x32xbf16, #tpu.memory_space<vmem>>, vector<288x32xbf16>
    %cst_53 = arith.constant dense<0.000000e+00> : vector<256x32xf32>
    %61 = tpu.matmul %59, %60, %cst_53 {dimension_numbers = #tpu.dot_dimension_numbers<[1], [0], [0], [1], [0, 0, 1, 1], [], []>} : vector<256x288xbf16>, vector<288x32xbf16>, vector<256x32xf32> -> vector<256x32xf32>
    %cst_54 = arith.constant dense<0.000000e+00> : vector<32xf32>
    %62 = vector.multi_reduction <add>, %61, %cst_54 [0] : vector<256x32xf32> to vector<32xf32>
    %63 = vector.shape_cast %62 : vector<32xf32> to vector<1x32xf32>
    %cst_55 = arith.constant 3.906250e-03 : f32
    %64 = vector.broadcast %cst_55 : f32 to vector<1x32xf32>
    %65 = arith.mulf %63, %64 : vector<1x32xf32>
    %c0_56 = arith.constant 0 : index
    %c0_57 = arith.constant 0 : index
    %66 = vector.load %arg6[%c0_56, %c0_57] : memref<1x32xf32, #tpu.memory_space<vmem>>, vector<1x32xf32>
    %67 = arith.mulf %65, %66 : vector<1x32xf32>
    %c0_58 = arith.constant 0 : index
    %c0_59 = arith.constant 0 : index
    %68 = vector.load %arg7[%c0_58, %c0_59] : memref<1x32xf32, #tpu.memory_space<vmem>>, vector<1x32xf32>
    %69 = arith.addf %67, %68 : vector<1x32xf32>
    %c0_60 = arith.constant 0 : index
    %c0_61 = arith.constant 0 : index
    %70 = vector.load %arg8[%c0_60, %c0_61] : memref<32x2xf32, #tpu.memory_space<vmem>>, vector<32x2xf32>
    %cst_62 = arith.constant dense<0.000000e+00> : vector<1x2xf32>
    %71 = tpu.matmul %69, %70, %cst_62 {dimension_numbers = #tpu.dot_dimension_numbers<[1], [0], [0], [1], [0, 0, 1, 1], [], []>} : vector<1x32xf32>, vector<32x2xf32>, vector<1x2xf32> -> vector<1x2xf32>
    %cst_63 = arith.constant 0.000000e+00 : f32
    %72 = vector.broadcast %cst_63 : f32 to vector<1x2xf32>
    %73 = arith.maximumf %71, %72 : vector<1x2xf32>
    %c0_64 = arith.constant 0 : index
    %c0_65 = arith.constant 0 : index
    %74 = vector.load %arg9[%c0_64, %c0_65] : memref<2x32xf32, #tpu.memory_space<vmem>>, vector<2x32xf32>
    %cst_66 = arith.constant dense<0.000000e+00> : vector<1x32xf32>
    %75 = tpu.matmul %73, %74, %cst_66 {dimension_numbers = #tpu.dot_dimension_numbers<[1], [0], [0], [1], [0, 0, 1, 1], [], []>} : vector<1x2xf32>, vector<2x32xf32>, vector<1x32xf32> -> vector<1x32xf32>
    %76 = arith.negf %75 : vector<1x32xf32>
    %77 = math.exp %76 : vector<1x32xf32>
    %cst_67 = arith.constant 1.000000e+00 : f32
    %78 = vector.broadcast %cst_67 : f32 to vector<1x32xf32>
    %79 = arith.addf %78, %77 : vector<1x32xf32>
    %80 = arith.divf %78, %79 : vector<1x32xf32>
    %c0_68 = arith.constant 0 : index
    %c0_69 = arith.constant 0 : index
    %81 = vector.load %arg6[%c0_68, %c0_69] : memref<1x32xf32, #tpu.memory_space<vmem>>, vector<1x32xf32>
    %82 = arith.mulf %81, %80 : vector<1x32xf32>
    %c0_70 = arith.constant 0 : index
    %c0_71 = arith.constant 0 : index
    %83 = vector.load %arg7[%c0_70, %c0_71] : memref<1x32xf32, #tpu.memory_space<vmem>>, vector<1x32xf32>
    %84 = arith.mulf %83, %80 : vector<1x32xf32>
    %85 = vector.extract_strided_slice %1 {offsets = [1, 1, 0], sizes = [16, 16, 32], strides = [1, 1, 1]} : vector<18x18x32xf32> to vector<16x16x32xf32>
    %86 = vector.shape_cast %85 : vector<16x16x32xf32> to vector<256x32xf32>
    %87 = vector.broadcast %82 : vector<1x32xf32> to vector<256x32xf32>
    %88 = arith.mulf %61, %87 : vector<256x32xf32>
    %89 = vector.broadcast %84 : vector<1x32xf32> to vector<256x32xf32>
    %90 = arith.addf %88, %89 : vector<256x32xf32>
    %91 = arith.addf %90, %86 : vector<256x32xf32>
    %cst_72 = arith.constant 0.000000e+00 : f32
    %92 = vector.broadcast %cst_72 : f32 to vector<256x32xf32>
    %93 = arith.maximumf %91, %92 : vector<256x32xf32>
    %c0_73 = arith.constant 0 : index
    %c0_74 = arith.constant 0 : index
    %c0_75 = arith.constant 0 : index
    %94 = vector.load %arg10[%c0_73, %c0_74, %c0_75] : memref<1x256x32xf32, #tpu.memory_space<vmem>>, vector<1x256x32xf32>
    %95 = vector.shape_cast %94 : vector<1x256x32xf32> to vector<256x32xf32>
    %96 = vector.shape_cast %93 : vector<256x32xf32> to vector<1x256x32xf32>
    tpu.vector_store %arg10[%c0_73, %c0_74, %c0_75], %96 {strides = array<i32>} : memref<1x256x32xf32, #tpu.memory_space<vmem>>, vector<1x256x32xf32>,
    return
  }
  func.func @transform_0(%arg0: i32) -> (i32, i32, i32, i32) {
    %c0_i32 = arith.constant 0 : i32
    %c0_i32_0 = arith.constant 0 : i32
    %c0_i32_1 = arith.constant 0 : i32
    %c0_i32_2 = arith.constant 0 : i32
    return %arg0, %c0_i32, %c0_i32_0, %c0_i32_1 : i32, i32, i32, i32
  }
  func.func @transform_1(%arg0: i32) -> (i32, i32) {
    %c0_i32 = arith.constant 0 : i32
    %c0_i32_0 = arith.constant 0 : i32
    %c0_i32_1 = arith.constant 0 : i32
    return %c0_i32, %c0_i32_0 : i32, i32
  }
  func.func @transform_2(%arg0: i32) -> (i32, i32) {
    %c0_i32 = arith.constant 0 : i32
    %c0_i32_0 = arith.constant 0 : i32
    %c0_i32_1 = arith.constant 0 : i32
    return %c0_i32, %c0_i32_0 : i32, i32
  }
  func.func @transform_3(%arg0: i32) -> (i32, i32) {
    %c0_i32 = arith.constant 0 : i32
    %c0_i32_0 = arith.constant 0 : i32
    %c0_i32_1 = arith.constant 0 : i32
    return %c0_i32, %c0_i32_0 : i32, i32
  }
  func.func @transform_4(%arg0: i32) -> (i32, i32) {
    %c0_i32 = arith.constant 0 : i32
    %c0_i32_0 = arith.constant 0 : i32
    %c0_i32_1 = arith.constant 0 : i32
    return %c0_i32, %c0_i32_0 : i32, i32
  }
  func.func @transform_5(%arg0: i32) -> (i32, i32) {
    %c0_i32 = arith.constant 0 : i32
    %c0_i32_0 = arith.constant 0 : i32
    %c0_i32_1 = arith.constant 0 : i32
    return %c0_i32, %c0_i32_0 : i32, i32
  }
  func.func @transform_6(%arg0: i32) -> (i32, i32) {
    %c0_i32 = arith.constant 0 : i32
    %c0_i32_0 = arith.constant 0 : i32
    %c0_i32_1 = arith.constant 0 : i32
    return %c0_i32, %c0_i32_0 : i32, i32
  }
  func.func @transform_7(%arg0: i32) -> (i32, i32) {
    %c0_i32 = arith.constant 0 : i32
    %c0_i32_0 = arith.constant 0 : i32
    %c0_i32_1 = arith.constant 0 : i32
    return %c0_i32, %c0_i32_0 : i32, i32
  }
  func.func @transform_8(%arg0: i32) -> (i32, i32) {
    %c0_i32 = arith.constant 0 : i32
    %c0_i32_0 = arith.constant 0 : i32
    %c0_i32_1 = arith.constant 0 : i32
    return %c0_i32, %c0_i32_0 : i32, i32
  }
  func.func @transform_9(%arg0: i32) -> (i32, i32, i32) {
    %c0_i32 = arith.constant 0 : i32
    %c0_i32_0 = arith.constant 0 : i32
    %c0_i32_1 = arith.constant 0 : i32
    return %arg0, %c0_i32, %c0_i32_0 : i32, i32, i32
  }
}

</mosaic_0001>

<bundles_post_ra>
// kernel: se_basic_block.1
= control target key start
LH: loop header
LB: loop body
LE: loop exit
PB: predicated region body
PF: predicated region fallthrough
CT: control target
= control target key end

     0   :  { %14 = vsyncpa [#allocation4], 0  ;;  %s8554_s0 = inlined_call_operand.vmem [shape: f32[2,18,18,32], index: 0, kind: input, shape index: {}]   ;;  %s8555_s1 = inlined_call_operand.vmem [shape: bf16[288,32], index: 1, kind: input, shape index: {}]   ;;  %s8556_s2 = inlined_call_operand.vmem [shape: f32[1,32], index: 2, kind: input, shape index: {}]   ;;  %s8557_s3 = inlined_call_operand.vmem [shape: f32[1,32], index: 3, kind: input, shape index: {}]   ;;  %s8558_s4 = inlined_call_operand.vmem [shape: bf16[288,32], index: 4, kind: input, shape index: {}]   ;;  %s8559_s5 = inlined_call_operand.vmem [shape: f32[1,32], index: 5, kind: input, shape index: {}]   ;;  %s8560_s6 = inlined_call_operand.vmem [shape: f32[1,32], index: 6, kind: input, shape index: {}]   ;;  %s8561_s7 = inlined_call_operand.vmem [shape: f32[32,2], index: 7, kind: input, shape index: {}]   ;;  %s8562_s8 = inlined_call_operand.vmem [shape: f32[2,32], index: 8, kind: input, shape index: {}]   ;;  %s8563_s9 = inlined_call_operand.hbm [shape: f32[2,256,32], index: 9, kind: output, shape index: {}]  }
   0x1   :  { %16 = vsyncpa [#allocation4 + $0x1], 0  ;;  %s5696_s30 = smov 0   ;;  %s5698_s10 = smov 0  }
   0x2   :  { %s5700_s11 = smov 0   ;;  %s5702_s12 = smov 0  }
   0x3 LB: > { %s5717_s13 = sadd.s32 4294967295, %s5638_s12   ;;  %s4298_s14 = sadd.s32 4294967294, %s5638_s12   ;;  %s5638_s12 = sphi %s5702_s12, %s8845_s12   ;;  %s5634_s11 = sphi %s5700_s11, %s8844_s11   ;;  %s5630_s10 = sphi %s5698_s10, %s8843_s10   ;;  %s5626_s30 = sphi %s5696_s30, %s8842_s30  }
   0x4   : > { %s5721_s15 = sadd.s32 1, %s5638_s12   ;;  %s223_s16 = sadd.s32 1, %s5634_s11 }
   0x5   : > { %s220_s17 = ssub.s32 %s5638_s12, %s5721_s15  ;;  %p233_p0 = scmp.ne.s32.totalorder %s5634_s11, %s5630_s10 }
   0x6   : > { %p221_p1 = scmp.eq.s32.totalorder %s220_s17, 0  ;;  %p234_p2 = scmp.eq.s32.totalorder %s5717_s13, 1 }
   0x7   : > { %p239_p3 = scmp.ne.s32.totalorder %s5630_s10, %s5626_s30  ;;  %p240_p4 = scmp.eq.s32.totalorder %s4298_s14, 1 }
   0x8   : > { %s5732_s18 = scalar_select %p221_p1, %s5634_s11, %s223_s16  }
   0x9   : > { %p5734_p5 = por %p234_p2, %p233_p0  ;;  %p5738_p6 = por %p240_p4, %p239_p3 }
   0xa   : > { %p4301_p7 = scmp.ge.s32.totalorder %s5638_s12, 1  ;;  %p290_p8 = scmp.lt.s32.totalorder %s5638_s12, 3 }
   0xc   : > { %p291_p9 = pnand %p4301_p7, %p290_p8 }
   0xe   : > { %294 = sbr.rel (%p291_p9) target bundleno = 1410 (0x582), region = 56 }
  0x13   : > { %p326_p10 = scmp.lt.s32.totalorder %s5717_s13, 1  ;;  %vm434_vm0 = vcmask 1046528   ;;  %s5640_s26 = smov 32   ;;  %vm515_vm1 = vcmask 1045504   ;;  %vm1295_vm2 = vcmask 523264   ;;  %vm1262_vm3 = vcmask 261120  }
  0x14   : > { %s5641_s27 = smov 96   ;;  %s5642_s28 = smov 64   ;;  %vm1328_vm4 = vcmask 785408   ;;  %vm2070_vm5 = vcmask 254976   ;;  %vm2076_vm6 = vcmask 253952   ;;  %vm4009_vm7 = vcmask 1041408  }
  0x15   : > { %s327_s21 = scalar_select %p326_p10, %s5717_s13, 1  ;;  %vm4005_vm8 = vcmask 15360  }
  0x16   : > { %s4525_s14 = sshll.u32 %s5717_s13, 8 }
  0x17   : > { %s4536_s22 = smul.u32 432, %s327_s21  ;;  %s4232_s17 = scalar_lea.hbm %s8563_s9, %s4525_s14 }
  0x18   : > { %s4235_s21 = sshll.u32 %s4232_s17, 4  ;;  %s5596_s14 = scalar_lea.hbm %s8563_s9, 512  ;;  %s4236_s21 = int_to_ptr.hbm [resolvable:$true] %s4235_s21 }
  0x19   : > { %s5749_s25 = scalar_lea.vmem %s8554_s0, %s4536_s22  ;;  %s5590_s23 = sshra.s32 %s4236_s21, 4  ;;  %s5591_s23 = int_to_ptr.hbm [resolvable:$true] %s5590_s23 }
  0x1a   : > { %v5752_v0 = vld [vmem:[%s5749_s25 + $0x60] sm:$0xff]  ;;  %v5755_v1 = vld [vmem:[%s5749_s25 + $0x68] sm:$0xff]  ;;  %v5758_v2 = vld [vmem:[%s5749_s25 + $0x70] sm:$0x3]  ;;  %s5592_s24 = scalar_lea.hbm %s5591_s23, 256  ;;  %p5597_p0 = scmp.lt.s32.totalorder %s5591_s23, %s8563_s9 }
  0x1b   : > { %v455_v3 = vrot.slane %v5752_v0, 1  ;;  %v456_v4 = vrot.slane %v5755_v1, 1  ;;  %v458_v5 = vrot.slane %v5758_v2, 1  ;;  %v5764_v6 = vld [vmem:[%s5749_s25 + $0x30] sm:$0xff]  ;;  %v5767_v7 = vld [vmem:[%s5749_s25 + $0x38] sm:$0xff]  ;;  %v5770_v8 = vld [vmem:[%s5749_s25] sm:$0xff]  ;;  %p5593_p11 = scmp.ne.s32.totalorder %s5591_s23, %s5592_s24  ;;  %p5598_p1 = scmp.lt.s32.totalorder %s5596_s14, %s5592_s24 }
  0x1c   : > { %v5773_v9 = vld [vmem:[%s5749_s25 + $0x40] sm:$0x3]  ;;  %v445_v10 = vrot.slane %v5764_v6, 1  ;;  %v446_v11 = vrot.slane %v5767_v7, 1  ;;  %v5778_v12 = vld [vmem:[%s5749_s25 + $0x8] sm:$0xff]  ;;  %v435_v13 = vrot.slane %v5770_v8, 1 }
  0x1d   : > { %v5782_v14 = vsel %vm434_vm0, %v455_v3, %v456_v4  ;;  %v5785_v15 = vsel %vm434_vm0, %v456_v4, %v458_v5  ;;  %v448_v16 = vrot.slane %v5773_v9, 1  ;;  %v5789_v17 = vld [vmem:[%s5749_s25 + $0x10] sm:$0x3]  ;;  %v436_v18 = vrot.slane %v5778_v12, 1  ;;  %v5793_v19 = vld [vmem:[%s5749_s25 + $0x78] sm:$0xff]  ;;  %v5796_v20 = vld [vmem:[%s5749_s25 + $0x80] sm:$0xff]  ;;  %p5594_p12 = pnand %p5593_p11, %p5734_p5  ;;  %p5599_p2 = por %p5598_p1, %p5597_p0 }
  0x1e   : > { %8664 = vst [vmem:[#allocation6_spill] sm:$0xff] %v5782_v14  ;;  %v5800_v21 = vpack.i.bf16 %v5785_v15, %v5782_v14  ;;  %v5803_v22 = vsel %vm434_vm0, %v445_v10, %v446_v11  ;;  %v438_v23 = vrot.slane %v5789_v17, 1  ;;  %v5807_v24 = vld [vmem:[%s5749_s25 + $0x88] sm:$0x3]  ;;  %v5813_v26 = vld [vmem:[%s5749_s25 + $0x50] sm:$0xff]  ;;  %v460_v29 = vrot.slane %v5793_v19, 1 }
  0x1f   : > { %8665 = vst [vmem:[#allocation7_spill] sm:$0xff] %v5785_v15  ;;  %v5810_v25 = vld [vmem:[%s5749_s25 + $0x48] sm:$0xff]  ;;  %v5816_v27 = vsel %vm434_vm0, %v446_v11, %v448_v16  ;;  %v437_v28 = vsel %vm434_vm0, %v435_v13, %v436_v18  ;;  %v461_v30 = vrot.slane %v5796_v20, 1  ;;  %v5822_v31 = vld [vmem:[%s5749_s25 + $0x58] sm:$0x3]  ;;  %v5828_v33 = vld [vmem:[%s5749_s25 + $0x20] sm:$0xff]  ;;  %p5595_p13 = pneg %p5594_p12 }
  0x20   : > { %8666 = vst [vmem:[#allocation8_spill] sm:$0xff] %v5803_v22  ;;  %v5825_v32 = vld [vmem:[%s5749_s25 + $0x18] sm:$0xff]  ;;  %4603 = vrot.lane.b32.xlu2 %v5800_v21, %s5640_s26  ;;  %v5834_v34 = vpack.i.bf16 %v5816_v27, %v5803_v22  ;;  %v439_v35 = vsel %vm434_vm0, %v436_v18, %v438_v23  ;;  %v463_v36 = vrot.slane %v5807_v24, 1  ;;  %v450_v37 = vrot.slane %v5810_v25, 1  ;;  %v5840_v38 = vld [vmem:[%s5749_s25 + $0x28] sm:$0x3] }
  0x21   : > { %8667 = vst [vmem:[#allocation9_spill] sm:$0xff] %v5816_v27  ;;  %v4582_v39 = vpack.i.bf16 %v439_v35, %v437_v28  ;;  %v5843_v40 = vsel %vm434_vm0, %v460_v29, %v461_v30  ;;  %v451_v41 = vrot.slane %v5813_v26, 1  ;;  %v453_v42 = vrot.slane %v5822_v31, 1  ;;  %v5848_v43 = vld [vmem:[%s5749_s25 + $0xc0] sm:$0xff]  ;;  %v5859_v48 = vld [vmem:[%s5749_s25 + $0xc8] sm:$0xff]  ;;  %v5883_v56 = vld [vmem:[%s5749_s25 + $0xb0] sm:$0xff]  ;;  %p5600_p3 = pnand %p5599_p2, %p5595_p13 }
  0x22   : > { %8668 = vst [vmem:[#allocation10_spill] sm:$0xff] %v5843_v40  ;;  %4593 = vrot.lane.b32.xlu1 %v5834_v34, %s5640_s26  ;;  %v5853_v44 = vsel %vm434_vm0, %v461_v30, %v463_v36  ;;  %v440_v45 = vrot.slane %v5825_v32, 1  ;;  %v441_v46 = vrot.slane %v5828_v33, 1  ;;  %v443_v47 = vrot.slane %v5840_v38, 1  ;;  %v358_v49 = vld [vmem:[%s5749_s25 + $0xd0] sm:$0x3] }
  0x23   : > { %8669 = vst [vmem:[#allocation11_spill] sm:$0xff] %v5853_v44  ;;  %4583 = vrot.lane.b32.xlu0 %v4582_v39, %s5640_s26  ;;  %v5864_v50 = vsel %vm434_vm0, %v450_v37, %v451_v41  ;;  %v5867_v51 = vsel %vm434_vm0, %v451_v41, %v453_v42  ;;  %v5870_v52 = vld [vmem:[%s5749_s25 + $0xa8] sm:$0xff]  ;;  %v5874_v53 = vpack.i.bf16 %v5853_v44, %v5843_v40  ;;  %v5886_v57 = vld [vmem:[%s5749_s25 + $0xb8] sm:$0x3]  ;;  %v5889_v58 = vld [vmem:[%s5749_s25 + $0x90] sm:$0xff]  ;;  %v475_v59 = vrot.slane %v5848_v43, 1 }
  0x24   : > { %8670 = vst [vmem:[#allocation12_spill] sm:$0xff] %v5864_v50  ;;  %v5877_v54 = vsel %vm434_vm0, %v440_v45, %v441_v46  ;;  %v5880_v55 = vsel %vm434_vm0, %v441_v46, %v443_v47  ;;  %v476_v60 = vrot.slane %v5859_v48, 1  ;;  %v478_v61 = vrot.slane %v358_v49, 1  ;;  %v5894_v62 = vld [vmem:[%s5749_s25 + $0x98] sm:$0xff]  ;;  %v5897_v63 = vld [vmem:[%s5749_s25 + $0xa0] sm:$0x3] }
  0x25   : > { %8671 = vst [vmem:[#allocation13_spill] sm:$0xff] %v5867_v51  ;;  %v5901_v3 = vpack.i.bf16 %v5867_v51, %v5864_v50  ;;  %v4587_v4 = vpack.i.bf16 %v5880_v55, %v5877_v54  ;;  %v470_v5 = vrot.slane %v5870_v52, 1  ;;  %v471_v10 = vrot.slane %v5883_v56, 1  ;;  %v5939_v39 = vld [vmem:[%s5749_s25 + $0xd8] sm:$0xff]  ;;  %v5942_v41 = vld [vmem:[%s5749_s25 + $0xe0] sm:$0xff] }
  0x26   : > { %8672 = vst [vmem:[#allocation14_spill] sm:$0xff] %v5877_v54  ;;  %v473_v11 = vrot.slane %v5886_v57, 1  ;;  %v465_v13 = vrot.slane %v5889_v58, 1  ;;  %v466_v16 = vrot.slane %v5894_v62, 1  ;;  %v468_v18 = vrot.slane %v5897_v63, 1 }
  0x27   : > { %8673 = vst [vmem:[#allocation15_spill] sm:$0xff] %v5880_v55  ;;  %v5914_v23 = vsel %vm434_vm0, %v475_v59, %v476_v60  ;;  %v5917_v28 = vsel %vm434_vm0, %v476_v60, %v478_v61  ;;  %v5923_v29 = vsel %vm434_vm0, %v470_v5, %v471_v10  ;;  %v361_v42 = vld [vmem:[%s5749_s25 + $0xe8] sm:$0x3]  ;;  %v556_v47 = vrot.slane %v5848_v43, 2  ;;  %v6126_v55 = vld [vmem:[%s5749_s25 + $0x150] sm:$0xff] }
  0x28   : > { %4608 = vrot.lane.b32.xlu2 %v5874_v53, %s5640_s26  ;;  %8674 = vst [vmem:[#allocation16_spill] sm:$0xff] %v5914_v23  ;;  %v5926_v30 = vsel %vm434_vm0, %v471_v10, %v473_v11  ;;  %v5930_v35 = vpack.i.bf16 %v5917_v28, %v5914_v23  ;;  %v5933_v36 = vsel %vm434_vm0, %v465_v13, %v466_v16  ;;  %v557_v59 = vrot.slane %v5859_v48, 2  ;;  %v5983_v23 = vld [vmem:[%s5749_s25 + $0xf8] sm:$0xff] }
  0x29   : > { %8675 = vst [vmem:[#allocation17_spill] sm:$0xff] %v5917_v28  ;;  %v5936_v37 = vsel %vm434_vm0, %v466_v16, %v468_v18  ;;  %v5947_v45 = vpack.i.bf16 %v5926_v30, %v5923_v29  ;;  %v559_v60 = vrot.slane %v358_v49, 2  ;;  %v480_v61 = vrot.slane %v5939_v39, 1  ;;  %v5980_v18 = vld [vmem:[%s5749_s25 + $0xf0] sm:$0xff] }
  0x2a   : > { %4598 = vrot.lane.b32.xlu1 %v5901_v3, %s5640_s26  ;;  %8676 = vst [vmem:[#allocation18_spill] sm:$0xff] %v5923_v29  ;;  %v5951_v46 = vpack.i.bf16 %v5936_v37, %v5933_v36  ;;  %v483_v5 = vrot.slane %v361_v42, 1  ;;  %v5964_v10 = vsel %vm515_vm1, %v556_v47, %v557_v59  ;;  %v5971_v11 = vpack.i.bf16 %v5942_v41, %v5939_v39  ;;  %v364_v47 = vld [vmem:[%s5749_s25 + $0x100] sm:$0x3] }
  0x2b   : > { %4588 = vrot.lane.b32.xlu0 %v4587_v4, %s5640_s26  ;;  %8677 = vst [vmem:[#allocation19_spill] sm:$0xff] %v5926_v30  ;;  %v481_v4 = vrot.slane %v5942_v41, 1  ;;  %v5967_v49 = vsel %vm515_vm1, %v557_v59, %v559_v60  ;;  %v485_v28 = vrot.slane %v5980_v18, 1  ;;  %v486_v29 = vrot.slane %v5983_v23, 1 }
  0x2c   : > { %8678 = vst [vmem:[#allocation20_spill] sm:$0xff] %v5933_v36  ;;  %v5988_v59 = vpack.i.bf16 %v5967_v49, %v5964_v10  ;;  %v488_v30 = vrot.slane %v364_v47, 1  ;;  %v367_v36 = vld [vmem:[%s5749_s25 + $0x118] sm:$0x3] }
  0x2d   : > { %8679 = vst [vmem:[#allocation21_spill] sm:$0xff] %v5936_v37  ;;  %v5974_v13 = vsel %vm434_vm0, %v480_v61, %v481_v4  ;;  %v5977_v16 = vsel %vm434_vm0, %v481_v4, %v483_v5  ;;  %v561_v61 = vrot.slane %v5939_v39, 2  ;;  %v562_v4 = vrot.slane %v5942_v41, 2 }
  0x2e   : > { %8680 = vst [vmem:[#allocation22_spill] sm:$0xff] %v5964_v10  ;;  %v5992_v60 = vpack.i.bf16 %v5977_v16, %v5974_v13  ;;  %v564_v5 = vrot.slane %v361_v42, 2  ;;  %v6022_v10 = vsel %vm434_vm0, %v485_v28, %v486_v29  ;;  %v6025_v40 = vsel %vm434_vm0, %v486_v29, %v488_v30 }
  0x2f   : > { %8681 = vst [vmem:[#allocation23_spill] sm:$0xff] %v5967_v49  ;;  %v6012_v42 = vsel %vm515_vm1, %v561_v61, %v562_v4  ;;  %v6019_v49 = vpack.i.bf16 %v5983_v23, %v5980_v18  ;;  %v493_v14 = vrot.slane %v367_v36, 1  ;;  %v566_v28 = vrot.slane %v5980_v18, 2 }
  0x30   : > { %4623 = vrot.lane.b32.xlu2 %v5930_v35, %s5640_s26  ;;  %8682 = vst [vmem:[#allocation24_spill] sm:$0xff] %v5974_v13  ;;  %v6003_v13 = vld [vmem:[%s5749_s25 + $0x108] sm:$0xff]  ;;  %v6015_v37 = vsel %vm515_vm1, %v562_v4, %v564_v5  ;;  %v6035_v5 = vpack.i.bf16 %v6025_v40, %v6022_v10  ;;  %v567_v29 = vrot.slane %v5983_v23, 2  ;;  %v569_v30 = vrot.slane %v364_v47, 2 }
  0x31   : > { %8683 = vst [vmem:[#allocation25_spill] sm:$0xff] %v5977_v16  ;;  %v6006_v16 = vld [vmem:[%s5749_s25 + $0x110] sm:$0xff]  ;;  %v490_v44 = vrot.slane %v6003_v13, 1  ;;  %v6031_v4 = vpack.i.bf16 %v6015_v37, %v6012_v42 }
  0x32   : > { %4618 = vrot.lane.b32.xlu1 %v5947_v45, %s5640_s26  ;;  %8684 = vst [vmem:[#allocation26_spill] sm:$0xff] %v5992_v60  ;;  %v491_v61 = vrot.slane %v6006_v16, 1  ;;  %v4662_v27 = vpack.i.bf16 %v6006_v16, %v6003_v13 }
  0x33   : > { %4613 = vrot.lane.b32.xlu0 %v5951_v46, %s5640_s26  ;;  %8685 = vst [vmem:[#allocation27_spill] sm:$0xff] %v6012_v42 }
  0x34   : > { %8686 = vst [vmem:[#allocation28_spill] sm:$0xff] %v6015_v37  ;;  %v6042_v15 = vsel %vm434_vm0, %v490_v44, %v491_v61  ;;  %v6045_v51 = vsel %vm434_vm0, %v491_v61, %v493_v14  ;;  %v6050_v37 = vld [vmem:[%s5749_s25 + $0x120] sm:$0xff]  ;;  %v6063_v14 = vsel %vm515_vm1, %v566_v28, %v567_v29  ;;  %v6066_v44 = vsel %vm515_vm1, %v567_v29, %v569_v30 }
  0x35   : > { %8687 = vst [vmem:[#allocation29_spill] sm:$0xff] %v6019_v49  ;;  %v6060_v47 = vpack.i.bf16 %v6045_v51, %v6042_v15  ;;  %v495_v61 = vrot.slane %v6050_v37, 1  ;;  %v571_v28 = vrot.slane %v6003_v13, 2  ;;  %v572_v29 = vrot.slane %v6006_v16, 2 }
  0x36   : > { %8688 = vst [vmem:[#allocation30_spill] sm:$0xff] %v6022_v10  ;;  %v6053_v10 = vld [vmem:[%s5749_s25 + $0x128] sm:$0xff]  ;;  %v574_v30 = vrot.slane %v367_v36, 2 }
  0x37   : > { %8689 = vst [vmem:[#allocation31_spill] sm:$0xff] %v6025_v40  ;;  %v370_v40 = vld [vmem:[%s5749_s25 + $0x130] sm:$0x3]  ;;  %v496_v42 = vrot.slane %v6053_v10, 1 }
  0x38   : > { %4638 = vrot.lane.b32.xlu2 %v5971_v11, %s5641_s27  ;;  %8690 = vst [vmem:[#allocation32_spill] sm:$0xff] %v6031_v4  ;;  %v498_v50 = vrot.slane %v370_v40, 1 }
  0x39   : > { %8691 = vst [vmem:[#allocation33_spill] sm:$0xff] %v6035_v5 }
  0x3a   : > { %4633 = vrot.lane.b32.xlu1 %v5988_v59, %s5642_s28  ;;  %8692 = vst [vmem:[#allocation34_spill] sm:$0xff] %v6042_v15  ;;  %v6074_v15 = vpack.i.bf16 %v6066_v44, %v6063_v14  ;;  %v6084_v22 = vsel %vm434_vm0, %v496_v42, %v498_v50 }
  0x3b   : > { %4628 = vrot.lane.b32.xlu0 %v5992_v60, %s5640_s26  ;;  %8693 = vst [vmem:[#allocation35_spill] sm:$0xff] %v6045_v51  ;;  %v6081_v51 = vsel %vm434_vm0, %v495_v61, %v496_v42  ;;  %v6101_v61 = vsel %vm515_vm1, %v571_v28, %v572_v29  ;;  %v576_v28 = vrot.slane %v6050_v37, 2 }
  0x3c   : > { %8694 = vst [vmem:[#allocation36_spill] sm:$0xff] %v6060_v47  ;;  %v6098_v36 = vpack.i.bf16 %v6084_v22, %v6081_v51 }
  0x3d   : > { %8695 = vst [vmem:[#allocation37_spill] sm:$0xff] %v6063_v14  ;;  %v373_v14 = vld [vmem:[%s5749_s25 + $0x148] sm:$0x3] }
  0x3e   : > { %8696 = vst [vmem:[#allocation38_spill] sm:$0xff] %v6066_v44  ;;  %v6091_v44 = vld [vmem:[%s5749_s25 + $0x140] sm:$0xff] }
  0x3f   : > { %8697 = vst [vmem:[#allocation39_spill] sm:$0xff] %v6074_v15  ;;  %v501_v42 = vrot.slane %v6091_v44, 1 }
  0x40   : > { %4653 = vrot.lane.b32.xlu2 %v6019_v49, %s5641_s27  ;;  %8698 = vst [vmem:[#allocation40_spill] sm:$0xff] %v6081_v51  ;;  %v6164_v49 = vld [vmem:[%s5749_s25 + $0x168] sm:$0xff] }
  0x41   : > { %8699 = vst [vmem:[#allocation41_spill] sm:$0xff] %v6084_v22 }
  0x42   : > { %4648 = vrot.lane.b32.xlu1 %v6031_v4, %s5642_s28  ;;  %8700 = vst [vmem:[#allocation42_spill] sm:$0xff] %v6098_v36 }
  0x43   : > { %4643 = vrot.lane.b32.xlu0 %v6035_v5, %s5640_s26  ;;  %v6088_v5 = vld [vmem:[%s5749_s25 + $0x138] sm:$0xff]  ;;  %8701 = vst [vmem:[#allocation43_spill] sm:$0xff] %v6101_v61 }
  0x44   : > { %v500_v50 = vrot.slane %v6088_v5, 1 }
  0x46   : > { %v6119_v51 = vsel %vm434_vm0, %v500_v50, %v501_v42 }
  0x47   : > { %8704 = vst [vmem:[#allocation46_spill] sm:$0xff] %v6119_v51 }
  0x48   : > { %4668 = vrot.lane.b32.xlu2 %v6060_v47, %s5640_s26  ;;  %v503_v47 = vrot.slane %v373_v14, 1 }
  0x4a   : > { %4663 = vrot.lane.b32.xlu1 %v4662_v27, %s5641_s27  ;;  %v6104_v27 = vsel %vm515_vm1, %v572_v29, %v574_v30  ;;  %v577_v29 = vrot.slane %v6053_v10, 2  ;;  %v579_v30 = vrot.slane %v370_v40, 2  ;;  %v6122_v54 = vsel %vm434_vm0, %v501_v42, %v503_v47 }
  0x4b   : > { %4658 = vrot.lane.b32.xlu0 %v6074_v15, %s5642_s28  ;;  %8702 = vst [vmem:[#allocation44_spill] sm:$0xff] %v6104_v27  ;;  %v4677_v15 = vpack.i.bf16 %v6053_v10, %v6050_v37  ;;  %v6112_v22 = vpack.i.bf16 %v6104_v27, %v6101_v61  ;;  %v6129_v27 = vld [vmem:[%s5749_s25 + $0x158] sm:$0xff]  ;;  %v376_v61 = vld [vmem:[%s5749_s25 + $0x160] sm:$0x3]  ;;  %v6136_v40 = vpack.i.bf16 %v6122_v54, %v6119_v51  ;;  %v505_v47 = vrot.slane %v6126_v55, 1 }
  0x4c   : > { %8705 = vst [vmem:[#allocation47_spill] sm:$0xff] %v6122_v54  ;;  %v6139_v50 = vsel %vm515_vm1, %v576_v28, %v577_v29  ;;  %v506_v42 = vrot.slane %v6129_v27, 1  ;;  %v581_v28 = vrot.slane %v6088_v5, 2  ;;  %v4707_v4 = vpack.i.bf16 %v6129_v27, %v6126_v55 }
  0x4d   : > { %8703 = vst [vmem:[#allocation45_spill] sm:$0xff] %v6112_v22 }
  0x4e   : > { %8706 = vst [vmem:[#allocation48_spill] sm:$0xff] %v6136_v40  ;;  %v6157_v54 = vsel %vm434_vm0, %v505_v47, %v506_v42 }
  0x4f   : > { %8707 = vst [vmem:[#allocation49_spill] sm:$0xff] %v6139_v50 }
  0x50   : > { %4683 = vrot.lane.b32.xlu2 %v6098_v36, %s5640_s26  ;;  %v508_v36 = vrot.slane %v376_v61, 1  ;;  %8710 = vst [vmem:[#allocation52_spill] sm:$0xff] %v6157_v54 }
  0x52   : > { %4678 = vrot.lane.b32.xlu1 %v4677_v15, %s5641_s27  ;;  %v6142_v15 = vsel %vm515_vm1, %v577_v29, %v579_v30  ;;  %v582_v29 = vrot.slane %v6091_v44, 2  ;;  %v584_v30 = vrot.slane %v373_v14, 2  ;;  %v6160_v60 = vsel %vm434_vm0, %v506_v42, %v508_v36 }
  0x53   : > { %4673 = vrot.lane.b32.xlu0 %v6112_v22, %s5642_s28  ;;  %8708 = vst [vmem:[#allocation50_spill] sm:$0xff] %v6142_v15  ;;  %v4692_v22 = vpack.i.bf16 %v6091_v44, %v6088_v5  ;;  %v6150_v51 = vpack.i.bf16 %v6142_v15, %v6139_v50  ;;  %v6167_v15 = vld [vmem:[%s5749_s25 + $0x170] sm:$0xff]  ;;  %v379_v50 = vld [vmem:[%s5749_s25 + $0x178] sm:$0x3] }
  0x54   : > { %8711 = vst [vmem:[#allocation53_spill] sm:$0xff] %v6160_v60  ;;  %v6177_v14 = vsel %vm515_vm1, %v581_v28, %v582_v29  ;;  %v6180_v36 = vsel %vm515_vm1, %v582_v29, %v584_v30  ;;  %v511_v47 = vrot.slane %v6167_v15, 1  ;;  %v513_v42 = vrot.slane %v379_v50, 1 }
  0x55   : > { %8709 = vst [vmem:[#allocation51_spill] sm:$0xff] %v6150_v51  ;;  %v586_v28 = vrot.slane %v6126_v55, 2  ;;  %v587_v29 = vrot.slane %v6129_v27, 2  ;;  %v589_v30 = vrot.slane %v376_v61, 2 }
  0x56   : > { %8712 = vst [vmem:[#allocation54_spill] sm:$0xff] %v6167_v15 }
  0x57   : > { %8714 = vst [vmem:[#allocation56_spill] sm:$0xff] %v6177_v14  ;;  %v6211_v61 = vsel %vm515_vm1, %v587_v29, %v589_v30  ;;  %v594_v30 = vrot.slane %v379_v50, 2 }
  0x58   : > { %4698 = vrot.lane.b32.xlu2 %v6136_v40, %s5640_s26  ;;  %v6174_v40 = vpack.i.bf16 %v6160_v60, %v6157_v54  ;;  %8715 = vst [vmem:[#allocation57_spill] sm:$0xff] %v6180_v36  ;;  %v6198_v60 = vsel %vm434_vm0, %v511_v47, %v513_v42  ;;  %v4722_v42 = vpack.i.bf16 %v6167_v15, %v6164_v49 }
  0x59   : > { %8718 = vst [vmem:[#allocation60_spill] sm:$0xff] %v6198_v60 }
  0x5a   : > { %4693 = vrot.lane.b32.xlu1 %v4692_v22, %s5641_s27  ;;  %8713 = vst [vmem:[#allocation55_spill] sm:$0xff] %v6174_v40  ;;  %v510_v22 = vrot.slane %v6164_v49, 1 }
  0x5b   : > { %4688 = vrot.lane.b32.xlu0 %v6150_v51, %s5642_s28  ;;  %v6188_v51 = vpack.i.bf16 %v6180_v36, %v6177_v14  ;;  %v6208_v14 = vsel %vm515_vm1, %v586_v28, %v587_v29  ;;  %8721 = vst [vmem:[#allocation63_spill] sm:$0xff] %v6211_v61  ;;  %v591_v28 = vrot.slane %v6164_v49, 2  ;;  %v592_v29 = vrot.slane %v6167_v15, 2 }
  0x5c   : > { %v6195_v54 = vsel %vm434_vm0, %v510_v22, %v511_v47  ;;  %8720 = vst [vmem:[#allocation62_spill] sm:$0xff] %v6208_v14  ;;  %v521_v22 = vrot.slane %v5825_v32, 2  ;;  %v522_v47 = vrot.slane %v5828_v33, 2 }
  0x5d   : > { %8716 = vst [vmem:[#allocation58_spill] sm:$0xff] %v6188_v51  ;;  %v6205_v36 = vpack.i.bf16 %v6198_v60, %v6195_v54 }
  0x5e   : > { %8717 = vst [vmem:[#allocation59_spill] sm:$0xff] %v6195_v54  ;;  %v6220_v54 = vpack.i.bf16 %v6211_v61, %v6208_v14  ;;  %v523_v60 = vsel %vm515_vm1, %v521_v22, %v522_v47  ;;  %v381_v61 = vld [vmem:[%s5749_s25 + $0x188] sm:$0xff]  ;;  %v519_v22 = vrot.slane %v5789_v17, 2 }
  0x5f   : > { %8719 = vst [vmem:[#allocation61_spill] sm:$0xff] %v6205_v36 }
  0x60   : > { %4713 = vrot.lane.b32.xlu2 %v6174_v40, %s5640_s26  ;;  %8722 = vst [vmem:[#allocation64_spill] sm:$0xff] %v6220_v54 }
  0x62   : > { %4708 = vrot.lane.b32.xlu1 %v4707_v4, %s5641_s27  ;;  %v524_v4 = vrot.slane %v5840_v38, 2  ;;  %v380_v38 = vld [vmem:[%s5749_s25 + $0x180] sm:$0xff] }
  0x63   : > { %4703 = vrot.lane.b32.xlu0 %v6188_v51, %s5642_s28  ;;  %v6234_v51 = vsel %vm515_vm1, %v591_v28, %v592_v29  ;;  %v4737_v15 = vpack.i.bf16 %v381_v61, %v380_v38  ;;  %v529_v38 = vrot.slane %v5773_v9, 2  ;;  %v4493_v9 = vld [vmem:[%s8555_s1 + $0x20] sm:$0xff] }
  0x64   : > { %v525_v40 = vsel %vm515_vm1, %v522_v47, %v524_v4  ;;  %8723 = vst [vmem:[#allocation65_spill] sm:$0xff] %v6234_v51  ;;  %v516_v47 = vrot.slane %v5770_v8, 2  ;;  %v517_v4 = vrot.slane %v5778_v12, 2 }
  0x65   : > { %v4742_v14 = vpack.i.bf16 %v525_v40, %v523_v60  ;;  %v4496_v60 = vld [vmem:[%s8555_s1 + $0x38] sm:$0xff]  ;;  %v4757_v40 = vpack.i.bf16 %v5828_v33, %v5825_v32 }
  0x66   : > { %v518_v17 = vsel %vm515_vm1, %v516_v47, %v517_v4  ;;  %v520_v61 = vsel %vm515_vm1, %v517_v4, %v519_v22  ;;  %4526 = vmatpush.bf16.msra.mxu1 %v4496_v60  ;;  %1697 = vmatpush.bf16.msra.mxu0 %v4496_v60 }
  0x67   : > { %v4747_v28 = vpack.i.bf16 %v520_v61, %v518_v17  ;;  %v4491_v17 = vld [vmem:[%s8555_s1 + $0x10] sm:$0xff]  ;;  %v531_v61 = vrot.slane %v5810_v25, 2 }
  0x68   : > { %4728 = vrot.lane.b32.xlu2 %v6205_v36, %s5640_s26  ;;  %v6237_v36 = vsel %vm515_vm1, %v592_v29, %v594_v30  ;;  %v526_v29 = vrot.slane %v5764_v6, 2  ;;  %v527_v30 = vrot.slane %v5767_v7, 2 }
  0x69   : > { %8724 = vst [vmem:[#allocation66_spill] sm:$0xff] %v6237_v36  ;;  %v6241_v50 = vpack.i.bf16 %v6237_v36, %v6234_v51 }
  0x6a   : > { %4723 = vrot.lane.b32.xlu1 %v4722_v42, %s5641_s27  ;;  %v4752_v42 = vpack.i.bf16 %v5767_v7, %v5764_v6  ;;  %v6271_v47 = vsel %vm515_vm1, %v526_v29, %v527_v30  ;;  %v6274_v4 = vsel %vm515_vm1, %v527_v30, %v529_v38  ;;  %v4494_v6 = vld [vmem:[%s8555_s1 + $0x28] sm:$0xff]  ;;  %v539_v30 = vrot.slane %v5758_v2, 2  ;;  %v4489_v38 = vld [vmem:[%s8555_s1] sm:$0xff] }
  0x6b   : > { %4718 = vrot.lane.b32.xlu0 %v6220_v54, %s5642_s28  ;;  %8725 = vst [vmem:[#allocation67_spill] sm:$0xff] %v6241_v50  ;;  %v4767_v7 = vpack.i.bf16 %v6274_v4, %v6271_v47  ;;  %v546_v54 = vrot.slane %v5889_v58, 2 }
  0x70   : > { %4743 = vrot.lane.b32.xlu2 %v4742_v14, %s5640_s26 }
  0x72   : > { %4738 = vrot.lane.b32.xlu1 %v4737_v15, %s5641_s27  ;;  %v4495_v15 = vld [vmem:[%s8555_s1 + $0x30] sm:$0xff] }
  0x73   : > { %4733 = vrot.lane.b32.xlu0 %v6241_v50, %s5642_s28  ;;  %4527 = vmatpush.bf16.msra.mxu1 %v4495_v15  ;;  %v4852_v50 = vpack.i.bf16 %v5894_v62, %v5889_v58  ;;  %v4502_v58 = vld [vmem:[%s8555_s1 + $0x68] sm:$0xff] }
  0x74   : > { %1698 = vmatpush.bf16.msra.mxu0 %v4495_v15  ;;  %v534_v15 = vrot.slane %v5822_v31, 2  ;;  %v536_v31 = vrot.slane %v5752_v0, 2 }
  0x77   : > { %4528 = vmatpush.bf16.msra.mxu1 %v4494_v6 }
  0x78   : > { %4758 = vrot.lane.b32.xlu2 %v4757_v40, %s5641_s27  ;;  %1699 = vmatpush.bf16.msra.mxu0 %v4494_v6  ;;  %v4492_v40 = vld [vmem:[%s8555_s1 + $0x18] sm:$0xff] }
  0x7a   : > { %4753 = vrot.lane.b32.xlu1 %v4752_v42, %s5642_s28  ;;  %v6267_v22 = vpop.permute.xlu2 %4603 }
  0x7b   : > { %4748 = vrot.lane.b32.xlu0 %v4747_v28, %s5642_s28  ;;  %4529 = vmatpush.bf16.msra.mxu1 %v4493_v9  ;;  %v4490_v28 = vld [vmem:[%s8555_s1 + $0x8] sm:$0xff] }
  0x7c   : > { %1700 = vmatpush.bf16.msra.mxu0 %v4493_v9 }
  0x7f   : > { %4530 = vmatpush.bf16.msra.mxu1 %v4492_v40 }
  0x80   : > { %4773 = vrot.lane.b32.xlu2 %v4742_v14, %s5642_s28  ;;  %1701 = vmatpush.bf16.msra.mxu0 %v4492_v40  ;;  %v4777_v14 = vpack.i.bf16 %v5813_v26, %v5810_v25 }
  0x82   : > { %4768 = vrot.lane.b32.xlu1 %v4767_v7, %s5640_s26  ;;  %v6286_v60 = vpop.permute.xlu2 %4608 }
  0x83   : > { %4763 = vrot.lane.b32.xlu0 %v5834_v34, %s5641_s27  ;;  %v532_v34 = vrot.slane %v5813_v26, 2  ;;  %4531 = vmatpush.bf16.msra.mxu1 %v4491_v17 }
  0x84   : > { %1702 = vmatpush.bf16.msra.mxu0 %v4491_v17 }
  0x85   : > { %v6311_v25 = vsel %vm515_vm1, %v531_v61, %v532_v34  ;;  %v6314_v26 = vsel %vm515_vm1, %v532_v34, %v534_v15  ;;  %v4827_v15 = vpack.i.bf16 %v5796_v20, %v5793_v19 }
  0x86   : > { %v4792_v6 = vpack.i.bf16 %v6314_v26, %v6311_v25 }
  0x87   : > { %4532 = vmatpush.bf16.msra.mxu1 %v4490_v28 }
  0x88   : > { %4788 = vrot.lane.b32.xlu2 %v5901_v3, %s5641_s27  ;;  %v4802_v3 = vpack.i.bf16 %v5755_v1, %v5752_v0  ;;  %1703 = vmatpush.bf16.msra.mxu0 %v4490_v28  ;;  %v541_v28 = vrot.slane %v5793_v19, 2  ;;  %v4503_v19 = vld [vmem:[%s8555_s1 + $0x70] sm:$0xff] }
  0x8a   : > { %4783 = vrot.lane.b32.xlu1 %v4752_v42, %s5641_s27  ;;  %v4624_v29 = vpop.permute.xlu2 %4623  ;;  %v537_v42 = vrot.slane %v5755_v1, 2  ;;  %v4504_v1 = vld [vmem:[%s8555_s1 + $0x78] sm:$0xff] }
  0x8b   : > { %4778 = vrot.lane.b32.xlu0 %v4777_v14, %s5642_s28  ;;  %4533 = vmatpush.bf16.msra.mxu1 %v4489_v38 }
  0x8c   : > { %v6326_v9 = vsel %vm515_vm1, %v536_v31, %v537_v42  ;;  %v6329_v0 = vsel %vm515_vm1, %v537_v42, %v539_v30  ;;  %1704 = vmatpush.bf16.msra.mxu0 %v4489_v38  ;;  %v542_v31 = vrot.slane %v5796_v20, 2  ;;  %v544_v42 = vrot.slane %v5807_v24, 2 }
  0x8d   : > { %v4817_v40 = vpack.i.bf16 %v6329_v0, %v6326_v9  ;;  %v4626_v38 = vunpack.i.h.bf16 %v4624_v29 }
  0x8f   : > { %1786 = vmatpush.bf16.msrb.mxu1 %v4504_v1 }
  0x90   : > { %4803 = vrot.lane.b32.xlu2 %v4802_v3, %s5642_s28 }
  0x92   : > { %4798 = vrot.lane.b32.xlu1 %v4767_v7, %s5642_s28  ;;  %v4639_v61 = vpop.permute.xlu2 %4638 }
  0x93   : > { %4793 = vrot.lane.b32.xlu0 %v4792_v6, %s5640_s26  ;;  %1787 = vmatpush.bf16.msrb.mxu1 %v4503_v19 }
  0x94   : > { %v6336_v2 = vpop.permute.xlu1 %4593 }
  0x95   : > { %v6340_v17 = vpop.permute.xlu0 %4583 }
  0x97   : > { %1788 = vmatpush.bf16.msrb.mxu1 %v4502_v58 }
  0x98   : > { %4818 = vrot.lane.b32.xlu2 %v4817_v40, %s5640_s26 }
  0x9a   : > { %4813 = vrot.lane.b32.xlu1 %v5800_v21, %s5641_s27  ;;  %v6355_v30 = vpop.permute.xlu2 %4653  ;;  %v6361_v21 = vsel %vm515_vm1, %v541_v28, %v542_v31  ;;  %v4641_v28 = vunpack.i.h.bf16 %v4639_v61 }
  0x9b   : > { %4808 = vrot.lane.b32.xlu0 %v4777_v14, %s5641_s27  ;;  %8726 = vst [vmem:[#allocation68_spill] sm:$0xff] %v6361_v21  ;;  %v6364_v14 = vsel %vm515_vm1, %v542_v31, %v544_v42  ;;  %v4640_v31 = vunpack.i.l.bf16 %v4639_v61 }
  0x9c   : > { %v6346_v7 = vpop.permute.xlu1 %4598  ;;  %8727 = vst [vmem:[#allocation69_spill] sm:$0xff] %v6364_v14 }
  0x9d   : > { %v6348_v34 = vpop.permute.xlu0 %4588 }
  0xa0   : > { %4833 = vrot.lane.b32.xlu2 %v4802_v3, %s5641_s27  ;;  %v4842_v3 = vpack.i.bf16 %v6364_v14, %v6361_v21 }
  0xa2   : > { %4828 = vrot.lane.b32.xlu1 %v4827_v15, %s5642_s28  ;;  %v6376_v1 = vpop.permute.xlu2 %4668 }
  0xa3   : > { %4823 = vrot.lane.b32.xlu0 %v4792_v6, %s5642_s28  ;;  %v4625_v6 = vunpack.i.l.bf16 %v4624_v29  ;;  %v1280_v29 = vsel %vm1262_vm3, %v5859_v48, %v4626_v38  ;;  %v549_v38 = vrot.slane %v5897_v63, 2 }
  0xa4   : > { %v6369_v20 = vpop.permute.xlu1 %4618 }
  0xa5   : > { %8728 = vst [vmem:[#allocation70_spill] sm:$0xff] %v6369_v20  ;;  %v6371_v24 = vpop.permute.xlu0 %4613 }
  0xa6   : > { %8729 = vst [vmem:[#allocation71_spill] sm:$0xff] %v6371_v24 }
  0xa8   : > { %4848 = vrot.lane.b32.xlu2 %v4817_v40, %s5642_s28  ;;  %v1279_v40 = vsel %vm1262_vm3, %v5848_v43, %v4625_v6  ;;  %v547_v6 = vrot.slane %v5894_v62, 2  ;;  %v4877_v62 = vpack.i.bf16 %v5883_v56, %v5870_v52 }
  0xaa   : > { %4843 = vrot.lane.b32.xlu1 %v4842_v3, %s5640_s26  ;;  %v6406_v63 = vsel %vm515_vm1, %v546_v54, %v547_v6 }
  0xab   : > { %4838 = vrot.lane.b32.xlu0 %v5874_v53, %s5641_s27 }
  0xac   : > { %v4634_v42 = vpop.permute.xlu1 %4633 }
  0xad   : > { %v4636_v36 = vunpack.i.h.bf16 %v4634_v42  ;;  %v4635_v19 = vunpack.i.l.bf16 %v4634_v42  ;;  %v4629_v51 = vpop.permute.xlu0 %4628 }
  0xae   : > { %v4631_v14 = vunpack.i.h.bf16 %v4629_v51  ;;  %v4630_v21 = vunpack.i.l.bf16 %v4629_v51  ;;  %v6409_v51 = vsel %vm515_vm1, %v547_v6, %v549_v38 }
  0xaf   : > { %v1312_v53 = vsel %vm1295_vm2, %v1279_v40, %v4635_v19  ;;  %v1313_v61 = vsel %vm1295_vm2, %v1280_v29, %v4636_v36  ;;  %v554_v19 = vrot.slane %v5886_v57, 2  ;;  %v4867_v29 = vpack.i.bf16 %v6409_v51, %v6406_v63 }
  0xb0   : > { %4863 = vrot.lane.b32.xlu2 %v5951_v46, %s5641_s27  ;;  %v1345_v42 = vsel %vm1328_vm4, %v1312_v53, %v4640_v31  ;;  %v1346_v20 = vsel %vm1328_vm4, %v1313_v61, %v4641_v28  ;;  %v6401_v46 = vpop.permute.xlu2 %4683  ;;  %v552_v31 = vrot.slane %v5883_v56, 2  ;;  %v1281_v40 = vsel %vm1262_vm3, %v5939_v39, %v4630_v21 }
  0xb1   : > { %v1481_v24 = vpack.c.bf16 %v1346_v20, %v1345_v42  ;;  %v1282_v54 = vsel %vm1262_vm3, %v5942_v41, %v4631_v14  ;;  %v4656_v53 = vunpack.i.h.bf16 %v6355_v30 }
  0xb2   : > { %4858 = vrot.lane.b32.xlu1 %v4827_v15, %s5641_s27  ;;  %v551_v15 = vrot.slane %v5870_v52, 2  ;;  %v4655_v52 = vunpack.i.l.bf16 %v6355_v30  ;;  %v6427_v57 = vsel %vm515_vm1, %v552_v31, %v554_v19 }
  0xb3   : > { %4853 = vrot.lane.b32.xlu0 %v4852_v50, %s5642_s28  ;;  %1745 = vmatmul.bf16.vlgmr.msra.gmra.mxu1 %v1481_v24 }
  0xb4   : > { %v4649_v36 = vpop.permute.xlu1 %4648  ;;  %v6424_v56 = vsel %vm515_vm1, %v551_v15, %v552_v31 }
  0xb5   : > { %v4651_v20 = vunpack.i.h.bf16 %v4649_v36  ;;  %v4650_v24 = vunpack.i.l.bf16 %v4649_v36  ;;  %v4644_v28 = vpop.permute.xlu0 %4643  ;;  %v4892_v30 = vpack.i.bf16 %v6427_v57, %v6424_v56 }
  0xb6   : > { %v4646_v58 = vunpack.i.h.bf16 %v4644_v28  ;;  %v4645_v36 = vunpack.i.l.bf16 %v4644_v28 }
  0xb7   : > { %v1314_v39 = vsel %vm1295_vm2, %v1281_v40, %v4650_v24  ;;  %v1315_v21 = vsel %vm1295_vm2, %v1282_v54, %v4651_v20  ;;  %v4902_v24 = vpack.i.bf16 %v5859_v48, %v5848_v43 }
  0xb8   : > { %4878 = vrot.lane.b32.xlu2 %v4877_v62, %s5642_s28  ;;  %v1347_v14 = vsel %vm1328_vm4, %v1314_v39, %v4655_v52  ;;  %v1348_v61 = vsel %vm1328_vm4, %v1315_v21, %v4656_v53  ;;  %v6437_v6 = vpop.permute.xlu2 %4698  ;;  %v4670_v21 = vunpack.i.l.bf16 %v6376_v1 }
  0xb9   : > { %v1484_v38 = vpack.c.bf16 %v1348_v61, %v1347_v14  ;;  %v4500_v14 = vld [vmem:[%s8555_s1 + $0x58] sm:$0xff] }
  0xba   : > { %4873 = vrot.lane.b32.xlu1 %v4842_v3, %s5642_s28  ;;  %v4501_v3 = vld [vmem:[%s8555_s1 + $0x60] sm:$0xff] }
  0xbb   : > { %4868 = vrot.lane.b32.xlu0 %v4867_v29, %s5640_s26  ;;  %1789 = vmatpush.bf16.msrb.mxu1 %v4501_v3 }
  0xbc   : > { %v4664_v41 = vpop.permute.xlu1 %4663 }
  0xbd   : > { %v4659_v42 = vpop.permute.xlu0 %4658  ;;  %v4666_v54 = vunpack.i.h.bf16 %v4664_v41  ;;  %v4665_v28 = vunpack.i.l.bf16 %v4664_v41 }
  0xbe   : > { %v4661_v31 = vunpack.i.h.bf16 %v4659_v42  ;;  %v4660_v19 = vunpack.i.l.bf16 %v4659_v42 }
  0xbf   : > { %1790 = vmatpush.bf16.msrb.mxu1 %v4500_v14 }
  0xc0   : > { %4893 = vrot.lane.b32.xlu2 %v4892_v30, %s5640_s26  ;;  %v6448_v40 = vpop.permute.xlu2 %4713 }
  0xc2   : > { %4888 = vrot.lane.b32.xlu1 %v5947_v45, %s5641_s27  ;;  %v1283_v45 = vsel %vm1262_vm3, %v5980_v18, %v4645_v36 }
  0xc3   : > { %4883 = vrot.lane.b32.xlu0 %v4852_v50, %s5641_s27  ;;  %1750 = vmatmul.bf16.gmra.mxu1 %v1484_v38  ;;  %v1284_v50 = vsel %vm1262_vm3, %v5983_v23, %v4646_v58  ;;  %v1316_v43 = vsel %vm1295_vm2, %v1283_v45, %v4660_v19  ;;  %v4671_v23 = vunpack.i.h.bf16 %v6376_v1  ;;  %v1285_v38 = vsel %vm1262_vm3, %v6003_v13, %v4670_v21 }
  0xc4   : > { %v4679_v15 = vpop.permute.xlu1 %4678  ;;  %v1317_v48 = vsel %vm1295_vm2, %v1284_v50, %v4661_v31  ;;  %v4686_v50 = vunpack.i.h.bf16 %v6401_v46 }
  0xc5   : > { %v4674_v20 = vpop.permute.xlu0 %4673  ;;  %v1350_v39 = vsel %vm1328_vm4, %v1317_v48, %v4666_v54  ;;  %v1286_v1 = vsel %vm1262_vm3, %v6006_v16, %v4671_v23  ;;  %v4681_v3 = vunpack.i.h.bf16 %v4679_v15 }
  0xc6   : > { %v4676_v61 = vunpack.i.h.bf16 %v4674_v20  ;;  %v4675_v42 = vunpack.i.l.bf16 %v4674_v20 }
  0xc8   : > { %4908 = vrot.lane.b32.xlu2 %v4877_v62, %s5641_s27  ;;  %v1349_v62 = vsel %vm1328_vm4, %v1316_v43, %v4665_v28  ;;  %v6464_v41 = vpop.permute.xlu2 %4728  ;;  %v1318_v58 = vsel %vm1295_vm2, %v1285_v38, %v4675_v42  ;;  %v1319_v36 = vsel %vm1295_vm2, %v1286_v1, %v4676_v61  ;;  %v4586_v61 = vunpack.i.h.bf16 %v6340_v17 }
  0xc9   : > { %v1487_v18 = vpack.c.bf16 %v1350_v39, %v1349_v62  ;;  %v1352_v13 = vsel %vm1328_vm4, %v1319_v36, %v4681_v3 }
  0xca   : > { %4903 = vrot.lane.b32.xlu1 %v4902_v24, %s5642_s28  ;;  %v1264_v36 = vsel %vm1262_vm3, %v5778_v12, %v4586_v61  ;;  %v4498_v12 = vld [vmem:[%s8555_s1 + $0x48] sm:$0xff] }
  0xcb   : > { %4898 = vrot.lane.b32.xlu0 %v4867_v29, %s5642_s28 }
  0xcc   : > { %v4694_v53 = vpop.permute.xlu1 %4693 }
  0xcd   : > { %v4689_v52 = vpop.permute.xlu0 %4688  ;;  %v4695_v23 = vunpack.i.l.bf16 %v4694_v53 }
  0xce   : > { %v4691_v28 = vunpack.i.h.bf16 %v4689_v52  ;;  %v4690_v43 = vunpack.i.l.bf16 %v4689_v52  ;;  %v4585_v52 = vunpack.i.l.bf16 %v6340_v17 }
  0xd0   : > { %4923 = vrot.lane.b32.xlu2 %v4892_v30, %s5642_s28  ;;  %v6482_v31 = vpop.permute.xlu2 %4743 }
  0xd2   : > { %4918 = vrot.lane.b32.xlu1 %v5988_v59, %s5640_s26  ;;  %v4680_v59 = vunpack.i.l.bf16 %v4679_v15  ;;  %v4685_v15 = vunpack.i.l.bf16 %v6401_v46  ;;  %v4696_v46 = vunpack.i.h.bf16 %v4694_v53  ;;  %v1263_v53 = vsel %vm1262_vm3, %v5770_v8, %v4585_v52 }
  0xd3   : > { %1755 = vmatmul.bf16.gmra.mxu1 %v1487_v18  ;;  %v1288_v18 = vsel %vm1262_vm3, %v6053_v10, %v4686_v50  ;;  %4913 = vrot.lane.b32.xlu0 %v5930_v35, %s5641_s27 }
  0xd4   : > { %v6468_v29 = vpop.permute.xlu1 %4708  ;;  %v1351_v19 = vsel %vm1328_vm4, %v1318_v58, %v4680_v59  ;;  %v1287_v39 = vsel %vm1262_vm3, %v6050_v37, %v4685_v15  ;;  %v1321_v14 = vsel %vm1295_vm2, %v1288_v18, %v4691_v28  ;;  %v4700_v28 = vunpack.i.l.bf16 %v6437_v6 }
  0xd5   : > { %v6473_v30 = vpop.permute.xlu0 %4703  ;;  %v1490_v16 = vpack.c.bf16 %v1352_v13, %v1351_v19  ;;  %v1320_v21 = vsel %vm1295_vm2, %v1287_v39, %v4690_v43  ;;  %v1354_v37 = vsel %vm1328_vm4, %v1321_v14, %v4696_v46  ;;  %v4591_v14 = vunpack.i.h.bf16 %v6348_v34 }
  0xd6   : > { %v1353_v38 = vsel %vm1328_vm4, %v1320_v21, %v4695_v23  ;;  %v4705_v39 = vunpack.i.l.bf16 %v6473_v30  ;;  %v1289_v46 = vsel %vm1262_vm3, %v6088_v5, %v4700_v28  ;;  %v4711_v23 = vunpack.i.h.bf16 %v6468_v29  ;;  %v4497_v28 = vld [vmem:[%s8555_s1 + $0x40] sm:$0xff] }
  0xd7   : > { %v1493_v19 = vpack.c.bf16 %v1354_v37, %v1353_v38  ;;  %v4710_v21 = vunpack.i.l.bf16 %v6468_v29 }
  0xd8   : > { %v4759_v62 = vpop.permute.xlu2 %4758  ;;  %v1322_v61 = vsel %vm1295_vm2, %v1289_v46, %v4705_v39  ;;  %v1459_v46 = vpack.c.bf16 %v6274_v4, %v6271_v47 }
  0xd9   : > { %v4761_v1 = vunpack.i.h.bf16 %v4759_v62  ;;  %v4760_v3 = vunpack.i.l.bf16 %v4759_v62  ;;  %v4706_v62 = vunpack.i.h.bf16 %v6473_v30  ;;  %v4590_v30 = vunpack.i.l.bf16 %v6348_v34 }
  0xda   : > { %4933 = vrot.lane.b32.xlu1 %v4902_v24, %s5641_s27  ;;  %v4499_v24 = vld [vmem:[%s8555_s1 + $0x50] sm:$0xff] }
  0xdb   : > { %1791 = vmatpush.bf16.msrb.mxu1 %v4499_v24  ;;  %v4701_v24 = vunpack.i.h.bf16 %v6437_v6  ;;  %v1265_v34 = vsel %vm1262_vm3, %v5825_v32, %v4590_v30  ;;  %v4716_v32 = vunpack.i.h.bf16 %v6448_v40  ;;  %4928 = vrot.lane.b32.xlu0 %v5971_v11, %s5642_s28 }
  0xdc   : > { %v6484_v20 = vpop.permute.xlu1 %4723 }
  0xdd   : > { %v6488_v45 = vpop.permute.xlu0 %4718  ;;  %v1290_v6 = vsel %vm1262_vm3, %v6091_v44, %v4701_v24  ;;  %v1292_v39 = vsel %vm1262_vm3, %v6129_v27, %v4716_v32  ;;  %v4595_v27 = vunpack.i.l.bf16 %v6336_v2 }
  0xde   : > { %v1323_v52 = vsel %vm1295_vm2, %v1290_v6, %v4706_v62  ;;  %v4726_v6 = vunpack.i.h.bf16 %v6484_v20 }
  0xdf   : > { %1792 = vmatpush.bf16.msrb.mxu1 %v4498_v12  ;;  %v1356_v29 = vsel %vm1328_vm4, %v1323_v52, %v4711_v23  ;;  %v4720_v12 = vunpack.i.l.bf16 %v6488_v45  ;;  %v4725_v23 = vunpack.i.l.bf16 %v6484_v20 }
  0xe0   : > { %v4774_v13 = vpop.permute.xlu2 %4773 }
  0xe1   : > { %v4776_v5 = vunpack.i.h.bf16 %v4774_v13  ;;  %v4775_v38 = vunpack.i.l.bf16 %v4774_v13 }
  0xe3   : > { %1760 = vmatmul.bf16.gmra.mxu1 %v1490_v16 }
  0xe4   : > { %v6492_v54 = vpop.permute.xlu1 %4738  ;;  %1793 = vmatpush.bf16.msrb.mxu1 %v4497_v28  ;;  %v4600_v28 = vunpack.i.l.bf16 %v6346_v7 }
  0xe5   : > { %v6497_v48 = vpop.permute.xlu0 %4733 }
  0xe8   : > { %v6542_v37 = vpop.permute.xlu2 %4788 }
  0xec   : > { %v6507_v42 = vpop.permute.xlu1 %4753 }
  0xed   : > { %v4749_v10 = vpop.permute.xlu0 %4748 }
  0xee   : > { %v4751_v59 = vunpack.i.h.bf16 %v4749_v10  ;;  %v4750_v58 = vunpack.i.l.bf16 %v4749_v10 }
  0xf0   : > { %v1296_v17 = vsel %vm1295_vm2, %v1263_v53, %v4750_v58  ;;  %v1297_v16 = vsel %vm1295_vm2, %v1264_v36, %v4751_v59  ;;  %v1266_v59 = vsel %vm1262_vm3, %v5828_v33, %v4591_v14  ;;  %v1298_v58 = vsel %vm1295_vm2, %v1265_v34, %v4775_v38 }
  0xf1   : > { %v1329_v50 = vsel %vm1328_vm4, %v1296_v17, %v4760_v3  ;;  %v1330_v15 = vsel %vm1328_vm4, %v1297_v16, %v4761_v1  ;;  %v1355_v1 = vsel %vm1328_vm4, %v1322_v61, %v4710_v21  ;;  %v1299_v53 = vsel %vm1295_vm2, %v1266_v59, %v4776_v5  ;;  %v4506_v17 = vld [vmem:[%s8555_s1 + $0x88] sm:$0xff] }
  0xf2   : > { %v1457_v43 = vpack.c.bf16 %v1330_v15, %v1329_v50  ;;  %v1496_v13 = vpack.c.bf16 %v1356_v29, %v1355_v1  ;;  %1881 = vmatpush.bf16.msra.mxu2 %v4506_v17  ;;  %4534 = vmatpush.bf16.msra.mxu3 %v4506_v17  ;;  %v4715_v33 = vunpack.i.l.bf16 %v6448_v40  ;;  %v4505_v50 = vld [vmem:[%s8555_s1 + $0x80] sm:$0xff]  ;;  %v6564_v15 = vpop.permute.xlu2 %4803  ;;  %v4735_v17 = vunpack.i.l.bf16 %v6497_v48 }
  0xf3   : > { %1765 = vmatmul.bf16.gmra.mxu1 %v1493_v19 }
  0xf4   : > { %1705 = vmatmul.bf16.vlgmr.msra.gmra.mxu0 %v1457_v43  ;;  %v6521_v8 = vpop.permute.xlu1 %4768  ;;  %v4721_v43 = vunpack.i.h.bf16 %v6488_v45  ;;  %v1291_v40 = vsel %vm1262_vm3, %v6126_v55, %v4715_v33  ;;  %v4596_v55 = vunpack.i.h.bf16 %v6336_v2  ;;  %v5549_v2 = vld [vmem:[%s5749_s25 + $0x38] sm:$0xff]  ;;  %v8730_v33 = vld [vmem:[#allocation54_spill] sm:$0xff] }
  0xf5   : > { %v6528_v18 = vpop.permute.xlu0 %4763  ;;  %v1324_v45 = vsel %vm1295_vm2, %v1291_v40, %v4720_v12 }
  0xf6   : > { %1882 = vmatpush.bf16.msra.mxu2 %v4505_v50  ;;  %4535 = vmatpush.bf16.msra.mxu3 %v4505_v50  ;;  %v1325_v21 = vsel %vm1295_vm2, %v1292_v39, %v4721_v43  ;;  %v1357_v20 = vsel %vm1328_vm4, %v1324_v45, %v4725_v23  ;;  %v1268_v29 = vsel %vm1262_vm3, %v5549_v2, %v4596_v55  ;;  %v4741_v43 = vunpack.i.h.bf16 %v6492_v54  ;;  %v5550_v23 = vld [vmem:[%s5749_s25 + $0x48] sm:$0xff]  ;;  %v5551_v45 = vld [vmem:[%s5749_s25 + $0x50] sm:$0xff] }
  0xf7   : > { %v1358_v30 = vsel %vm1328_vm4, %v1325_v21, %v4726_v6  ;;  %v8733_v2 = vld [vmem:[#allocation26_spill] sm:$0xff] }
  0xf8   : > { %4938 = vrot.lane.b32.xlu2 %v8733_v2, %s5641_s27 }
  0xf9   : > { %4376 = vmatmul.msk.bf16.vlgmr.msra.gmra.mxu2 %vm1262_vm3, %v1459_v46 }
  0xfa   : > { %v6592_v52 = vpop.permute.xlu2 %4818 }
  0xfc   : > { %v4784_v44 = vpop.permute.xlu1 %4783 }
  0xfd   : > { %v4786_v3 = vunpack.i.h.bf16 %v4784_v44  ;;  %v4785_v10 = vunpack.i.l.bf16 %v4784_v44  ;;  %v6546_v35 = vpop.permute.xlu0 %4778  ;;  %v5548_v44 = vld [vmem:[%s5749_s25 + $0x30] sm:$0xff] }
  0xfe   : > { %v1267_v1 = vsel %vm1262_vm3, %v5548_v44, %v4595_v27 }
  0xff   : > { %v1331_v36 = vsel %vm1328_vm4, %v1298_v58, %v4785_v10  ;;  %v1332_v19 = vsel %vm1328_vm4, %v1299_v53, %v4786_v3  ;;  %v1499_v10 = vpack.c.bf16 %v1358_v30, %v1357_v20  ;;  %v4731_v53 = vunpack.i.h.bf16 %v6464_v41 }
 0x100   : > { %v1460_v16 = vpack.c.bf16 %v1332_v19, %v1331_v36  ;;  %v4730_v36 = vunpack.i.l.bf16 %v6464_v41  ;;  %v4601_v41 = vunpack.i.h.bf16 %v6346_v7 }
 0x101   : > { %v1294_v50 = vsel %vm1262_vm3, %v8730_v33, %v4731_v53 }
 0x102   : > { %v1293_v32 = vsel %vm1262_vm3, %v6164_v49, %v4730_v36  ;;  %v4834_v12 = vpop.permute.xlu2 %4833  ;;  %v1270_v21 = vsel %vm1262_vm3, %v5551_v45, %v4601_v41  ;;  %v8735_v36 = vld [vmem:[#allocation14_spill] sm:$0xff] }
 0x103   : > { %1770 = vmatmul.bf16.gmra.mxu1 %v1496_v13  ;;  %v4736_v13 = vunpack.i.h.bf16 %v6497_v48  ;;  %v4740_v48 = vunpack.i.l.bf16 %v6492_v54  ;;  %v1326_v49 = vsel %vm1295_vm2, %v1293_v32, %v4735_v17  ;;  %v4836_v7 = vunpack.i.h.bf16 %v4834_v12  ;;  %v5553_v32 = vld [vmem:[%s5749_s25 + $0x110] sm:$0xff] }
 0x104   : > { %1710 = vmatmul.bf16.gmra.mxu0 %v1460_v16  ;;  %v4799_v24 = vpop.permute.xlu1 %4798  ;;  %v4835_v6 = vunpack.i.l.bf16 %v4834_v12  ;;  %v1269_v54 = vsel %vm1262_vm3, %v5550_v23, %v4600_v28  ;;  %v4606_v17 = vunpack.i.h.bf16 %v6267_v22  ;;  %v8736_v28 = vld [vmem:[#allocation39_spill] sm:$0xff] }
 0x105   : > { %v6571_v62 = vpop.permute.xlu0 %4793  ;;  %v4801_v47 = vunpack.i.h.bf16 %v4799_v24  ;;  %v4800_v4 = vunpack.i.l.bf16 %v4799_v24  ;;  %v1462_v24 = vpack.c.bf16 %v6314_v26, %v6311_v25  ;;  %v1327_v46 = vsel %vm1295_vm2, %v1294_v50, %v4736_v13  ;;  %v8731_v25 = vld [vmem:[#allocation32_spill] sm:$0xff]  ;;  %v8732_v26 = vld [vmem:[#allocation29_spill] sm:$0xff] }
 0x106   : > { %4943 = vrot.lane.b32.xlu0 %v8731_v25, %s5640_s26  ;;  %4948 = vrot.lane.b32.xlu1 %v8732_v26, %s5642_s28  ;;  %v1360_v20 = vsel %vm1328_vm4, %v1327_v46, %v4741_v43  ;;  %v4766_v50 = vunpack.i.h.bf16 %v6528_v18  ;;  %v5555_v46 = vld [vmem:[%s5749_s25 + $0x68] sm:$0xff]  ;;  %v1465_v25 = vpack.c.bf16 %v6329_v0, %v6326_v9 }
 0x107   : > { %v1300_v11 = vsel %vm1295_vm2, %v1267_v1, %v4800_v4  ;;  %v1301_v3 = vsel %vm1295_vm2, %v1268_v29, %v4801_v47  ;;  %v1359_v4 = vsel %vm1328_vm4, %v1326_v49, %v4740_v48  ;;  %v4746_v29 = vunpack.i.h.bf16 %v6482_v31 }
 0x109   : > { %4377 = vmatmul.msk.bf16.gmra.mxu2 %vm1262_vm3, %v1462_v24  ;;  %v4765_v24 = vunpack.i.l.bf16 %v6528_v18  ;;  %v1272_v18 = vsel %vm1262_vm3, %v5555_v46, %v4606_v17  ;;  %v4610_v17 = vunpack.i.l.bf16 %v6286_v60 }
 0x10a   : > { %v4849_v44 = vpop.permute.xlu2 %4848 }
 0x10b   : > { %v4850_v41 = vunpack.i.l.bf16 %v4849_v44 }
 0x10c   : > { %v6588_v14 = vpop.permute.xlu1 %4813 }
 0x10d   : > { %v4809_v61 = vpop.permute.xlu0 %4808 }
 0x10e   : > { %v4811_v5 = vunpack.i.h.bf16 %v4809_v61  ;;  %v4810_v38 = vunpack.i.l.bf16 %v4809_v61  ;;  %4958 = vrot.lane.b32.xlu0 %v8736_v28, %s5640_s26 }
 0x110   : > { %v1333_v34 = vsel %vm1328_vm4, %v1300_v11, %v4810_v38  ;;  %v1334_v59 = vsel %vm1328_vm4, %v1301_v3, %v4811_v5  ;;  %v1502_v38 = vpack.c.bf16 %v1360_v20, %v1359_v4  ;;  %v4745_v11 = vunpack.i.l.bf16 %v6482_v31  ;;  %v5552_v31 = vld [vmem:[%s5749_s25 + $0x108] sm:$0xff] }
 0x111   : > { %v1463_v58 = vpack.c.bf16 %v1334_v59, %v1333_v34  ;;  %v4756_v34 = vunpack.i.h.bf16 %v6507_v42  ;;  %v4755_v59 = vunpack.i.l.bf16 %v6507_v42  ;;  %v4962_v33 = vpack.i.bf16 %v5553_v32, %v5552_v31  ;;  %v8737_v4 = vld [vmem:[#allocation33_spill] sm:$0xff] }
 0x112   : > { %v1361_v13 = vsel %vm1262_vm3, %v8735_v36, %v4745_v11  ;;  %v4851_v42 = vunpack.i.h.bf16 %v4849_v44  ;;  %4953 = vrot.lane.b32.xlu2 %v8737_v4, %s5641_s27  ;;  %v4770_v20 = vunpack.i.l.bf16 %v6521_v8  ;;  %v4781_v44 = vunpack.i.h.bf16 %v6546_v35 }
 0x113   : > { %1775 = vmatmul.bf16.gmra.mxu1 %v1499_v10  ;;  %v1393_v12 = vsel %vm1295_vm2, %v1361_v13, %v4755_v59  ;;  %4963 = vrot.lane.b32.xlu1 %v4962_v33, %s5642_s28  ;;  %v5556_v59 = vld [vmem:[%s5749_s25 + $0x120] sm:$0xff]  ;;  %v4611_v13 = vunpack.i.h.bf16 %v6286_v60 }
 0x114   : > { %1715 = vmatmul.bf16.gmra.mxu0 %v1463_v58  ;;  %v6604_v19 = vpop.permute.xlu1 %4828  ;;  %v8734_v58 = vld [vmem:[#allocation15_spill] sm:$0xff]  ;;  %v1425_v23 = vsel %vm1328_vm4, %v1393_v12, %v4765_v24  ;;  %v8740_v24 = vld [vmem:[#allocation45_spill] sm:$0xff]  ;;  %v8741_v60 = vld [vmem:[#allocation68_spill] sm:$0xff] }
 0x115   : > { %v4824_v16 = vpop.permute.xlu0 %4823  ;;  %v1362_v53 = vsel %vm1262_vm3, %v8734_v58, %v4746_v29  ;;  %v5558_v12 = vld [vmem:[%s5749_s25 + $0x78] sm:$0xff] }
 0x116   : > { %v4826_v40 = vunpack.i.h.bf16 %v4824_v16  ;;  %v4825_v39 = vunpack.i.l.bf16 %v4824_v16  ;;  %v4605_v16 = vunpack.i.l.bf16 %v6267_v22  ;;  %v6662_v22 = vpop.permute.xlu2 %4863  ;;  %4973 = vrot.lane.b32.xlu0 %v8740_v24, %s5640_s26 }
 0x118   : > { %v1302_v27 = vsel %vm1295_vm2, %v1269_v54, %v4825_v39  ;;  %v1303_v47 = vsel %vm1295_vm2, %v1270_v21, %v4826_v40  ;;  %v1394_v40 = vsel %vm1295_vm2, %v1362_v53, %v4756_v34  ;;  %v5554_v39 = vld [vmem:[%s5749_s25 + $0x60] sm:$0xff]  ;;  %v5557_v53 = vld [vmem:[%s5749_s25 + $0x128] sm:$0xff] }
 0x119   : > { %v1335_v61 = vsel %vm1328_vm4, %v1302_v27, %v4835_v6  ;;  %v1336_v5 = vsel %vm1328_vm4, %v1303_v47, %v4836_v7  ;;  %v1271_v49 = vsel %vm1262_vm3, %v5554_v39, %v4605_v16  ;;  %v1305_v6 = vsel %vm1295_vm2, %v1272_v18, %v4851_v42  ;;  %4378 = vmatmul.msk.bf16.gmra.mxu2 %vm1262_vm3, %v1465_v25 }
 0x11a   : > { %v1466_v1 = vpack.c.bf16 %v1336_v5, %v1335_v61  ;;  %v1304_v7 = vsel %vm1295_vm2, %v1271_v49, %v4850_v41  ;;  %v1426_v54 = vsel %vm1328_vm4, %v1394_v40, %v4766_v50  ;;  %v4771_v61 = vunpack.i.h.bf16 %v6521_v8  ;;  %v5559_v40 = vld [vmem:[%s5749_s25 + $0x80] sm:$0xff] }
 0x11b   : > { %v1458_v9 = vpack.c.bf16 %v1426_v54, %v1425_v23  ;;  %v4780_v5 = vunpack.i.l.bf16 %v6546_v35  ;;  %v4977_v8 = vpack.i.bf16 %v5557_v53, %v5556_v59  ;;  %v4791_v35 = vunpack.i.h.bf16 %v6542_v37 }
 0x11c   : > { %v6629_v55 = vpop.permute.xlu1 %4843  ;;  %v4790_v16 = vunpack.i.l.bf16 %v6542_v37  ;;  %v1273_v37 = vsel %vm1262_vm3, %v5558_v12, %v4610_v17  ;;  %v1274_v39 = vsel %vm1262_vm3, %v5559_v40, %v4611_v13  ;;  %v4815_v13 = vunpack.i.l.bf16 %v6588_v14 }
 0x11d   : > { %v6635_v30 = vpop.permute.xlu0 %4838  ;;  %4978 = vrot.lane.b32.xlu1 %v4977_v8, %s5642_s28  ;;  %v4816_v8 = vunpack.i.h.bf16 %v6588_v14 }
 0x123   : > { %1780 = vmatmul.bf16.gmra.mxu1 %v1502_v38  ;;  %v6686_v38 = vpop.permute.xlu2 %4878 }
 0x124   : > { %1720 = vmatmul.bf16.gmra.mxu0 %v1466_v1  ;;  %v4859_v10 = vpop.permute.xlu1 %4858  ;;  %v8738_v1 = vld [vmem:[#allocation8_spill] sm:$0xff] }
 0x125   : > { %v6643_v3 = vpop.permute.xlu0 %4853  ;;  %v4861_v43 = vunpack.i.h.bf16 %v4859_v10  ;;  %v4860_v48 = vunpack.i.l.bf16 %v4859_v10  ;;  %v1363_v2 = vsel %vm1262_vm3, %v8738_v1, %v4770_v20  ;;  %v8739_v10 = vld [vmem:[#allocation9_spill] sm:$0xff]  ;;  %v4806_v20 = vunpack.i.h.bf16 %v6564_v15 }
 0x126   : > { %v1364_v34 = vsel %vm1262_vm3, %v8739_v10, %v4771_v61  ;;  %v1395_v50 = vsel %vm1295_vm2, %v1363_v2, %v4780_v5  ;;  %v4805_v61 = vunpack.i.l.bf16 %v6564_v15 }
 0x127   : > { %v1337_v45 = vsel %vm1328_vm4, %v1304_v7, %v4860_v48  ;;  %v1338_v21 = vsel %vm1328_vm4, %v1305_v6, %v4861_v43  ;;  %v1396_v28 = vsel %vm1295_vm2, %v1364_v34, %v4781_v44  ;;  %v8742_v43 = vld [vmem:[#allocation69_spill] sm:$0xff]  ;;  %v1427_v18 = vsel %vm1328_vm4, %v1395_v50, %v4790_v16  ;;  %v8744_v44 = vld [vmem:[#allocation71_spill] sm:$0xff] }
 0x128   : > { %v1469_v0 = vpack.c.bf16 %v1338_v21, %v1337_v45  ;;  %v1468_v48 = vpack.c.bf16 %v8742_v43, %v8741_v60  ;;  %v1428_v25 = vsel %vm1328_vm4, %v1396_v28, %v4791_v35  ;;  %v4796_v21 = vunpack.i.h.bf16 %v6571_v62  ;;  %v8746_v34 = vld [vmem:[#allocation13_spill] sm:$0xff]  ;;  %v5560_v16 = vld [vmem:[%s5749_s25 + $0x138] sm:$0xff] }
 0x129   : > { %v1461_v45 = vpack.c.bf16 %v1428_v25, %v1427_v18  ;;  %v4615_v2 = vunpack.i.l.bf16 %v8744_v44  ;;  %v4616_v53 = vunpack.i.h.bf16 %v8744_v44  ;;  %v8747_v60 = vld [vmem:[#allocation51_spill] sm:$0xff] }
 0x12a   : > { %4379 = vmatmul.msk.bf16.gmra.mxu2 %vm1262_vm3, %v1468_v48  ;;  %v1366_v59 = vsel %vm1262_vm3, %v8746_v34, %v4796_v21  ;;  %4988 = vrot.lane.b32.xlu0 %v8747_v60, %s5640_s26  ;;  %v5563_v48 = vld [vmem:[%s5749_s25 + $0x98] sm:$0xff] }
 0x12b   : > { %v6721_v23 = vpop.permute.xlu2 %4893  ;;  %v1398_v24 = vsel %vm1295_vm2, %v1366_v59, %v4806_v20  ;;  %v1276_v12 = vsel %vm1262_vm3, %v5563_v48, %v4616_v53  ;;  %v8749_v20 = vld [vmem:[#allocation7_spill] sm:$0xff]  ;;  %v4841_v59 = vunpack.i.h.bf16 %v6635_v30  ;;  %v4840_v53 = vunpack.i.l.bf16 %v6635_v30 }
 0x12c   : > { %v4874_v27 = vpop.permute.xlu1 %4873 }
 0x12d   : > { %v6670_v26 = vpop.permute.xlu0 %4868  ;;  %v4876_v31 = vunpack.i.h.bf16 %v4874_v27  ;;  %v4875_v32 = vunpack.i.l.bf16 %v4874_v27  ;;  %v4795_v27 = vunpack.i.l.bf16 %v6571_v62 }
 0x12f   : > { %v1306_v49 = vsel %vm1295_vm2, %v1273_v37, %v4875_v32  ;;  %v1307_v46 = vsel %vm1295_vm2, %v1274_v39, %v4876_v31  ;;  %v5561_v31 = vld [vmem:[%s5749_s25 + $0x140] sm:$0xff]  ;;  %v1471_v37 = vpack.c.bf16 %v6409_v51, %v6406_v63  ;;  %v4821_v63 = vunpack.i.h.bf16 %v6592_v52 }
 0x130   : > { %v6679_v47 = vpop.f32.mrf.mxu1  ;;  %v4992_v32 = vpack.i.bf16 %v5561_v31, %v5560_v16  ;;  %v4820_v51 = vunpack.i.l.bf16 %v6592_v52  ;;  %v8751_v52 = vld [vmem:[#allocation70_spill] sm:$0xff]  ;;  %v5565_v31 = vld [vmem:[%s5749_s25 + $0x158] sm:$0xff] }
 0x131   : > { %v5564_v16 = vld [vmem:[%s5749_s25 + $0x150] sm:$0xff] }
 0x132   : > { %4993 = vrot.lane.b32.xlu1 %v4992_v32, %s5642_s28  ;;  %v5007_v32 = vpack.i.bf16 %v5565_v31, %v5564_v16 }
 0x133   : > { %1794 = vmatmul.bf16.vlgmr.msrb.gmra.mxu1 %v1458_v9 }
 0x134   : > { %1725 = vmatmul.bf16.gmra.mxu0 %v1469_v0  ;;  %v6701_v33 = vpop.permute.xlu1 %4888  ;;  %v8743_v0 = vld [vmem:[#allocation36_spill] sm:$0xff] }
 0x135   : > { %v4884_v29 = vpop.permute.xlu0 %4883  ;;  %4968 = vrot.lane.b32.xlu2 %v8743_v0, %s5641_s27  ;;  %v4830_v0 = vunpack.i.l.bf16 %v6604_v19 }
 0x136   : > { %v4886_v42 = vunpack.i.h.bf16 %v4884_v29  ;;  %v4885_v41 = vunpack.i.l.bf16 %v4884_v29  ;;  %v8745_v29 = vld [vmem:[#allocation12_spill] sm:$0xff] }
 0x137   : > { %v1365_v62 = vsel %vm1262_vm3, %v8745_v29, %v4795_v27  ;;  %v8748_v27 = vld [vmem:[#allocation42_spill] sm:$0xff] }
 0x138   : > { %v6691_v11 = vpop.f32.mrf.mxu1  ;;  %v1339_v7 = vsel %vm1328_vm4, %v1306_v49, %v4885_v41  ;;  %v1340_v6 = vsel %vm1328_vm4, %v1307_v46, %v4886_v42  ;;  %v1397_v50 = vsel %vm1295_vm2, %v1365_v62, %v4805_v61  ;;  %v4909_v42 = vpop.permute.xlu2 %4908  ;;  %v5562_v41 = vld [vmem:[%s5749_s25 + $0x90] sm:$0xff]  ;;  %v1430_v46 = vsel %vm1328_vm4, %v1398_v24, %v4816_v8 }
 0x139   : > { %v1472_v9 = vpack.c.bf16 %v1340_v6, %v1339_v7  ;;  %v1275_v28 = vsel %vm1262_vm3, %v5562_v41, %v4615_v2  ;;  %v4911_v14 = vunpack.i.h.bf16 %v4909_v42  ;;  %v4910_v43 = vunpack.i.l.bf16 %v4909_v42  ;;  %v8752_v42 = vld [vmem:[#allocation58_spill] sm:$0xff] }
 0x13a   : > { %v1429_v49 = vsel %vm1328_vm4, %v1397_v50, %v4815_v13  ;;  %4380 = vmatmul.msk.bf16.gmra.mxu2 %vm1262_vm3, %v1471_v37  ;;  %v1368_v61 = vsel %vm1262_vm3, %v8749_v20, %v4821_v63  ;;  %v4621_v62 = vunpack.i.h.bf16 %v8751_v52  ;;  %5003 = vrot.lane.b32.xlu0 %v8752_v42, %s5640_s26  ;;  %v8753_v63 = vld [vmem:[#allocation48_spill] sm:$0xff] }
 0x13b   : > { %v1464_v6 = vpack.c.bf16 %v1430_v46, %v1429_v49  ;;  %5008 = vrot.lane.b32.xlu1 %v5007_v32, %s5642_s28 }
 0x13c   : > { %v6729_v4 = vpop.permute.xlu1 %4903 }
 0x13d   : > { %v4899_v5 = vpop.permute.xlu0 %4898  ;;  %4983 = vrot.lane.b32.xlu2 %v8748_v27, %s5641_s27  ;;  %v8754_v27 = vld [vmem:[#allocation11_spill] sm:$0xff] }
 0x13e   : > { %v4901_v17 = vunpack.i.h.bf16 %v4899_v5  ;;  %v4900_v35 = vunpack.i.l.bf16 %v4899_v5  ;;  %v8750_v5 = vld [vmem:[#allocation6_spill] sm:$0xff] }
 0x13f   : > { %v1367_v44 = vsel %vm1262_vm3, %v8750_v5, %v4820_v51  ;;  %v4856_v51 = vunpack.i.h.bf16 %v6643_v3 }
 0x140   : > { %v6723_v54 = vpop.f32.mrf.mxu1  ;;  %v1308_v40 = vsel %vm1295_vm2, %v1275_v28, %v4900_v35  ;;  %v1309_v39 = vsel %vm1295_vm2, %v1276_v12, %v4901_v17  ;;  %v4924_v2 = vpop.permute.xlu2 %4923  ;;  %v4620_v17 = vunpack.i.l.bf16 %v8751_v52  ;;  %v1474_v28 = vpack.c.bf16 %v6427_v57, %v6424_v56  ;;  %v5567_v12 = vld [vmem:[%s5749_s25 + $0xb0] sm:$0xff] }
 0x141   : > { %v1341_v25 = vsel %vm1328_vm4, %v1308_v40, %v4910_v43  ;;  %v1342_v7 = vsel %vm1328_vm4, %v1309_v39, %v4911_v14  ;;  %v4926_v50 = vunpack.i.h.bf16 %v4924_v2  ;;  %v4925_v24 = vunpack.i.l.bf16 %v4924_v2  ;;  %v5566_v43 = vld [vmem:[%s5749_s25 + $0xa8] sm:$0xff] }
 0x142   : > { %v1475_v21 = vpack.c.bf16 %v1342_v7, %v1341_v25  ;;  %v1277_v48 = vsel %vm1262_vm3, %v5566_v43, %v4620_v17  ;;  %v1278_v37 = vsel %vm1262_vm3, %v5567_v12, %v4621_v62  ;;  %v4846_v57 = vunpack.i.h.bf16 %v6629_v55  ;;  %v8756_v17 = vld [vmem:[#allocation64_spill] sm:$0xff] }
 0x143   : > { %1799 = vmatmul.bf16.gmra.mxu1 %v1461_v45  ;;  %v1310_v40 = vsel %vm1295_vm2, %v1277_v48, %v4925_v24  ;;  %v1311_v39 = vsel %vm1295_vm2, %v1278_v37, %v4926_v50  ;;  %v4845_v7 = vunpack.i.l.bf16 %v6629_v55  ;;  %v4866_v55 = vunpack.i.h.bf16 %v6662_v22  ;;  %5018 = vrot.lane.b32.xlu0 %v8756_v17, %s5640_s26  ;;  %v8760_v48 = vld [vmem:[#allocation21_spill] sm:$0xff]  ;;  %v8761_v37 = vld [vmem:[#allocation20_spill] sm:$0xff] }
 0x144   : > { %1730 = vmatmul.bf16.gmra.mxu0 %v1472_v9  ;;  %v6760_v18 = vpop.permute.xlu1 %4918  ;;  %v4831_v9 = vunpack.i.h.bf16 %v6604_v19  ;;  %v1399_v19 = vsel %vm1295_vm2, %v1367_v44, %v4830_v0  ;;  %v8755_v0 = vld [vmem:[#allocation10_spill] sm:$0xff]  ;;  %v4865_v44 = vunpack.i.l.bf16 %v6662_v22  ;;  %v5643_v52 = vmov 0.0  }
 0x145   : > { %v1431_v60 = vsel %vm1328_vm4, %v1399_v19, %v4840_v53  ;;  %4998 = vrot.lane.b32.xlu2 %v8753_v63, %s5641_s27  ;;  %2068 = vst.msk [vmem:[#allocation2] sm:$0xff] %vm1262_vm3, %v5643_v52  ;;  %v5569_v53 = vld [vmem:[%s5749_s25 + $0x170] sm:$0xff]  ;;  %v8758_v19 = vld [vmem:[#allocation23_spill] sm:$0xff]  ;;  %v4880_v43 = vunpack.i.l.bf16 %v6686_v38  ;;  %v8763_v63 = vld [vmem:[#allocation28_spill] sm:$0xff] }
 0x146   : > { %v1400_v35 = vsel %vm1295_vm2, %v1368_v61, %v4831_v9  ;;  %v1370_v9 = vsel %vm1262_vm3, %v8754_v27, %v4846_v57  ;;  %v1369_v61 = vsel %vm1262_vm3, %v8755_v0, %v4845_v7  ;;  %2069 = vst.msk [vmem:[#allocation2 + $0x8] sm:$0xff] %vm1262_vm3, %v5643_v52  ;;  %v8757_v22 = vld [vmem:[#allocation22_spill] sm:$0xff]  ;;  %v6863_v57 = vld [vmem:[%s5749_s25 + $0x180] sm:$0xff]  ;;  %v6866_v7 = vld [vmem:[%s5749_s25 + $0x188] sm:$0xff] }
 0x147   : > { %v1432_v14 = vsel %vm1328_vm4, %v1400_v35, %v4841_v59  ;;  %v1402_v62 = vsel %vm1295_vm2, %v1370_v9, %v4856_v51  ;;  %v5568_v59 = vld [vmem:[%s5749_s25 + $0x168] sm:$0xff]  ;;  %2071 = vst.msk [vmem:[#allocation2 + $0x10] sm:$0x3] %vm2070_vm5, %v5643_v52  ;;  %v1477_v35 = vpack.c.bf16 %v8758_v19, %v8757_v22  ;;  %v8764_v9 = vld [vmem:[#allocation67_spill] sm:$0xff]  ;;  %v8767_v22 = vld [vmem:[#allocation18_spill] sm:$0xff]  ;;  %v636_v20 = vrot.slane %v6863_v57, 2 }
 0x148   : > { %v6741_v15 = vpop.f32.mrf.mxu1  ;;  %v1467_v25 = vpack.c.bf16 %v1432_v14, %v1431_v60  ;;  %2075 = vst.msk [vmem:[#allocation2 + $0x1a8] sm:$0x3] %vm2070_vm5, %v5643_v52  ;;  %v1434_v31 = vsel %vm1328_vm4, %v1402_v62, %v4866_v55  ;;  %v8759_v60 = vld [vmem:[#allocation55_spill] sm:$0xff]  ;;  %v4881_v14 = vunpack.i.h.bf16 %v6686_v38  ;;  %v5047_v38 = vpack.i.bf16 %v6866_v7, %v6863_v57 }
 0x149   : > { %2073 = vst.msk [vmem:[#allocation2 + $0x198] sm:$0xff] %vm1262_vm3, %v5643_v52  ;;  %v4895_v62 = vunpack.i.l.bf16 %v6721_v23 }
 0x14a   : > { %4381 = vmatmul.msk.bf16.gmra.mxu2 %vm1262_vm3, %v1474_v28  ;;  %2074 = vst.msk [vmem:[#allocation2 + $0x1a0] sm:$0xff] %vm1262_vm3, %v5643_v52 }
 0x14b   : > { %2095 = vst.msk [vmem:[#allocation2 + $0x11] sm:$0x1] %vm2076_vm6, %v5643_v52  ;;  %v1373_v19 = vsel %vm1262_vm3, %v8767_v22, %v4895_v62 }
 0x14c   : > { %v4934_v8 = vpop.permute.xlu1 %4933  ;;  %2077 = vst.msk [vmem:[#allocation2] sm:$0x1] %vm2076_vm6, %v5643_v52 }
 0x14d   : > { %v4936_v30 = vunpack.i.h.bf16 %v4934_v8  ;;  %v4935_v41 = vunpack.i.l.bf16 %v4934_v8  ;;  %v5022_v8 = vpack.i.bf16 %v5569_v53, %v5568_v59  ;;  %v2178_v24 = vld [vmem:[#allocation2 + $0x1] sm:$0xff]  ;;  %5013 = vrot.lane.b32.xlu2 %v8759_v60, %s5641_s27  ;;  %2078 = vst.msk [vmem:[#allocation2 + $0x18] sm:$0x1] %vm2076_vm6, %v5643_v52  ;;  %v4906_v59 = vunpack.i.h.bf16 %v6729_v4 }
 0x14e   : > { %v2179_v42 = vld [vmem:[#allocation2 + $0x9] sm:$0xff]  ;;  %v4905_v53 = vunpack.i.l.bf16 %v6729_v4  ;;  %2079 = vst.msk [vmem:[#allocation2 + $0x30] sm:$0x1] %vm2076_vm6, %v5643_v52 }
 0x14f   : > { %v1343_v49 = vsel %vm1328_vm4, %v1310_v40, %v4935_v41  ;;  %v1344_v46 = vsel %vm1328_vm4, %v1311_v39, %v4936_v30  ;;  %5023 = vrot.lane.b32.xlu1 %v5022_v8, %s5642_s28  ;;  %v4871_v30 = vunpack.i.h.bf16 %v6670_v26  ;;  %v4870_v41 = vunpack.i.l.bf16 %v6670_v26  ;;  %v4914_v8 = vpop.permute.xlu0 %4913  ;;  %2080 = vst.msk [vmem:[#allocation2 + $0x48] sm:$0x1] %vm2076_vm6, %v5643_v52 }
 0x150   : > { %v6765_v45 = vpop.f32.mrf.mxu1  ;;  %v5032_v28 = vpack.i.bf16 %v2179_v42, %v2178_v24  ;;  %v4891_v39 = vunpack.i.h.bf16 %v6701_v33  ;;  %v4890_v26 = vunpack.i.l.bf16 %v6701_v33  ;;  %2081 = vst.msk [vmem:[#allocation2 + $0x60] sm:$0x1] %vm2076_vm6, %v5643_v52  ;;  %v4915_v4 = vunpack.i.l.bf16 %v4914_v8  ;;  %v2210_v24 = vld [vmem:[#allocation2 + $0x2] sm:$0xff] }
 0x151   : > { %v1372_v12 = vsel %vm1262_vm3, %v8760_v48, %v4871_v30  ;;  %v1371_v40 = vsel %vm1262_vm3, %v8761_v37, %v4870_v41  ;;  %2082 = vst.msk [vmem:[#allocation2 + $0x78] sm:$0x1] %vm2076_vm6, %v5643_v52  ;;  %v8768_v41 = vld [vmem:[#allocation37_spill] sm:$0xff] }
 0x152   : > { %5033 = vrot.lane.b32.xlu0 %v5032_v28, %s5640_s26  ;;  %v2211_v42 = vld [vmem:[#allocation2 + $0xa] sm:$0xff]  ;;  %2083 = vst.msk [vmem:[#allocation2 + $0x90] sm:$0x1] %vm2076_vm6, %v5643_v52  ;;  %v4939_v62 = vpop.permute.xlu2 %4938 }
 0x153   : > { %1804 = vmatmul.bf16.gmra.mxu1 %v1464_v6  ;;  %v1478_v6 = vpack.c.bf16 %v1344_v46, %v1343_v49  ;;  %v1403_v46 = vsel %vm1295_vm2, %v1371_v40, %v4880_v43  ;;  %v5037_v30 = vpack.i.bf16 %v2211_v42, %v2210_v24  ;;  %2084 = vst.msk [vmem:[#allocation2 + $0xa8] sm:$0x1] %vm2076_vm6, %v5643_v52  ;;  %v8769_v28 = vld [vmem:[#allocation38_spill] sm:$0xff] }
 0x154   : > { %1735 = vmatmul.bf16.gmra.mxu0 %v1475_v21  ;;  %v4855_v21 = vunpack.i.l.bf16 %v6643_v3  ;;  %v1435_v33 = vsel %vm1328_vm4, %v1403_v46, %v4890_v26  ;;  %2085 = vst.msk [vmem:[#allocation2 + $0xc0] sm:$0x1] %vm2076_vm6, %v5643_v52  ;;  %v1483_v60 = vpack.c.bf16 %v8769_v28, %v8768_v41  ;;  %v599_v26 = vrot.slane %v6863_v57, 1  ;;  %v8774_v41 = vld [vmem:[#allocation43_spill] sm:$0xff]  ;;  %v8775_v28 = vld [vmem:[#allocation44_spill] sm:$0xff] }
 0x155   : > { %2086 = vst.msk [vmem:[#allocation2 + $0xd8] sm:$0x1] %vm2076_vm6, %v5643_v52  ;;  %v600_v46 = vrot.slane %v6866_v7, 1 }
 0x156   : > { %v1401_v3 = vsel %vm1295_vm2, %v1369_v61, %v4855_v21  ;;  %2087 = vst.msk [vmem:[#allocation2 + $0xf0] sm:$0x1] %vm2076_vm6, %v5643_v52 }
 0x157   : > { %v1433_v16 = vsel %vm1328_vm4, %v1401_v3, %v4865_v44  ;;  %5048 = vrot.lane.b32.xlu1 %v5047_v38, %s5642_s28  ;;  %v4896_v44 = vunpack.i.h.bf16 %v6721_v23  ;;  %v8765_v3 = vld [vmem:[#allocation61_spill] sm:$0xff]  ;;  %v8766_v23 = vld [vmem:[#allocation19_spill] sm:$0xff]  ;;  %2088 = vst.msk [vmem:[#allocation2 + $0x108] sm:$0x1] %vm2076_vm6, %v5643_v52 }
 0x158   : > { %v6780_v13 = vpop.f32.mrf.mxu1  ;;  %v1470_v32 = vpack.c.bf16 %v1434_v31, %v1433_v16  ;;  %5028 = vrot.lane.b32.xlu2 %v8765_v3, %s5641_s27  ;;  %v4916_v16 = vunpack.i.h.bf16 %v4914_v8  ;;  %v1405_v31 = vsel %vm1295_vm2, %v1373_v19, %v4905_v53  ;;  %2089 = vst.msk [vmem:[#allocation2 + $0x120] sm:$0x1] %vm2076_vm6, %v5643_v52  ;;  %v8772_v3 = vld [vmem:[#allocation17_spill] sm:$0xff]  ;;  %v8773_v53 = vld [vmem:[#allocation16_spill] sm:$0xff]  ;;  %v4941_v19 = vunpack.i.h.bf16 %v4939_v62 }
 0x159   : > { %v1374_v17 = vsel %vm1262_vm3, %v8766_v23, %v4896_v44  ;;  %2090 = vst.msk [vmem:[#allocation2 + $0x138] sm:$0x1] %vm2076_vm6, %v5643_v52 }
 0x15a   : > { %4382 = vmatmul.msk.bf16.gmra.mxu2 %vm1262_vm3, %v1477_v35  ;;  %5043 = vrot.lane.b32.xlu0 %v8764_v9, %s5640_s26  ;;  %2091 = vst.msk [vmem:[#allocation2 + $0x150] sm:$0x1] %vm2076_vm6, %v5643_v52 }
 0x15b   : > { %2092 = vst.msk [vmem:[#allocation2 + $0x168] sm:$0x1] %vm2076_vm6, %v5643_v52 }
 0x15c   : > { %2093 = vst.msk [vmem:[#allocation2 + $0x180] sm:$0x1] %vm2076_vm6, %v5643_v52 }
 0x15d   : > { %2094 = vst.msk [vmem:[#allocation2 + $0x198] sm:$0x1] %vm2076_vm6, %v5643_v52 }
 0x15e   : > { %2096 = vst.msk [vmem:[#allocation2 + $0x29] sm:$0x1] %vm2076_vm6, %v5643_v52 }
 0x15f   : > { %2097 = vst.msk [vmem:[#allocation2 + $0x41] sm:$0x1] %vm2076_vm6, %v5643_v52 }
 0x160   : > { %v6803_v56 = vpop.f32.mrf.mxu1  ;;  %5038 = vrot.lane.b32.xlu2 %v5037_v30, %s5642_s28  ;;  %2098 = vst.msk [vmem:[#allocation2 + $0x59] sm:$0x1] %vm2076_vm6, %v5643_v52 }
 0x161   : > { %2099 = vst.msk [vmem:[#allocation2 + $0x71] sm:$0x1] %vm2076_vm6, %v5643_v52 }
 0x162   : > { %2100 = vst.msk [vmem:[#allocation2 + $0x89] sm:$0x1] %vm2076_vm6, %v5643_v52 }
 0x163   : > { %1809 = vmatmul.bf16.gmra.mxu1 %v1467_v25  ;;  %v1404_v25 = vsel %vm1295_vm2, %v1372_v12, %v4881_v14  ;;  %v1437_v14 = vsel %vm1328_vm4, %v1405_v31, %v4915_v4  ;;  %v6926_v12 = vld [vmem:[%s5749_s25 + $0x190] sm:$0x3]  ;;  %2101 = vst.msk [vmem:[#allocation2 + $0xa1] sm:$0x1] %vm2076_vm6, %v5643_v52 }
 0x164   : > { %1740 = vmatmul.bf16.gmra.mxu0 %v1478_v6  ;;  %v8762_v6 = vld [vmem:[#allocation27_spill] sm:$0xff]  ;;  %v1436_v21 = vsel %vm1328_vm4, %v1404_v25, %v4891_v39  ;;  %v602_v38 = vrot.slane %v6926_v12, 1  ;;  %2102 = vst.msk [vmem:[#allocation2 + $0xb9] sm:$0x1] %vm2076_vm6, %v5643_v52  ;;  %v639_v34 = vrot.slane %v6926_v12, 2 }
 0x165   : > { %v1480_v51 = vpack.c.bf16 %v8763_v63, %v8762_v6  ;;  %v1473_v61 = vpack.c.bf16 %v1436_v21, %v1435_v33  ;;  %v6943_v6 = vsel %vm434_vm0, %v599_v26, %v600_v46  ;;  %v4921_v63 = vunpack.i.h.bf16 %v6760_v18  ;;  %v4929_v21 = vpop.permute.xlu0 %4928  ;;  %2103 = vst.msk [vmem:[#allocation2 + $0xd1] sm:$0x1] %vm2076_vm6, %v5643_v52 }
 0x166   : > { %8770 = vst [vmem:[#allocation54_spill] sm:$0xff] %v6943_v6  ;;  %v6952_v9 = vsel %vm434_vm0, %v600_v46, %v602_v38  ;;  %v4930_v44 = vunpack.i.l.bf16 %v4929_v21 }
 0x167   : > { %8771 = vst [vmem:[#allocation32_spill] sm:$0xff] %v6952_v9 }
 0x168   : > { %v6817_v2 = vpop.f32.mrf.mxu1  ;;  %2104 = vst.msk [vmem:[#allocation2 + $0xe9] sm:$0x1] %vm2076_vm6, %v5643_v52 }
 0x169   : > { %2105 = vst.msk [vmem:[#allocation2 + $0x101] sm:$0x1] %vm2076_vm6, %v5643_v52 }
 0x16a   : > { %4383 = vmatmul.msk.bf16.gmra.mxu2 %vm1262_vm3, %v1480_v51  ;;  %v4920_v51 = vunpack.i.l.bf16 %v6760_v18  ;;  %v4931_v18 = vunpack.i.h.bf16 %v4929_v21  ;;  %2106 = vst.msk [vmem:[#allocation2 + $0x119] sm:$0x1] %vm2076_vm6, %v5643_v52 }
 0x16b   : > { %2107 = vst.msk [vmem:[#allocation2 + $0x131] sm:$0x1] %vm2076_vm6, %v5643_v52 }
 0x16c   : > { %v1375_v8 = vsel %vm1262_vm3, %v8773_v53, %v4920_v51  ;;  %2108 = vst.msk [vmem:[#allocation2 + $0x149] sm:$0x1] %vm2076_vm6, %v5643_v52 }
 0x16d   : > { %v1407_v31 = vsel %vm1295_vm2, %v1375_v8, %v4930_v44  ;;  %2109 = vst.msk [vmem:[#allocation2 + $0x161] sm:$0x1] %vm2076_vm6, %v5643_v52  ;;  %v8776_v44 = vld [vmem:[#allocation25_spill] sm:$0xff] }
 0x16e   : > { %2110 = vst.msk [vmem:[#allocation2 + $0x179] sm:$0x1] %vm2076_vm6, %v5643_v52 }
 0x16f   : > { %2111 = vst.msk [vmem:[#allocation2 + $0x191] sm:$0x1] %vm2076_vm6, %v5643_v52 }
 0x170   : > { %v6843_v50 = vpop.f32.mrf.mxu1  ;;  %2112 = vst.msk [vmem:[#allocation2 + $0x1a9] sm:$0x1] %vm2076_vm6, %v5643_v52 }
 0x171   : > { %v6947_v33 = vpop.f32.mrf.mxu0 }
 0x173   : > { %1814 = vmatmul.bf16.gmra.mxu1 %v1470_v32  ;;  %v1406_v32 = vsel %vm1295_vm2, %v1374_v17, %v4906_v59  ;;  %v1376_v59 = vsel %vm1262_vm3, %v8772_v3, %v4921_v63 }
 0x174   : > { %v1438_v43 = vsel %vm1328_vm4, %v1406_v32, %v4916_v16  ;;  %v4940_v16 = vunpack.i.l.bf16 %v4939_v62  ;;  %v1408_v4 = vsel %vm1295_vm2, %v1376_v59, %v4931_v18  ;;  %v8777_v59 = vld [vmem:[#allocation24_spill] sm:$0xff] }
 0x175   : > { %v1476_v40 = vpack.c.bf16 %v1438_v43, %v1437_v14  ;;  %v1440_v30 = vsel %vm1328_vm4, %v1408_v4, %v4941_v19 }
 0x176   : > { %v1439_v42 = vsel %vm1328_vm4, %v1407_v31, %v4940_v16 }
 0x177   : > { %v1479_v14 = vpack.c.bf16 %v1440_v30, %v1439_v42 }
 0x178   : > { %v6858_v49 = vpop.f32.mrf.mxu1  ;;  %v4944_v43 = vpop.permute.xlu0 %4943 }
 0x179   : > { %v6985_v24 = vpop.f32.mrf.mxu0  ;;  %v4946_v26 = vunpack.i.h.bf16 %v4944_v43  ;;  %v4945_v46 = vunpack.i.l.bf16 %v4944_v43  ;;  %v4949_v38 = vpop.permute.xlu1 %4948 }
 0x17a   : > { %4384 = vmatmul.msk.bf16.gmra.mxu2 %vm1262_vm3, %v1483_v60  ;;  %v1486_v60 = vpack.c.bf16 %v8775_v28, %v8774_v41  ;;  %v4951_v51 = vunpack.i.h.bf16 %v4949_v38  ;;  %v4950_v21 = vunpack.i.l.bf16 %v4949_v38  ;;  %v8778_v28 = vld [vmem:[#allocation49_spill] sm:$0xff] }
 0x17b   : > { %v1378_v62 = vsel %vm1262_vm3, %v8776_v44, %v4946_v26  ;;  %v1377_v8 = vsel %vm1262_vm3, %v8777_v59, %v4945_v46 }
 0x17c   : > { %v6928_v39 = vpop.f32.mrf.mxu2  ;;  %4385 = vmatmul.msk.bf16.vlgmr.msra.gmra.mxu3 %vm1262_vm3, %v1486_v60  ;;  %v1409_v31 = vsel %vm1295_vm2, %v1377_v8, %v4950_v21  ;;  %v1410_v42 = vsel %vm1295_vm2, %v1378_v62, %v4951_v51  ;;  %v8779_v60 = vld [vmem:[#allocation50_spill] sm:$0xff]  ;;  %v7037_v51 = vld [vmem:[%s8556_s2] ss:$0 sm:$0xff] }
 0x180   : > { %v6878_v55 = vpop.f32.mrf.mxu1  ;;  %v4959_v26 = vpop.permute.xlu0 %4958 }
 0x181   : > { %v1711_v18 = vpop.f32.mrf.mxu0  ;;  %v4960_v62 = vunpack.i.l.bf16 %v4959_v26 }
 0x183   : > { %1819 = vmatmul.bf16.gmra.mxu1 %v1473_v61  ;;  %v5052_v61 = vpack.i.bf16 %v6952_v9, %v6943_v6 }
 0x184   : > { %v6979_v32 = vpop.f32.mrf.mxu2 }
 0x185   : > { %5053 = vrot.lane.b32.xlu2 %v5052_v61, %s5641_s27  ;;  %v4954_v61 = vpop.permute.xlu2 %4953  ;;  %v4964_v8 = vpop.permute.xlu1 %4963 }
 0x186   : > { %v4956_v16 = vunpack.i.h.bf16 %v4954_v61  ;;  %v4955_v4 = vunpack.i.l.bf16 %v4954_v61  ;;  %v4961_v61 = vunpack.i.h.bf16 %v4959_v26 }
 0x188   : > { %v6902_v35 = vpop.f32.mrf.mxu1  ;;  %v1441_v52 = vsel %vm1328_vm4, %v1409_v31, %v4955_v4  ;;  %v1442_v30 = vsel %vm1328_vm4, %v1410_v42, %v4956_v16  ;;  %v7043_v4 = vld [vmem:[%s8557_s3] ss:$0 sm:$0xff]  ;;  %v4966_v42 = vunpack.i.h.bf16 %v4964_v8 }
 0x189   : > { %v1482_v43 = vpack.c.bf16 %v1442_v30, %v1441_v52  ;;  %v7030_v46 = vpop.f32.mrf.mxu0 }
 0x18c   : > { %v7010_v63 = vpop.f32.mrf.mxu2 }
 0x18f   : > { %v4969_v52 = vpop.permute.xlu2 %4968 }
 0x190   : > { %v6935_v25 = vpop.f32.mrf.mxu1 }
 0x193   : > { %1824 = vmatmul.bf16.gmra.mxu1 %v1476_v40 }
 0x194   : > { %v7026_v41 = vpop.f32.mrf.mxu2 }
 0x198   : > { %v6971_v17 = vpop.f32.mrf.mxu1 }
 0x19c   : > { %v7046_v30 = vpop.f32.mrf.mxu2 }
 0x1a0   : > { %v6999_v40 = vpop.f32.mrf.mxu1 }
 0x1a3   : > { %1829 = vmatmul.bf16.gmra.mxu1 %v1479_v14  ;;  %v1489_v14 = vpack.c.bf16 %v8779_v60, %v8778_v28  ;;  %v4524_v28 = vld [vmem:[%s8558_s4 + $0x88] sm:$0xff]  ;;  %v8780_v60 = vld [vmem:[#allocation31_spill] sm:$0xff] }
 0x1a4   : > { %3819 = vmatpush.bf16.msrb.mxu0 %v4524_v28  ;;  %v8783_v28 = vld [vmem:[#allocation57_spill] sm:$0xff] }
 0x1a5   : > { %4386 = vmatmul.msk.bf16.gmra.mxu3 %vm1262_vm3, %v1489_v14  ;;  %v8781_v14 = vld [vmem:[#allocation30_spill] sm:$0xff] }
 0x1a6   : > { %v1379_v26 = vsel %vm1262_vm3, %v8781_v14, %v4960_v62 }
 0x1a8   : > { %v7020_v19 = vpop.f32.mrf.mxu1 }
 0x1b0   : > { %v1795_v38 = vpop.f32.mrf.mxu1 }
 0x1b1   : > { %v1796_v21 = vadd.f32 %v1795_v38, %v6947_v33  ;;  %v4965_v33 = vunpack.i.l.bf16 %v4964_v8 }
 0x1b3   : > { %v1885_v16 = vadd.f32 %v6928_v39, %v1796_v21  ;;  %1834 = vmatmul.bf16.gmra.mxu1 %v1482_v43  ;;  %v1380_v39 = vsel %vm1262_vm3, %v8780_v60, %v4961_v61  ;;  %v4971_v21 = vunpack.i.h.bf16 %v4969_v52  ;;  %v1411_v59 = vsel %vm1295_vm2, %v1379_v26, %v4965_v33  ;;  %v4523_v61 = vld [vmem:[%s8558_s4 + $0x80] sm:$0xff]  ;;  %v7062_v60 = vpop.f32.mrf.mxu0 }
 0x1b4   : > { %v1412_v3 = vsel %vm1295_vm2, %v1380_v39, %v4966_v42  ;;  %3820 = vmatpush.bf16.msrb.mxu0 %v4523_v61  ;;  %v8782_v33 = vld [vmem:[#allocation56_spill] sm:$0xff] }
 0x1b5   : > { %v1968_v31 = vmul.f32 %v7037_v51, %v1885_v16  ;;  %v4970_v16 = vunpack.i.l.bf16 %v4969_v52  ;;  %v1444_v52 = vsel %vm1328_vm4, %v1412_v3, %v4971_v21  ;;  %v1492_v42 = vpack.c.bf16 %v8783_v28, %v8782_v33  ;;  %v8785_v28 = vld [vmem:[#allocation34_spill] sm:$0xff] }
 0x1b7   : > { %v2004_v38 = vadd.f32 %v7043_v4, %v1968_v31  ;;  %v1443_v31 = vsel %vm1328_vm4, %v1411_v59, %v4970_v16  ;;  %4387 = vmatmul.msk.bf16.gmra.mxu3 %vm1262_vm3, %v1492_v42  ;;  %v4979_v16 = vpop.permute.xlu1 %4978 }
 0x1b8   : > { %v1797_v43 = vpop.f32.mrf.mxu1  ;;  %v1485_v26 = vpack.c.bf16 %v1444_v52, %v1443_v31  ;;  %v4980_v31 = vunpack.i.l.bf16 %v4979_v16  ;;  %v4984_v52 = vpop.permute.xlu2 %4983 }
 0x1b9   : > { %v2036_v8 = vmax.f32 %v2004_v38, 0.0  ;;  %v1798_v44 = vadd.f32 %v1797_v43, %v6985_v24  ;;  %v4974_v38 = vpop.permute.xlu0 %4973  ;;  %v7072_v43 = vpop.f32.mrf.mxu2 }
 0x1ba   : > { %v4975_v59 = vunpack.i.l.bf16 %v4974_v38 }
 0x1bb   : > { %2114 = vst.msk [vmem:[#allocation2 + $0x19] sm:$0xff] %vm1262_vm3, %v2036_v8  ;;  %v1887_v62 = vadd.f32 %v6979_v32, %v1798_v44  ;;  %v4976_v8 = vunpack.i.h.bf16 %v4974_v38  ;;  %v7077_v21 = vpop.f32.mrf.mxu0  ;;  %v4985_v38 = vunpack.i.l.bf16 %v4984_v52 }
 0x1bd   : > { %v1969_v24 = vmul.f32 %v7037_v51, %v1887_v62  ;;  %v4981_v62 = vunpack.i.h.bf16 %v4979_v16 }
 0x1bf   : > { %v2005_v39 = vadd.f32 %v7043_v4, %v1969_v24  ;;  %v8784_v24 = vld [vmem:[#allocation35_spill] sm:$0xff] }
 0x1c0   : > { %v1800_v14 = vpop.f32.mrf.mxu1  ;;  %v1382_v33 = vsel %vm1262_vm3, %v8784_v24, %v4976_v8 }
 0x1c1   : > { %v2037_v32 = vmax.f32 %v2005_v39, 0.0  ;;  %v1801_v44 = vadd.f32 %v1800_v14, %v1711_v18  ;;  %v1381_v18 = vsel %vm1262_vm3, %v8785_v28, %v4975_v59  ;;  %v4986_v39 = vunpack.i.h.bf16 %v4984_v52  ;;  %v4989_v52 = vpop.permute.xlu0 %4988 }
 0x1c2   : > { %v7088_v16 = vld [vmem:[#allocation2 + $0x19] sm:$0xff] }
 0x1c3   : > { %2115 = vst.msk [vmem:[#allocation2 + $0x21] sm:$0xff] %vm1262_vm3, %v2037_v32  ;;  %v1890_v3 = vadd.f32 %v7010_v63, %v1801_v44  ;;  %1839 = vmatmul.bf16.gmra.mxu1 %v1485_v26  ;;  %v1413_v32 = vsel %vm1295_vm2, %v1381_v18, %v4980_v31  ;;  %v1414_v44 = vsel %vm1295_vm2, %v1382_v33, %v4981_v62  ;;  %v7103_v18 = vpop.f32.mrf.mxu0 }
 0x1c4   : > { %v1445_v31 = vsel %vm1328_vm4, %v1413_v32, %v4985_v38  ;;  %v1446_v62 = vsel %vm1328_vm4, %v1414_v44, %v4986_v39  ;;  %v4990_v38 = vunpack.i.l.bf16 %v4989_v52  ;;  %v4991_v44 = vunpack.i.h.bf16 %v4989_v52  ;;  %v8788_v52 = vld [vmem:[#allocation40_spill] sm:$0xff] }
 0x1c5   : > { %v1970_v61 = vmul.f32 %v7037_v51, %v1890_v3  ;;  %v7090_v3 = vpop.f32.mrf.mxu2 }
 0x1c7   : > { %v2006_v14 = vadd.f32 %v7043_v4, %v1970_v61 }
 0x1c8   : > { %v1802_v42 = vpop.f32.mrf.mxu1 }
 0x1c9   : > { %v2038_v63 = vmax.f32 %v2006_v14, 0.0  ;;  %v1803_v26 = vadd.f32 %v1802_v42, %v7030_v46 }
 0x1ca   : > { %v2306_v8 = vld [vmem:[#allocation2 + $0x1a] sm:$0xff]  ;;  %v2307_v24 = vld [vmem:[#allocation2 + $0x22] sm:$0xff] }
 0x1cb   : > { %v7092_v53 = vld [vmem:[#allocation2 + $0x21] sm:$0xff]  ;;  %2116 = vst.msk [vmem:[#allocation2 + $0x31] sm:$0xff] %vm1262_vm3, %v2038_v63  ;;  %v1892_v59 = vadd.f32 %v7026_v41, %v1803_v26  ;;  %v5057_v61 = vpack.i.bf16 %v2307_v24, %v2306_v8  ;;  %v8786_v41 = vld [vmem:[#allocation62_spill] sm:$0xff]  ;;  %v8787_v24 = vld [vmem:[#allocation63_spill] sm:$0xff]  ;;  %v1488_v63 = vpack.c.bf16 %v1446_v62, %v1445_v31  ;;  %v4994_v26 = vpop.permute.xlu1 %4993  ;;  %v7139_v23 = vpop.f32.mrf.mxu0 }
 0x1cc   : > { %v5067_v46 = vpack.i.bf16 %v7092_v53, %v7088_v16  ;;  %v1495_v14 = vpack.c.bf16 %v8787_v24, %v8786_v41  ;;  %v7109_v32 = vld [vmem:[#allocation2 + $0x20] sm:$0xff]  ;;  %v4995_v41 = vunpack.i.l.bf16 %v4994_v26  ;;  %v4996_v24 = vunpack.i.h.bf16 %v4994_v26 }
 0x1cd   : > { %v1971_v33 = vmul.f32 %v7037_v51, %v1892_v59  ;;  %5058 = vrot.lane.b32.xlu1 %v5057_v61, %s5640_s26  ;;  %5073 = vrot.lane.b32.xlu2 %v5057_v61, %s5642_s28  ;;  %v4999_v61 = vpop.permute.xlu2 %4998 }
 0x1ce   : > { %5068 = vrot.lane.b32.xlu0 %v5067_v46, %s5640_s26  ;;  %4388 = vmatmul.msk.bf16.gmra.mxu3 %vm1262_vm3, %v1495_v14  ;;  %v7113_v46 = vld [vmem:[#allocation2 + $0x18] sm:$0xff]  ;;  %v7121_v14 = vpop.f32.mrf.mxu2  ;;  %v5001_v28 = vunpack.i.h.bf16 %v4999_v61 }
 0x1cf   : > { %v2007_v42 = vadd.f32 %v7043_v4, %v1971_v33  ;;  %v5062_v62 = vpack.i.bf16 %v7109_v32, %v7113_v46  ;;  %v1383_v33 = vsel %vm1262_vm3, %v8788_v52, %v4990_v38  ;;  %v7137_v52 = vld [vmem:[%s5749_s25 + $0x1a8] sm:$0x3] }
 0x1d0   : > { %v1805_v39 = vpop.f32.mrf.mxu1  ;;  %v647_v0 = vrot.slane %v7137_v52, 1 }
 0x1d1   : > { %v2039_v8 = vmax.f32 %v2007_v42, 0.0  ;;  %v1806_v59 = vadd.f32 %v1805_v39, %v7062_v60  ;;  %v8789_v60 = vld [vmem:[#allocation41_spill] sm:$0xff] }
 0x1d2   : > { %v1384_v42 = vsel %vm1262_vm3, %v8789_v60, %v4991_v44 }
 0x1d3   : > { %2117 = vst.msk [vmem:[#allocation2 + $0x39] sm:$0xff] %vm1262_vm3, %v2039_v8  ;;  %v1895_v31 = vadd.f32 %v7046_v30, %v1806_v59  ;;  %1844 = vmatmul.bf16.gmra.mxu1 %v1488_v63  ;;  %v5000_v8 = vunpack.i.l.bf16 %v4999_v61  ;;  %v7128_v30 = vld [vmem:[%s5749_s25 + $0x198] sm:$0xff]  ;;  %v7131_v63 = vld [vmem:[%s5749_s25 + $0x1a0] sm:$0xff]  ;;  %v1415_v59 = vsel %vm1295_vm2, %v1383_v33, %v4995_v41  ;;  %v1416_v26 = vsel %vm1295_vm2, %v1384_v42, %v4996_v24 }
 0x1d4   : > { %v644_v41 = vrot.slane %v7128_v30, 1  ;;  %v2371_v61 = vld [vmem:[#allocation2 + $0x31] sm:$0xff]  ;;  %v1448_v27 = vsel %vm1328_vm4, %v1416_v26, %v5001_v28 }
 0x1d5   : > { %v1972_v39 = vmul.f32 %v7037_v51, %v1895_v31  ;;  %5063 = vrot.lane.b32.xlu1 %v5062_v62, %s5641_s27  ;;  %v645_v31 = vrot.slane %v7131_v63, 1  ;;  %v5087_v62 = vpack.i.bf16 %v7131_v63, %v7128_v30  ;;  %v1447_v33 = vsel %vm1328_vm4, %v1415_v59, %v5000_v8  ;;  %v7147_v24 = vpop.permute.xlu2 %5013  ;;  %v2339_v59 = vld [vmem:[#allocation2 + $0x30] sm:$0xff] }
 0x1d6   : > { %v7163_v57 = vpop.f32.mrf.mxu2 }
 0x1d7   : > { %v2008_v38 = vadd.f32 %v7043_v4, %v1972_v39  ;;  %v5004_v39 = vpop.permute.xlu0 %5003 }
 0x1d8   : > { %v1807_v44 = vpop.f32.mrf.mxu1 }
 0x1d9   : > { %v2040_v60 = vmax.f32 %v2008_v38, 0.0  ;;  %v1808_v22 = vadd.f32 %v1807_v44, %v7077_v21  ;;  %v637_v38 = vrot.slane %v6866_v7, 2  ;;  %v646_v7 = vsel %vm434_vm0, %v644_v41, %v645_v31 }
 0x1da   : > { %v2403_v42 = vld [vmem:[#allocation2 + $0x32] sm:$0xff]  ;;  %v2404_v48 = vld [vmem:[#allocation2 + $0x3a] sm:$0xff] }
 0x1db   : > { %v2372_v37 = vld [vmem:[#allocation2 + $0x39] sm:$0xff]  ;;  %2118 = vst.msk [vmem:[#allocation2 + $0x49] sm:$0xff] %vm1262_vm3, %v2040_v60  ;;  %v1897_v21 = vadd.f32 %v7072_v43, %v1808_v22  ;;  %v3397_v44 = vpack.c.bf16 %v2404_v48, %v2403_v42  ;;  %v8790_v22 = vld [vmem:[#allocation65_spill] sm:$0xff]  ;;  %v648_v60 = vsel %vm434_vm0, %v645_v31, %v647_v0  ;;  %v7175_v26 = vsel %vm515_vm1, %v636_v20, %v637_v38  ;;  %v1726_v0 = vpop.f32.mrf.mxu0 }
 0x1dc   : > { %v7155_v8 = vpack.i.bf16 %v2372_v37, %v2371_v61  ;;  %v2340_v5 = vld [vmem:[#allocation2 + $0x38] sm:$0xff]  ;;  %v1491_v37 = vpack.c.bf16 %v1448_v27, %v1447_v33  ;;  %v5005_v33 = vunpack.i.l.bf16 %v5004_v39  ;;  %v5097_v31 = vpack.i.bf16 %v648_v60, %v646_v7  ;;  %v8793_v7 = vld [vmem:[#allocation46_spill] sm:$0xff] }
 0x1dd   : > { %v7158_v29 = vpack.i.bf16 %v2340_v5, %v2339_v59  ;;  %v1973_v28 = vmul.f32 %v7037_v51, %v1897_v21  ;;  %5088 = vrot.lane.b32.xlu1 %v5087_v62, %s5642_s28  ;;  %4464 = vmatmul.msk.bf16.vlgmr.msrb.gmra.mxu0 %vm1262_vm3, %v3397_v44  ;;  %v8791_v5 = vld [vmem:[#allocation66_spill] sm:$0xff]  ;;  %v7178_v62 = vsel %vm515_vm1, %v637_v38, %v639_v34  ;;  %v5006_v21 = vunpack.i.h.bf16 %v5004_v39  ;;  %v5009_v44 = vpop.permute.xlu1 %5008 }
 0x1de   : > { %5093 = vrot.lane.b32.xlu2 %v7155_v8, %s5641_s27  ;;  %v1498_v12 = vpack.c.bf16 %v8791_v5, %v8790_v22  ;;  %v5082_v20 = vpack.i.bf16 %v7178_v62, %v7175_v26  ;;  %v7190_v38 = vpack.i.bf16 %v2404_v48, %v2403_v42  ;;  %v5011_v22 = vunpack.i.h.bf16 %v5009_v44  ;;  %v8792_v5 = vld [vmem:[#allocation47_spill] sm:$0xff]  ;;  %v7205_v60 = vpop.f32.mrf.mxu2 }
 0x1df   : > { %5078 = vrot.lane.b32.xlu0 %v7158_v29, %s5642_s28  ;;  %v2009_v43 = vadd.f32 %v7043_v4, %v1973_v28  ;;  %v7182_v59 = vpop.permute.xlu0 %5018  ;;  %v7184_v28 = vpop.permute.xlu2 %5028  ;;  %v5010_v39 = vunpack.i.l.bf16 %v5009_v44  ;;  %v5016_v48 = vunpack.i.h.bf16 %v7147_v24 }
 0x1e0   : > { %v1810_v61 = vpop.f32.mrf.mxu1  ;;  %4389 = vmatmul.msk.bf16.gmra.mxu3 %vm1262_vm3, %v1498_v12 }
 0x1e1   : > { %v2041_v27 = vmax.f32 %v2009_v43, 0.0  ;;  %v1811_v41 = vadd.f32 %v1810_v61, %v7103_v18  ;;  %v1386_v18 = vsel %vm1262_vm3, %v8792_v5, %v5006_v21  ;;  %v1385_v43 = vsel %vm1262_vm3, %v8793_v7, %v5005_v33 }
 0x1e2   : > { %v1418_v42 = vsel %vm1295_vm2, %v1386_v18, %v5011_v22  ;;  %v1417_v21 = vsel %vm1295_vm2, %v1385_v43, %v5010_v39  ;;  %v2341_v33 = vld [vmem:[#allocation2 + $0x48] sm:$0xff]  ;;  %v2146_v43 = vld [vmem:[#allocation2] sm:$0xff] }
 0x1e3   : > { %2119 = vst.msk [vmem:[#allocation2 + $0x51] sm:$0xff] %vm1262_vm3, %v2041_v27  ;;  %v1900_v34 = vadd.f32 %v7090_v3, %v1811_v41  ;;  %1849 = vmatmul.bf16.gmra.mxu1 %v1491_v37  ;;  %v5015_v37 = vunpack.i.l.bf16 %v7147_v24  ;;  %v2373_v41 = vld [vmem:[#allocation2 + $0x49] sm:$0xff]  ;;  %v1450_v5 = vsel %vm1328_vm4, %v1418_v42, %v5016_v48  ;;  %v1728_v7 = vpop.f32.mrf.mxu0 }
 0x1e4   : > { %v2147_v48 = vld [vmem:[#allocation2 + $0x8] sm:$0xff] }
 0x1e5   : > { %v1974_v12 = vmul.f32 %v7037_v51, %v1900_v34  ;;  %5103 = vrot.lane.b32.xlu1 %v7190_v38, %s5640_s26  ;;  %v1449_v39 = vsel %vm1328_vm4, %v1417_v21, %v5015_v37 }
 0x1e6   : > { %5098 = vrot.lane.b32.xlu2 %v5097_v31, %s5641_s27  ;;  %v1909_v1 = vpop.f32.mrf.mxu2 }
 0x1e7   : > { %5083 = vrot.lane.b32.xlu0 %v5082_v20, %s5640_s26  ;;  %v2010_v3 = vadd.f32 %v7043_v4, %v1974_v12 }
 0x1e8   : > { %v1812_v61 = vpop.f32.mrf.mxu1 }
 0x1e9   : > { %v2042_v44 = vmax.f32 %v2010_v3, 0.0  ;;  %v1813_v27 = vadd.f32 %v1812_v61, %v7139_v23  ;;  %v4522_v23 = vld [vmem:[%s8558_s4 + $0x78] sm:$0xff]  ;;  %v5034_v3 = vpop.permute.xlu0 %5033  ;;  %v5039_v61 = vpop.permute.xlu2 %5038 }
 0x1ea   : > { %v2405_v31 = vld [vmem:[#allocation2 + $0x4a] sm:$0xff]  ;;  %v2406_v20 = vld [vmem:[#allocation2 + $0x52] sm:$0xff]  ;;  %v5036_v42 = vunpack.i.h.bf16 %v5034_v3  ;;  %v5040_v37 = vunpack.i.l.bf16 %v5039_v61  ;;  %3724 = vmatpush.bf16.msrb.mxu2 %v4522_v23 }
 0x1eb   : > { %v2374_v34 = vld [vmem:[#allocation2 + $0x51] sm:$0xff]  ;;  %2120 = vst.msk [vmem:[#allocation2 + $0x61] sm:$0xff] %vm1262_vm3, %v2042_v44  ;;  %v1902_v22 = vadd.f32 %v7121_v14, %v1813_v27  ;;  %v3400_v24 = vpack.c.bf16 %v2406_v20, %v2405_v31  ;;  %v5035_v44 = vunpack.i.l.bf16 %v5034_v3  ;;  %v5041_v14 = vunpack.i.h.bf16 %v5039_v61 }
 0x1ec   : > { %v7212_v18 = vpack.i.bf16 %v2374_v34, %v2373_v41  ;;  %v2342_v12 = vld [vmem:[#allocation2 + $0x50] sm:$0xff]  ;;  %v3204_v21 = vsel %vm1262_vm3, %v2147_v48, %v5036_v42  ;;  %v1494_v34 = vpack.c.bf16 %v1450_v5, %v1449_v39  ;;  %v5021_v48 = vunpack.i.h.bf16 %v7182_v59  ;;  %v5024_v42 = vpop.permute.xlu1 %5023 }
 0x1ed   : > { %v7218_v10 = vpack.i.bf16 %v2342_v12, %v2341_v33  ;;  %v1975_v27 = vmul.f32 %v7037_v51, %v1902_v22  ;;  %5108 = vrot.lane.b32.xlu1 %v7158_v29, %s5641_s27  ;;  %4465 = vmatmul.msk.bf16.gmra.mxu0 %vm1262_vm3, %v3400_v24  ;;  %v3203_v41 = vsel %vm1262_vm3, %v2146_v43, %v5035_v44  ;;  %v5020_v43 = vunpack.i.l.bf16 %v7182_v59  ;;  %v8794_v59 = vld [vmem:[#allocation53_spill] sm:$0xff] }
 0x1ee   : > { %5123 = vrot.lane.b32.xlu2 %v7212_v18, %s5641_s27  ;;  %v7232_v22 = vsel %vm1295_vm2, %v3203_v41, %v5040_v37  ;;  %v7235_v29 = vsel %vm1295_vm2, %v3204_v21, %v5041_v14  ;;  %v1501_v12 = vpack.c.bf16 %v7178_v62, %v7175_v26  ;;  %v5132_v39 = vpack.i.bf16 %v2406_v20, %v2405_v31  ;;  %v8795_v14 = vld [vmem:[#allocation52_spill] sm:$0xff] }
 0x1ef   : > { %5113 = vrot.lane.b32.xlu0 %v7218_v10, %s5642_s28  ;;  %v2011_v33 = vadd.f32 %v7043_v4, %v1975_v27  ;;  %v5026_v26 = vunpack.i.h.bf16 %v5024_v42  ;;  %v5025_v62 = vunpack.i.l.bf16 %v5024_v42  ;;  %v1388_v44 = vsel %vm1262_vm3, %v8794_v59, %v5021_v48 }
 0x1f0   : > { %v1815_v24 = vpop.f32.mrf.mxu1  ;;  %4390 = vmatmul.msk.bf16.gmra.mxu3 %vm1262_vm3, %v1501_v12  ;;  %v5031_v27 = vunpack.i.h.bf16 %v7184_v28  ;;  %v5030_v37 = vunpack.i.l.bf16 %v7184_v28  ;;  %v1911_v28 = vpop.f32.mrf.mxu2 }
 0x1f1   : > { %v2043_v3 = vmax.f32 %v2011_v33, 0.0  ;;  %v1816_v61 = vadd.f32 %v1815_v24, %v1726_v0  ;;  %v1731_v0 = vpop.f32.mrf.mxu0  ;;  %v1420_v33 = vsel %vm1295_vm2, %v1388_v44, %v5026_v26 }
 0x1f2   : > { %v1452_v26 = vsel %vm1328_vm4, %v1420_v33, %v5031_v27 }
 0x1f3   : > { %2121 = vst.msk [vmem:[#allocation2 + $0x69] sm:$0xff] %vm1262_vm3, %v2043_v3  ;;  %v1905_v5 = vadd.f32 %v7163_v57, %v1816_v61  ;;  %1854 = vmatmul.bf16.gmra.mxu1 %v1494_v34  ;;  %v1387_v57 = vsel %vm1262_vm3, %v8795_v14, %v5020_v43  ;;  %v2343_v43 = vld [vmem:[#allocation2 + $0x60] sm:$0xff] }
 0x1f5   : > { %v1976_v23 = vmul.f32 %v7037_v51, %v1905_v5  ;;  %5133 = vrot.lane.b32.xlu1 %v5132_v39, %s5640_s26 }
 0x1f6   : > { %5128 = vrot.lane.b32.xlu2 %v7190_v38, %s5642_s28  ;;  %v1419_v38 = vsel %vm1295_vm2, %v1387_v57, %v5025_v62  ;;  %v5044_v57 = vpop.permute.xlu0 %5043 }
 0x1f7   : > { %5118 = vrot.lane.b32.xlu0 %v7155_v8, %s5640_s26  ;;  %v2012_v31 = vadd.f32 %v7043_v4, %v1976_v23  ;;  %v2375_v8 = vld [vmem:[#allocation2 + $0x61] sm:$0xff]  ;;  %v1451_v23 = vsel %vm1328_vm4, %v1419_v38, %v5030_v37  ;;  %v5049_v38 = vpop.permute.xlu1 %5048 }
 0x1f8   : > { %v1817_v20 = vpop.f32.mrf.mxu1  ;;  %v1497_v44 = vpack.c.bf16 %v1452_v26, %v1451_v23 }
 0x1f9   : > { %v2044_v21 = vmax.f32 %v2012_v31, 0.0  ;;  %v1818_v41 = vadd.f32 %v1817_v20, %v1728_v7  ;;  %v4521_v7 = vld [vmem:[%s8558_s4 + $0x70] sm:$0xff]  ;;  %v1733_v31 = vpop.f32.mrf.mxu0 }
 0x1fa   : > { %v2407_v34 = vld [vmem:[#allocation2 + $0x62] sm:$0xff]  ;;  %v2408_v24 = vld [vmem:[#allocation2 + $0x6a] sm:$0xff]  ;;  %3725 = vmatpush.bf16.msrb.mxu2 %v4521_v7  ;;  %v8797_v7 = vld [vmem:[#allocation59_spill] sm:$0xff] }
 0x1fb   : > { %v2376_v12 = vld [vmem:[#allocation2 + $0x69] sm:$0xff]  ;;  %2122 = vst.msk [vmem:[#allocation2 + $0x79] sm:$0xff] %vm1262_vm3, %v2044_v21  ;;  %v1907_v3 = vadd.f32 %v7205_v60, %v1818_v41  ;;  %v3403_v61 = vpack.c.bf16 %v2408_v24, %v2407_v34  ;;  %v5046_v21 = vunpack.i.h.bf16 %v5044_v57  ;;  %v5045_v41 = vunpack.i.l.bf16 %v5044_v57 }
 0x1fc   : > { %v7261_v48 = vpack.i.bf16 %v2376_v12, %v2375_v8  ;;  %v2344_v42 = vld [vmem:[#allocation2 + $0x68] sm:$0xff]  ;;  %v5162_v33 = vpack.i.bf16 %v2408_v24, %v2407_v34  ;;  %v5051_v12 = vunpack.i.h.bf16 %v5049_v38 }
 0x1fd   : > { %v5142_v5 = vpack.i.bf16 %v2344_v42, %v2343_v43  ;;  %v1977_v62 = vmul.f32 %v7037_v51, %v1907_v3  ;;  %5138 = vrot.lane.b32.xlu1 %v7218_v10, %s5641_s27  ;;  %4466 = vmatmul.msk.bf16.gmra.mxu0 %vm1262_vm3, %v3403_v61  ;;  %v5050_v3 = vunpack.i.l.bf16 %v5049_v38  ;;  %v5054_v61 = vpop.permute.xlu2 %5053  ;;  %v1914_v43 = vpop.f32.mrf.mxu2 }
 0x1fe   : > { %5153 = vrot.lane.b32.xlu2 %v7261_v48, %s5641_s27  ;;  %v5056_v23 = vunpack.i.h.bf16 %v5054_v61  ;;  %v5055_v26 = vunpack.i.l.bf16 %v5054_v61 }
 0x1ff   : > { %5143 = vrot.lane.b32.xlu0 %v5142_v5, %s5642_s28  ;;  %v2013_v60 = vadd.f32 %v7043_v4, %v1977_v62 }
 0x200   : > { %v1820_v20 = vpop.f32.mrf.mxu1 }
 0x201   : > { %v2045_v27 = vmax.f32 %v2013_v60, 0.0  ;;  %v1821_v37 = vadd.f32 %v1820_v20, %v1731_v0  ;;  %v8796_v0 = vld [vmem:[#allocation60_spill] sm:$0xff] }
 0x202   : > { %v1390_v42 = vsel %vm1262_vm3, %v8796_v0, %v5046_v21  ;;  %v2377_v57 = vld [vmem:[#allocation2 + $0x79] sm:$0xff] }
 0x203   : > { %2123 = vst.msk [vmem:[#allocation2 + $0x81] sm:$0xff] %vm1262_vm3, %v2045_v27  ;;  %v1910_v10 = vadd.f32 %v1909_v1, %v1821_v37  ;;  %1859 = vmatmul.bf16.gmra.mxu1 %v1497_v44  ;;  %v1389_v1 = vsel %vm1262_vm3, %v8797_v7, %v5045_v41  ;;  %v2345_v20 = vld [vmem:[#allocation2 + $0x78] sm:$0xff] }
 0x204   : > { %v1421_v44 = vsel %vm1295_vm2, %v1389_v1, %v5050_v3 }
 0x205   : > { %v1978_v8 = vmul.f32 %v7037_v51, %v1910_v10  ;;  %5163 = vrot.lane.b32.xlu1 %v5162_v33, %s5640_s26  ;;  %v1453_v61 = vsel %vm1328_vm4, %v1421_v44, %v5055_v26 }
 0x206   : > { %5158 = vrot.lane.b32.xlu2 %v5132_v39, %s5642_s28  ;;  %v1422_v39 = vsel %vm1295_vm2, %v1390_v42, %v5051_v12  ;;  %v4520_v12 = vld [vmem:[%s8558_s4 + $0x68] sm:$0xff] }
 0x207   : > { %5148 = vrot.lane.b32.xlu0 %v7212_v18, %s5640_s26  ;;  %v2014_v34 = vadd.f32 %v7043_v4, %v1978_v8  ;;  %v1736_v18 = vpop.f32.mrf.mxu0  ;;  %v1454_v42 = vsel %vm1328_vm4, %v1422_v39, %v5056_v23  ;;  %3726 = vmatpush.bf16.msrb.mxu2 %v4520_v12 }
 0x208   : > { %v1822_v24 = vpop.f32.mrf.mxu1 }
 0x209   : > { %v2046_v62 = vmax.f32 %v2014_v34, 0.0  ;;  %v1823_v60 = vadd.f32 %v1822_v24, %v1733_v31  ;;  %v4514_v31 = vld [vmem:[%s8558_s4 + $0x38] sm:$0xff]  ;;  %v1500_v34 = vpack.c.bf16 %v1454_v42, %v1453_v61  ;;  %v1916_v24 = vpop.f32.mrf.mxu2 }
 0x20a   : > { %v2409_v27 = vld [vmem:[#allocation2 + $0x7a] sm:$0xff]  ;;  %v2410_v37 = vld [vmem:[#allocation2 + $0x82] sm:$0xff]  ;;  %3635 = vmatpush.bf16.msrb.mxu3 %v4514_v31 }
 0x20b   : > { %v2378_v21 = vld [vmem:[#allocation2 + $0x81] sm:$0xff]  ;;  %2124 = vst.msk [vmem:[#allocation2 + $0x91] sm:$0xff] %vm1262_vm3, %v2046_v62  ;;  %v1912_v41 = vadd.f32 %v1911_v28, %v1823_v60  ;;  %v3406_v38 = vpack.c.bf16 %v2410_v37, %v2409_v27  ;;  %v5192_v44 = vpack.i.bf16 %v2410_v37, %v2409_v27  ;;  %v649_v27 = vrot.slane %v7128_v30, 2 }
 0x20c   : > { %v7290_v10 = vpack.i.bf16 %v2378_v21, %v2377_v57  ;;  %v2346_v8 = vld [vmem:[#allocation2 + $0x80] sm:$0xff] }
 0x20d   : > { %v5172_v3 = vpack.i.bf16 %v2346_v8, %v2345_v20  ;;  %v1979_v1 = vmul.f32 %v7037_v51, %v1912_v41  ;;  %5168 = vrot.lane.b32.xlu1 %v5142_v5, %s5641_s27  ;;  %4467 = vmatmul.msk.bf16.gmra.mxu0 %vm1262_vm3, %v3406_v38  ;;  %v4513_v5 = vld [vmem:[%s8558_s4 + $0x30] sm:$0xff]  ;;  %v4512_v20 = vld [vmem:[%s8558_s4 + $0x28] sm:$0xff]  ;;  %v4511_v31 = vld [vmem:[%s8558_s4 + $0x20] sm:$0xff] }
 0x20e   : > { %5183 = vrot.lane.b32.xlu2 %v7290_v10, %s5641_s27  ;;  %3636 = vmatpush.bf16.msrb.mxu3 %v4513_v5  ;;  %v4510_v5 = vld [vmem:[%s8558_s4 + $0x18] sm:$0xff] }
 0x20f   : > { %5173 = vrot.lane.b32.xlu0 %v5172_v3, %s5642_s28  ;;  %v2015_v28 = vadd.f32 %v7043_v4, %v1979_v1  ;;  %v1738_v39 = vpop.f32.mrf.mxu0 }
 0x210   : > { %v1825_v26 = vpop.f32.mrf.mxu1 }
 0x211   : > { %v2047_v62 = vmax.f32 %v2015_v28, 0.0  ;;  %v1826_v23 = vadd.f32 %v1825_v26, %v1736_v18  ;;  %v1919_v8 = vpop.f32.mrf.mxu2 }
 0x212   : > { %3637 = vmatpush.bf16.msrb.mxu3 %v4512_v20  ;;  %v2379_v38 = vld [vmem:[#allocation2 + $0x91] sm:$0xff] }
 0x213   : > { %2125 = vst.msk [vmem:[#allocation2 + $0x99] sm:$0xff] %vm1262_vm3, %v2047_v62  ;;  %v1915_v60 = vadd.f32 %v1914_v43, %v1826_v23  ;;  %1864 = vmatmul.bf16.gmra.mxu1 %v1500_v34  ;;  %v650_v43 = vrot.slane %v7131_v63, 2  ;;  %v2347_v30 = vld [vmem:[#allocation2 + $0x90] sm:$0xff]  ;;  %v4519_v34 = vld [vmem:[%s8558_s4 + $0x60] sm:$0xff] }
 0x214   : > { %3727 = vmatpush.bf16.msrb.mxu2 %v4519_v34 }
 0x215   : > { %v1980_v57 = vmul.f32 %v7037_v51, %v1915_v60  ;;  %5193 = vrot.lane.b32.xlu1 %v5192_v44, %s5640_s26  ;;  %v651_v62 = vsel %vm515_vm1, %v649_v27, %v650_v43 }
 0x216   : > { %5188 = vrot.lane.b32.xlu2 %v5162_v33, %s5642_s28  ;;  %v652_v33 = vrot.slane %v7137_v52, 2  ;;  %3638 = vmatpush.bf16.msrb.mxu3 %v4511_v31 }
 0x217   : > { %5178 = vrot.lane.b32.xlu0 %v7261_v48, %s5640_s26  ;;  %v2016_v18 = vadd.f32 %v7043_v4, %v1980_v57  ;;  %v1741_v60 = vpop.f32.mrf.mxu0 }
 0x218   : > { %v1827_v37 = vpop.f32.mrf.mxu1  ;;  %v653_v52 = vsel %vm515_vm1, %v650_v43, %v652_v33 }
 0x219   : > { %v2048_v21 = vmax.f32 %v2016_v18, 0.0  ;;  %v1828_v41 = vadd.f32 %v1827_v37, %v1738_v39  ;;  %v4509_v18 = vld [vmem:[%s8558_s4 + $0x10] sm:$0xff]  ;;  %v1921_v37 = vpop.f32.mrf.mxu2 }
 0x21a   : > { %v2411_v12 = vld [vmem:[#allocation2 + $0x92] sm:$0xff]  ;;  %v2412_v48 = vld [vmem:[#allocation2 + $0x9a] sm:$0xff]  ;;  %3639 = vmatpush.bf16.msrb.mxu3 %v4510_v5 }
 0x21b   : > { %v2380_v61 = vld [vmem:[#allocation2 + $0x99] sm:$0xff]  ;;  %2126 = vst.msk [vmem:[#allocation2 + $0xa9] sm:$0xff] %vm1262_vm3, %v2048_v21  ;;  %v1917_v42 = vadd.f32 %v1916_v24, %v1828_v41  ;;  %v3409_v63 = vpack.c.bf16 %v2412_v48, %v2411_v12  ;;  %v1504_v24 = vpack.c.bf16 %v653_v52, %v651_v62  ;;  %v5222_v27 = vpack.i.bf16 %v2412_v48, %v2411_v12  ;;  %v4508_v41 = vld [vmem:[%s8558_s4 + $0x8] sm:$0xff] }
 0x21c   : > { %v7327_v1 = vpack.i.bf16 %v2380_v61, %v2379_v38  ;;  %v2348_v28 = vld [vmem:[#allocation2 + $0x98] sm:$0xff] }
 0x21d   : > { %v5202_v26 = vpack.i.bf16 %v2348_v28, %v2347_v30  ;;  %v1981_v23 = vmul.f32 %v7037_v51, %v1917_v42  ;;  %5198 = vrot.lane.b32.xlu1 %v5172_v3, %s5641_s27  ;;  %4468 = vmatmul.msk.bf16.gmra.mxu0 %vm1262_vm3, %v3409_v63  ;;  %v4518_v38 = vld [vmem:[%s8558_s4 + $0x58] sm:$0xff] }
 0x21e   : > { %5213 = vrot.lane.b32.xlu2 %v7327_v1, %s5641_s27  ;;  %4391 = vmatmul.msk.bf16.gmra.mxu3 %vm1262_vm3, %v1504_v24  ;;  %v4517_v24 = vld [vmem:[%s8558_s4 + $0x50] sm:$0xff] }
 0x21f   : > { %5203 = vrot.lane.b32.xlu0 %v5202_v26, %s5642_s28  ;;  %v2017_v39 = vadd.f32 %v7043_v4, %v1981_v23  ;;  %3640 = vmatpush.bf16.msrb.mxu3 %v4509_v18  ;;  %v1743_v31 = vpop.f32.mrf.mxu0  ;;  %v1929_v23 = vpop.f32.mrf.mxu3 }
 0x220   : > { %v1830_v57 = vpop.f32.mrf.mxu1  ;;  %3728 = vmatpush.bf16.msrb.mxu2 %v4518_v38 }
 0x221   : > { %v2049_v3 = vmax.f32 %v2017_v39, 0.0  ;;  %v1831_v20 = vadd.f32 %v1830_v57, %v1741_v60  ;;  %v1924_v39 = vpop.f32.mrf.mxu2 }
 0x222   : > { %v2381_v61 = vld [vmem:[#allocation2 + $0xa9] sm:$0xff] }
 0x223   : > { %2127 = vst.msk [vmem:[#allocation2 + $0xb1] sm:$0xff] %vm1262_vm3, %v2049_v3  ;;  %v1920_v43 = vadd.f32 %v1919_v8, %v1831_v20  ;;  %3641 = vmatpush.bf16.msrb.mxu3 %v4508_v41  ;;  %v2349_v62 = vld [vmem:[#allocation2 + $0xa8] sm:$0xff]  ;;  %v4515_v41 = vld [vmem:[%s8558_s4 + $0x40] sm:$0xff] }
 0x224   : > { %3729 = vmatpush.bf16.msrb.mxu2 %v4517_v24  ;;  %v4516_v3 = vld [vmem:[%s8558_s4 + $0x48] sm:$0xff] }
 0x225   : > { %v1982_v21 = vmul.f32 %v7037_v51, %v1920_v43  ;;  %5223 = vrot.lane.b32.xlu1 %v5222_v27, %s5640_s26 }
 0x226   : > { %5218 = vrot.lane.b32.xlu2 %v5192_v44, %s5642_s28  ;;  %v4507_v44 = vld [vmem:[%s8558_s4] sm:$0xff] }
 0x227   : > { %5208 = vrot.lane.b32.xlu0 %v7290_v10, %s5640_s26  ;;  %v2018_v8 = vadd.f32 %v7043_v4, %v1982_v21  ;;  %3642 = vmatpush.bf16.msrb.mxu3 %v4507_v44  ;;  %v7380_v20 = vpop.permute.xlu2 %5073 }
 0x228   : > { %v1832_v33 = vpop.f32.mrf.mxu1  ;;  %3730 = vmatpush.bf16.msrb.mxu2 %v4516_v3 }
 0x229   : > { %v2050_v12 = vmax.f32 %v2018_v8, 0.0  ;;  %v1833_v48 = vadd.f32 %v1832_v33, %v1743_v31  ;;  %v1931_v8 = vpop.f32.mrf.mxu3  ;;  %v1926_v31 = vpop.f32.mrf.mxu2 }
 0x22a   : > { %v2413_v42 = vld [vmem:[#allocation2 + $0xaa] sm:$0xff]  ;;  %v2414_v63 = vld [vmem:[#allocation2 + $0xb2] sm:$0xff] }
 0x22b   : > { %v2382_v10 = vld [vmem:[#allocation2 + $0xb1] sm:$0xff]  ;;  %2128 = vst.msk [vmem:[#allocation2 + $0xc1] sm:$0xff] %vm1262_vm3, %v2050_v12  ;;  %v1922_v30 = vadd.f32 %v1921_v37, %v1833_v48  ;;  %v3412_v28 = vpack.c.bf16 %v2414_v63, %v2413_v42  ;;  %v5252_v21 = vpack.i.bf16 %v2414_v63, %v2413_v42 }
 0x22c   : > { %v7365_v34 = vpack.i.bf16 %v2382_v10, %v2381_v61  ;;  %v2350_v52 = vld [vmem:[#allocation2 + $0xb0] sm:$0xff]  ;;  %3731 = vmatpush.bf16.msrb.mxu2 %v4515_v41 }
 0x22d   : > { %v5232_v5 = vpack.i.bf16 %v2350_v52, %v2349_v62  ;;  %v1983_v60 = vmul.f32 %v7037_v51, %v1922_v30  ;;  %5228 = vrot.lane.b32.xlu1 %v5202_v26, %s5641_s27  ;;  %4469 = vmatmul.msk.bf16.gmra.mxu0 %vm1262_vm3, %v3412_v28 }
 0x22e   : > { %5243 = vrot.lane.b32.xlu2 %v7365_v34, %s5641_s27 }
 0x22f   : > { %5233 = vrot.lane.b32.xlu0 %v5232_v5, %s5642_s28  ;;  %v2019_v57 = vadd.f32 %v7043_v4, %v1983_v60 }
 0x230   : > { %v1835_v18 = vpop.f32.mrf.mxu1 }
 0x231   : > { %v2051_v43 = vmax.f32 %v2019_v57, 0.0  ;;  %v1836_v26 = vadd.f32 %v1835_v18, %v6679_v47 }
 0x232   : > { %v2383_v44 = vld [vmem:[#allocation2 + $0xc1] sm:$0xff] }
 0x233   : > { %2129 = vst.msk [vmem:[#allocation2 + $0xc9] sm:$0xff] %vm1262_vm3, %v2051_v43  ;;  %v1925_v37 = vadd.f32 %v1924_v39, %v1836_v26  ;;  %v1934_v39 = vpop.f32.mrf.mxu3 }
 0x235   : > { %v1984_v38 = vmul.f32 %v7037_v51, %v1925_v37  ;;  %5253 = vrot.lane.b32.xlu1 %v5252_v21, %s5640_s26 }
 0x236   : > { %5248 = vrot.lane.b32.xlu2 %v5222_v27, %s5642_s28 }
 0x237   : > { %5238 = vrot.lane.b32.xlu0 %v7327_v1, %s5640_s26  ;;  %v2020_v47 = vadd.f32 %v7043_v4, %v1984_v38  ;;  %v2351_v1 = vld [vmem:[#allocation2 + $0xc0] sm:$0xff] }
 0x238   : > { %v7393_v33 = vpop.permute.xlu2 %5093  ;;  %v1837_v12 = vpop.f32.mrf.mxu1 }
 0x239   : > { %v2052_v48 = vmax.f32 %v2020_v47, 0.0  ;;  %v1838_v61 = vadd.f32 %v1837_v12, %v6691_v11 }
 0x23a   : > { %v2415_v42 = vld [vmem:[#allocation2 + $0xc2] sm:$0xff]  ;;  %v2416_v63 = vld [vmem:[#allocation2 + $0xca] sm:$0xff] }
 0x23b   : > { %v2384_v10 = vld [vmem:[#allocation2 + $0xc9] sm:$0xff]  ;;  %2130 = vst.msk [vmem:[#allocation2 + $0xd9] sm:$0xff] %vm1262_vm3, %v2052_v48  ;;  %v1927_v27 = vadd.f32 %v1926_v31, %v1838_v61  ;;  %v3415_v30 = vpack.c.bf16 %v2416_v63, %v2415_v42  ;;  %v7423_v61 = vpop.f32.mrf.mxu3 }
 0x23c   : > { %v7397_v28 = vpack.i.bf16 %v2384_v10, %v2383_v44  ;;  %v2352_v62 = vld [vmem:[#allocation2 + $0xc8] sm:$0xff] }
 0x23d   : > { %v5262_v52 = vpack.i.bf16 %v2352_v62, %v2351_v1  ;;  %v1985_v24 = vmul.f32 %v7037_v51, %v1927_v27  ;;  %5258 = vrot.lane.b32.xlu1 %v5232_v5, %s5641_s27  ;;  %4470 = vmatmul.msk.bf16.gmra.mxu0 %vm1262_vm3, %v3415_v30  ;;  %v7410_v5 = vpack.i.bf16 %v2416_v63, %v2415_v42 }
 0x23e   : > { %5273 = vrot.lane.b32.xlu2 %v7397_v28, %s5641_s27 }
 0x23f   : > { %5263 = vrot.lane.b32.xlu0 %v5262_v52, %s5642_s28  ;;  %v2021_v11 = vadd.f32 %v7043_v4, %v1985_v24  ;;  %v5059_v60 = vpop.permute.xlu1 %5058 }
 0x240   : > { %v7406_v57 = vpop.permute.xlu2 %5098  ;;  %v1840_v18 = vpop.f32.mrf.mxu1 }
 0x241   : > { %v2053_v3 = vmax.f32 %v2021_v11, 0.0  ;;  %v1841_v43 = vadd.f32 %v1840_v18, %v6723_v54  ;;  %v7418_v38 = vpop.permute.xlu0 %5068 }
 0x242   : > { %v2385_v48 = vld [vmem:[#allocation2 + $0xd9] sm:$0xff] }
 0x243   : > { %2131 = vst.msk [vmem:[#allocation2 + $0xe1] sm:$0xff] %vm1262_vm3, %v2053_v3  ;;  %v1930_v26 = vadd.f32 %v1929_v23, %v1841_v43  ;;  %v2353_v24 = vld [vmem:[#allocation2 + $0xd8] sm:$0xff] }
 0x245   : > { %5283 = vrot.lane.b32.xlu1 %v7410_v5, %s5640_s26  ;;  %v1986_v37 = vmul.f32 %v7037_v51, %v1930_v26 }
 0x246   : > { %5278 = vrot.lane.b32.xlu2 %v5252_v21, %s5642_s28 }
 0x247   : > { %5268 = vrot.lane.b32.xlu0 %v7365_v34, %s5640_s26  ;;  %v5064_v41 = vpop.permute.xlu1 %5063  ;;  %v2022_v54 = vadd.f32 %v7043_v4, %v1986_v37 }
 0x248   : > { %v5066_v47 = vunpack.i.h.bf16 %v5064_v41  ;;  %v5065_v31 = vunpack.i.l.bf16 %v5064_v41  ;;  %v7421_v12 = vpop.permute.xlu2 %5123  ;;  %v1842_v23 = vpop.f32.mrf.mxu1  ;;  %v5096_v41 = vunpack.i.h.bf16 %v7393_v33 }
 0x249   : > { %v2054_v44 = vmax.f32 %v2022_v54, 0.0  ;;  %v1843_v42 = vadd.f32 %v1842_v23, %v6741_v15  ;;  %v5061_v15 = vunpack.i.h.bf16 %v5059_v60 }
 0x24a   : > { %v3267_v21 = vsel %vm1328_vm4, %v7232_v22, %v5065_v31  ;;  %v3268_v34 = vsel %vm1328_vm4, %v7235_v29, %v5066_v47  ;;  %v2417_v63 = vld [vmem:[#allocation2 + $0xda] sm:$0xff]  ;;  %v2418_v10 = vld [vmem:[#allocation2 + $0xe2] sm:$0xff]  ;;  %v5060_v22 = vunpack.i.l.bf16 %v5059_v60  ;;  %v5095_v60 = vunpack.i.l.bf16 %v7393_v33 }
 0x24b   : > { %v2386_v27 = vld [vmem:[#allocation2 + $0xe1] sm:$0xff]  ;;  %v3395_v30 = vpack.c.bf16 %v3268_v34, %v3267_v21  ;;  %v3418_v1 = vpack.c.bf16 %v2418_v10, %v2417_v63  ;;  %2132 = vst.msk [vmem:[#allocation2 + $0xf1] sm:$0xff] %vm1262_vm3, %v2054_v44  ;;  %v1932_v3 = vadd.f32 %v1931_v8, %v1843_v42  ;;  %v7456_v42 = vpop.f32.mrf.mxu3 }
 0x24c   : > { %v7430_v62 = vpack.i.bf16 %v2386_v27, %v2385_v48  ;;  %v2354_v11 = vld [vmem:[#allocation2 + $0xe0] sm:$0xff]  ;;  %v3299_v31 = vsel %vm1262_vm3, %v7088_v16, %v5060_v22  ;;  %v7461_v16 = vpack.i.bf16 %v2418_v10, %v2417_v63  ;;  %v5076_v10 = vunpack.i.h.bf16 %v7380_v20 }
 0x24d   : > { %v7433_v18 = vpack.i.bf16 %v2354_v11, %v2353_v24  ;;  %3643 = vmatmul.bf16.vlgmr.msrb.gmra.mxu3 %v3395_v30  ;;  %4471 = vmatmul.msk.bf16.gmra.mxu0 %vm1262_vm3, %v3418_v1  ;;  %v1987_v29 = vmul.f32 %v7037_v51, %v1932_v3  ;;  %v5075_v1 = vunpack.i.l.bf16 %v7380_v20  ;;  %v5100_v3 = vunpack.i.l.bf16 %v7406_v57 }
 0x24e   : > { %5303 = vrot.lane.b32.xlu2 %v7430_v62, %s5641_s27  ;;  %5288 = vrot.lane.b32.xlu1 %v5262_v52, %s5641_s27  ;;  %v3300_v52 = vsel %vm1262_vm3, %v7092_v53, %v5061_v15  ;;  %v5070_v53 = vunpack.i.l.bf16 %v7418_v38 }
 0x24f   : > { %5293 = vrot.lane.b32.xlu0 %v7433_v18, %s5642_s28  ;;  %v7442_v43 = vpop.permute.xlu1 %5088  ;;  %v2023_v8 = vadd.f32 %v7043_v4, %v1987_v29 }
 0x250   : > { %v7445_v37 = vpop.permute.xlu2 %5128  ;;  %v1845_v47 = vpop.f32.mrf.mxu1  ;;  %v5090_v24 = vunpack.i.l.bf16 %v7442_v43  ;;  %v5091_v15 = vunpack.i.h.bf16 %v7442_v43  ;;  %v3205_v20 = vsel %vm1262_vm3, %v7113_v46, %v5070_v53 }
 0x251   : > { %v5079_v26 = vpop.permute.xlu0 %5078  ;;  %v2055_v23 = vmax.f32 %v2023_v8, 0.0  ;;  %v1846_v48 = vadd.f32 %v1845_v47, %v6765_v45  ;;  %v7467_v45 = vld [vmem:[%s8556_s2] ss:$0 sm:$0xff] }
 0x252   : > { %v5081_v51 = vunpack.i.h.bf16 %v5079_v26  ;;  %v5080_v54 = vunpack.i.l.bf16 %v5079_v26  ;;  %v5101_v26 = vunpack.i.h.bf16 %v7406_v57 }
 0x253   : > { %2133 = vst.msk [vmem:[#allocation2 + $0xf9] sm:$0xff] %vm1262_vm3, %v2055_v23  ;;  %v1935_v33 = vadd.f32 %v1934_v39, %v1846_v48  ;;  %v5071_v39 = vunpack.i.h.bf16 %v7418_v38  ;;  %v1941_v53 = vpop.f32.mrf.mxu3 }
 0x254   : > { %v3332_v4 = vsel %vm1295_vm2, %v3300_v52, %v5081_v51  ;;  %v3331_v44 = vsel %vm1295_vm2, %v3299_v31, %v5080_v54  ;;  %v2387_v51 = vld [vmem:[#allocation2 + $0xf1] sm:$0xff] }
 0x255   : > { %v3363_v21 = vsel %vm1328_vm4, %v3331_v44, %v5095_v60  ;;  %v3364_v34 = vsel %vm1328_vm4, %v3332_v4, %v5096_v41  ;;  %v1988_v30 = vmul.f32 %v7467_v45, %v1935_v33  ;;  %v3206_v54 = vsel %vm1262_vm3, %v7109_v32, %v5071_v39  ;;  %v2355_v4 = vld [vmem:[#allocation2 + $0xf0] sm:$0xff] }
 0x256   : > { %v3396_v27 = vpack.c.bf16 %v3364_v34, %v3363_v21  ;;  %5308 = vrot.lane.b32.xlu2 %v7410_v5, %s5642_s28  ;;  %5313 = vrot.lane.b32.xlu1 %v7461_v16, %s5640_s26  ;;  %v7483_v5 = vld [vmem:[%s8557_s3] ss:$0 sm:$0xff]  ;;  %v5126_v39 = vunpack.i.h.bf16 %v7421_v12 }
 0x257   : > { %5298 = vrot.lane.b32.xlu0 %v7397_v28, %s5640_s26  ;;  %v5104_v63 = vpop.permute.xlu1 %5103  ;;  %v2024_v28 = vadd.f32 %v7483_v5, %v1988_v30 }
 0x258   : > { %3732 = vmatmul.bf16.vlgmr.msrb.gmra.mxu2 %v3396_v27  ;;  %v7486_v38 = vpop.permute.xlu2 %5153  ;;  %v1847_v8 = vpop.f32.mrf.mxu1  ;;  %v5106_v31 = vunpack.i.h.bf16 %v5104_v63  ;;  %v5105_v33 = vunpack.i.l.bf16 %v5104_v63 }
 0x259   : > { %v5084_v11 = vpop.permute.xlu0 %5083  ;;  %v2056_v41 = vmax.f32 %v2024_v28, 0.0  ;;  %v1848_v60 = vadd.f32 %v1847_v8, %v6780_v13  ;;  %v3237_v28 = vsel %vm1295_vm2, %v3205_v20, %v5075_v1 }
 0x25a   : > { %v5086_v22 = vunpack.i.h.bf16 %v5084_v11  ;;  %v5085_v29 = vunpack.i.l.bf16 %v5084_v11  ;;  %v2419_v52 = vld [vmem:[#allocation2 + $0xf2] sm:$0xff]  ;;  %v2420_v23 = vld [vmem:[#allocation2 + $0xfa] sm:$0xff]  ;;  %v3238_v11 = vsel %vm1295_vm2, %v3206_v54, %v5076_v10 }
 0x25b   : > { %v2388_v48 = vld [vmem:[#allocation2 + $0xf9] sm:$0xff]  ;;  %2134 = vst.msk [vmem:[#allocation2 + $0x109] sm:$0xff] %vm1262_vm3, %v2056_v41  ;;  %v1937_v46 = vadd.f32 %v7423_v61, %v1848_v60  ;;  %v3421_v57 = vpack.c.bf16 %v2420_v23, %v2419_v52 }
 0x25c   : > { %v1392_v47 = vsel %vm1262_vm3, %v6952_v9, %v5086_v22  ;;  %v1391_v43 = vsel %vm1262_vm3, %v6943_v6, %v5085_v29  ;;  %v7502_v13 = vpack.i.bf16 %v2388_v48, %v2387_v51  ;;  %v2356_v44 = vld [vmem:[#allocation2 + $0xf8] sm:$0xff] }
 0x25d   : > { %v1423_v32 = vsel %vm1295_vm2, %v1391_v43, %v5090_v24  ;;  %v7505_v21 = vpack.i.bf16 %v2356_v44, %v2355_v4  ;;  %v1424_v34 = vsel %vm1295_vm2, %v1392_v47, %v5091_v15  ;;  %v1989_v30 = vmul.f32 %v7467_v45, %v1937_v46  ;;  %4472 = vmatmul.msk.bf16.gmra.mxu0 %vm1262_vm3, %v3421_v57  ;;  %v2276_v15 = vld [vmem:[#allocation2 + $0x31] sm:$0xff]  ;;  %v2277_v22 = vld [vmem:[#allocation2 + $0x39] sm:$0xff] }
 0x25e   : > { %v1455_v27 = vsel %vm1328_vm4, %v1423_v32, %v5100_v3  ;;  %5333 = vrot.lane.b32.xlu2 %v7502_v13, %s5641_s27  ;;  %v1456_v61 = vsel %vm1328_vm4, %v1424_v34, %v5101_v26  ;;  %5318 = vrot.lane.b32.xlu1 %v7433_v18, %s5641_s27  ;;  %v5125_v3 = vunpack.i.l.bf16 %v7421_v12  ;;  %v3301_v18 = vsel %vm1262_vm3, %v2276_v15, %v5105_v33  ;;  %v1944_v34 = vpop.f32.mrf.mxu3 }
 0x25f   : > { %5323 = vrot.lane.b32.xlu0 %v7505_v21, %s5642_s28  ;;  %v1503_v63 = vpack.c.bf16 %v1456_v61, %v1455_v27  ;;  %v5109_v24 = vpop.permute.xlu1 %5108  ;;  %v2025_v29 = vadd.f32 %v7483_v5, %v1989_v30  ;;  %v3302_v51 = vsel %vm1262_vm3, %v2277_v22, %v5106_v31  ;;  %v7536_v32 = vpack.i.bf16 %v2420_v23, %v2419_v52 }
 0x260   : > { %v5111_v8 = vunpack.i.h.bf16 %v5109_v24  ;;  %v5110_v26 = vunpack.i.l.bf16 %v5109_v24  ;;  %v7523_v60 = vpop.permute.xlu2 %5158  ;;  %v1850_v20 = vpop.f32.mrf.mxu1 }
 0x261   : > { %v5114_v41 = vpop.permute.xlu0 %5113  ;;  %1869 = vmatmul.bf16.gmra.mxu1 %v1503_v63  ;;  %v2057_v10 = vmax.f32 %v2025_v29, 0.0  ;;  %v1851_v12 = vadd.f32 %v1850_v20, %v6803_v56 }
 0x262   : > { %v5116_v47 = vunpack.i.h.bf16 %v5114_v41  ;;  %v5115_v1 = vunpack.i.l.bf16 %v5114_v41  ;;  %v3269_v54 = vsel %vm1328_vm4, %v3237_v28, %v5110_v26  ;;  %v3270_v43 = vsel %vm1328_vm4, %v3238_v11, %v5111_v8  ;;  %v2389_v24 = vld [vmem:[#allocation2 + $0x109] sm:$0xff] }
 0x263   : > { %v3398_v48 = vpack.c.bf16 %v3270_v43, %v3269_v54  ;;  %2135 = vst.msk [vmem:[#allocation2 + $0x111] sm:$0xff] %vm1262_vm3, %v2057_v10  ;;  %v1940_v31 = vadd.f32 %v7456_v42, %v1851_v12  ;;  %v2357_v26 = vld [vmem:[#allocation2 + $0x108] sm:$0xff]  ;;  %v5156_v54 = vunpack.i.h.bf16 %v7486_v38  ;;  %v5155_v43 = vunpack.i.l.bf16 %v7486_v38 }
 0x264   : > { %v3333_v46 = vsel %vm1295_vm2, %v3301_v18, %v5115_v1  ;;  %v3334_v57 = vsel %vm1295_vm2, %v3302_v51, %v5116_v47  ;;  %v2150_v18 = vld [vmem:[#allocation2 + $0x30] sm:$0xff]  ;;  %v2151_v51 = vld [vmem:[#allocation2 + $0x38] sm:$0xff] }
 0x265   : > { %v3365_v4 = vsel %vm1328_vm4, %v3333_v46, %v5125_v3  ;;  %v3366_v44 = vsel %vm1328_vm4, %v3334_v57, %v5126_v39  ;;  %3648 = vmatmul.bf16.gmra.mxu3 %v3398_v48  ;;  %v1990_v33 = vmul.f32 %v7467_v45, %v1940_v31  ;;  %v2278_v10 = vld [vmem:[#allocation2 + $0x49] sm:$0xff]  ;;  %v2279_v48 = vld [vmem:[#allocation2 + $0x51] sm:$0xff] }
 0x266   : > { %v3399_v56 = vpack.c.bf16 %v3366_v44, %v3365_v4  ;;  %5338 = vrot.lane.b32.xlu2 %v7461_v16, %s5642_s28  ;;  %5343 = vrot.lane.b32.xlu1 %v7536_v32, %s5640_s26 }
 0x267   : > { %5328 = vrot.lane.b32.xlu0 %v7430_v62, %s5640_s26  ;;  %v5134_v42 = vpop.permute.xlu1 %5133  ;;  %v2026_v27 = vadd.f32 %v7483_v5, %v1990_v33 }
 0x268   : > { %3737 = vmatmul.bf16.gmra.mxu2 %v3399_v56  ;;  %v7546_v52 = vpop.permute.xlu2 %5183  ;;  %v1852_v23 = vpop.f32.mrf.mxu1  ;;  %v5135_v28 = vunpack.i.l.bf16 %v5134_v42  ;;  %v5136_v62 = vunpack.i.h.bf16 %v5134_v42 }
 0x269   : > { %v5119_v30 = vpop.permute.xlu0 %5118  ;;  %v2058_v61 = vmax.f32 %v2026_v27, 0.0  ;;  %v1853_v16 = vadd.f32 %v1852_v23, %v6817_v2  ;;  %v5131_v2 = vunpack.i.h.bf16 %v7445_v37  ;;  %v1946_v23 = vpop.f32.mrf.mxu3 }
 0x26a   : > { %v5121_v39 = vunpack.i.h.bf16 %v5119_v30  ;;  %v5120_v63 = vunpack.i.l.bf16 %v5119_v30  ;;  %v2421_v11 = vld [vmem:[#allocation2 + $0x10a] sm:$0xff]  ;;  %v2422_v3 = vld [vmem:[#allocation2 + $0x112] sm:$0xff]  ;;  %v3303_v46 = vsel %vm1262_vm3, %v2278_v10, %v5135_v28  ;;  %v3304_v31 = vsel %vm1262_vm3, %v2279_v48, %v5136_v62 }
 0x26b   : > { %v2390_v15 = vld [vmem:[#allocation2 + $0x111] sm:$0xff]  ;;  %2136 = vst.msk [vmem:[#allocation2 + $0x121] sm:$0xff] %vm1262_vm3, %v2058_v61  ;;  %v1942_v22 = vadd.f32 %v1941_v53, %v1853_v16  ;;  %v3424_v29 = vpack.c.bf16 %v2422_v3, %v2421_v11  ;;  %v5130_v53 = vunpack.i.l.bf16 %v7445_v37 }
 0x26c   : > { %v7550_v8 = vpack.i.bf16 %v2390_v15, %v2389_v24  ;;  %v2358_v41 = vld [vmem:[#allocation2 + $0x110] sm:$0xff]  ;;  %v3208_v1 = vsel %vm1262_vm3, %v2151_v51, %v5121_v39  ;;  %v3207_v20 = vsel %vm1262_vm3, %v2150_v18, %v5120_v63 }
 0x26d   : > { %v7552_v47 = vpack.i.bf16 %v2358_v41, %v2357_v26  ;;  %v1991_v12 = vmul.f32 %v7467_v45, %v1942_v22  ;;  %4473 = vmatmul.msk.bf16.gmra.mxu0 %vm1262_vm3, %v3424_v29  ;;  %v3239_v30 = vsel %vm1295_vm2, %v3207_v20, %v5130_v53  ;;  %v7583_v26 = vpack.i.bf16 %v2422_v3, %v2421_v11 }
 0x26e   : > { %5363 = vrot.lane.b32.xlu2 %v7550_v8, %s5641_s27  ;;  %5348 = vrot.lane.b32.xlu1 %v7505_v21, %s5641_s27  ;;  %v3240_v21 = vsel %vm1295_vm2, %v3208_v1, %v5131_v2 }
 0x26f   : > { %5353 = vrot.lane.b32.xlu0 %v7552_v47, %s5642_s28  ;;  %v5139_v57 = vpop.permute.xlu1 %5138  ;;  %v2027_v4 = vadd.f32 %v7483_v5, %v1991_v12 }
 0x270   : > { %v5141_v44 = vunpack.i.h.bf16 %v5139_v57  ;;  %v5140_v37 = vunpack.i.l.bf16 %v5139_v57  ;;  %v7571_v33 = vpop.permute.xlu2 %5188  ;;  %v1855_v27 = vpop.f32.mrf.mxu1 }
 0x271   : > { %v5144_v56 = vpop.permute.xlu0 %5143  ;;  %v2059_v61 = vmax.f32 %v2027_v4, 0.0  ;;  %v1856_v39 = vadd.f32 %v1855_v27, %v6843_v50 }
 0x272   : > { %v5146_v38 = vunpack.i.h.bf16 %v5144_v56  ;;  %v5145_v42 = vunpack.i.l.bf16 %v5144_v56  ;;  %v3271_v63 = vsel %vm1328_vm4, %v3239_v30, %v5140_v37  ;;  %v3272_v16 = vsel %vm1328_vm4, %v3240_v21, %v5141_v44  ;;  %v2359_v4 = vld [vmem:[#allocation2 + $0x120] sm:$0xff]  ;;  %v2153_v37 = vld [vmem:[#allocation2 + $0x50] sm:$0xff] }
 0x273   : > { %v3401_v24 = vpack.c.bf16 %v3272_v16, %v3271_v63  ;;  %2137 = vst.msk [vmem:[#allocation2 + $0x129] sm:$0xff] %vm1262_vm3, %v2059_v61  ;;  %v1945_v62 = vadd.f32 %v1944_v34, %v1856_v39  ;;  %v2280_v30 = vld [vmem:[#allocation2 + $0x61] sm:$0xff]  ;;  %v5186_v61 = vunpack.i.h.bf16 %v7546_v52  ;;  %v5185_v39 = vunpack.i.l.bf16 %v7546_v52  ;;  %v2281_v63 = vld [vmem:[#allocation2 + $0x69] sm:$0xff] }
 0x274   : > { %v3335_v28 = vsel %vm1295_vm2, %v3303_v46, %v5145_v42  ;;  %v3336_v15 = vsel %vm1295_vm2, %v3304_v31, %v5146_v38  ;;  %v5161_v38 = vunpack.i.h.bf16 %v7523_v60 }
 0x275   : > { %v3367_v22 = vsel %vm1328_vm4, %v3335_v28, %v5155_v43  ;;  %v3368_v29 = vsel %vm1328_vm4, %v3336_v15, %v5156_v54  ;;  %3653 = vmatmul.bf16.gmra.mxu3 %v3401_v24  ;;  %v1992_v41 = vmul.f32 %v7467_v45, %v1945_v62 }
 0x276   : > { %v3402_v50 = vpack.c.bf16 %v3368_v29, %v3367_v22  ;;  %5368 = vrot.lane.b32.xlu2 %v7536_v32, %s5642_s28  ;;  %5373 = vrot.lane.b32.xlu1 %v7583_v26, %s5640_s26  ;;  %v7596_v32 = vld [vmem:[#allocation2 + $0x121] sm:$0xff] }
 0x277   : > { %5358 = vrot.lane.b32.xlu0 %v7502_v13, %s5640_s26  ;;  %v5164_v34 = vpop.permute.xlu1 %5163  ;;  %v2028_v18 = vadd.f32 %v7483_v5, %v1992_v41  ;;  %v1949_v13 = vpop.f32.mrf.mxu3 }
 0x278   : > { %3742 = vmatmul.bf16.gmra.mxu2 %v3402_v50  ;;  %v7593_v2 = vpop.permute.xlu2 %5213  ;;  %v1857_v11 = vpop.f32.mrf.mxu1  ;;  %v5165_v12 = vunpack.i.l.bf16 %v5164_v34  ;;  %v5166_v48 = vunpack.i.h.bf16 %v5164_v34 }
 0x279   : > { %v5149_v51 = vpop.permute.xlu0 %5148  ;;  %v2060_v3 = vmax.f32 %v2028_v18, 0.0  ;;  %v1858_v10 = vadd.f32 %v1857_v11, %v6858_v49  ;;  %v2152_v49 = vld [vmem:[#allocation2 + $0x48] sm:$0xff] }
 0x27a   : > { %v5151_v1 = vunpack.i.h.bf16 %v5149_v51  ;;  %v5150_v20 = vunpack.i.l.bf16 %v5149_v51  ;;  %v2423_v53 = vld [vmem:[#allocation2 + $0x122] sm:$0xff]  ;;  %v2424_v54 = vld [vmem:[#allocation2 + $0x12a] sm:$0xff]  ;;  %v3305_v16 = vsel %vm1262_vm3, %v2280_v30, %v5165_v12  ;;  %v3306_v28 = vsel %vm1262_vm3, %v2281_v63, %v5166_v48 }
 0x27b   : > { %v7598_v43 = vld [vmem:[#allocation2 + $0x129] sm:$0xff]  ;;  %2138 = vst.msk [vmem:[#allocation2 + $0x139] sm:$0xff] %vm1262_vm3, %v2060_v3  ;;  %v1947_v46 = vadd.f32 %v1946_v23, %v1858_v10  ;;  %v3427_v57 = vpack.c.bf16 %v2424_v54, %v2423_v53  ;;  %v5160_v23 = vunpack.i.l.bf16 %v7523_v60 }
 0x27c   : > { %v7603_v31 = vpack.i.bf16 %v7598_v43, %v7596_v32  ;;  %v2360_v44 = vld [vmem:[#allocation2 + $0x128] sm:$0xff]  ;;  %v3210_v42 = vsel %vm1262_vm3, %v2153_v37, %v5151_v1  ;;  %v3209_v27 = vsel %vm1262_vm3, %v2152_v49, %v5150_v20 }
 0x27d   : > { %v7605_v56 = vpack.i.bf16 %v2360_v44, %v2359_v4  ;;  %v1993_v21 = vmul.f32 %v7467_v45, %v1947_v46  ;;  %4474 = vmatmul.msk.bf16.gmra.mxu0 %vm1262_vm3, %v3427_v57  ;;  %v3241_v34 = vsel %vm1295_vm2, %v3209_v27, %v5160_v23  ;;  %v7636_v57 = vpack.i.bf16 %v2424_v54, %v2423_v53 }
 0x27e   : > { %5393 = vrot.lane.b32.xlu2 %v7603_v31, %s5641_s27  ;;  %5378 = vrot.lane.b32.xlu1 %v7552_v47, %s5641_s27  ;;  %v3242_v47 = vsel %vm1295_vm2, %v3210_v42, %v5161_v38 }
 0x27f   : > { %5383 = vrot.lane.b32.xlu0 %v7605_v56, %s5642_s28  ;;  %v5169_v24 = vpop.permute.xlu1 %5168  ;;  %v2029_v15 = vadd.f32 %v7483_v5, %v1993_v21  ;;  %v1951_v4 = vpop.f32.mrf.mxu3 }
 0x280   : > { %v5171_v62 = vunpack.i.h.bf16 %v5169_v24  ;;  %v5170_v60 = vunpack.i.l.bf16 %v5169_v24  ;;  %v7624_v29 = vpop.permute.xlu2 %5218  ;;  %v1860_v41 = vpop.f32.mrf.mxu1 }
 0x281   : > { %v5174_v22 = vpop.permute.xlu0 %5173  ;;  %v2061_v18 = vmax.f32 %v2029_v15, 0.0  ;;  %v1861_v51 = vadd.f32 %v1860_v41, %v6878_v55 }
 0x282   : > { %v5176_v52 = vunpack.i.h.bf16 %v5174_v22  ;;  %v5175_v50 = vunpack.i.l.bf16 %v5174_v22  ;;  %v3273_v11 = vsel %vm1328_vm4, %v3241_v34, %v5170_v60  ;;  %v3274_v3 = vsel %vm1328_vm4, %v3242_v47, %v5171_v62  ;;  %v2154_v62 = vld [vmem:[#allocation2 + $0x60] sm:$0xff]  ;;  %v7660_v22 = vpop.f32.mrf.mxu0 }
 0x283   : > { %v3404_v10 = vpack.c.bf16 %v3274_v3, %v3273_v11  ;;  %2139 = vst.msk [vmem:[#allocation2 + $0x141] sm:$0xff] %vm1262_vm3, %v2061_v18  ;;  %v1950_v12 = vadd.f32 %v1949_v13, %v1861_v51  ;;  %v2282_v34 = vld [vmem:[#allocation2 + $0x79] sm:$0xff]  ;;  %v5190_v18 = vunpack.i.l.bf16 %v7571_v33  ;;  %v5216_v51 = vunpack.i.h.bf16 %v7593_v2  ;;  %v2283_v3 = vld [vmem:[#allocation2 + $0x81] sm:$0xff] }
 0x284   : > { %v3338_v1 = vsel %vm1295_vm2, %v3306_v28, %v5176_v52  ;;  %v3337_v20 = vsel %vm1295_vm2, %v3305_v16, %v5175_v50  ;;  %v2361_v28 = vld [vmem:[#allocation2 + $0x138] sm:$0xff]  ;;  %v5191_v52 = vunpack.i.h.bf16 %v7571_v33  ;;  %v5215_v11 = vunpack.i.l.bf16 %v7593_v2 }
 0x285   : > { %v3369_v48 = vsel %vm1328_vm4, %v3337_v20, %v5185_v39  ;;  %v3370_v46 = vsel %vm1328_vm4, %v3338_v1, %v5186_v61  ;;  %3658 = vmatmul.bf16.gmra.mxu3 %v3404_v10  ;;  %v1994_v44 = vmul.f32 %v7467_v45, %v1950_v12 }
 0x286   : > { %v3405_v55 = vpack.c.bf16 %v3370_v46, %v3369_v48  ;;  %5398 = vrot.lane.b32.xlu2 %v7583_v26, %s5642_s28  ;;  %5403 = vrot.lane.b32.xlu1 %v7636_v57, %s5640_s26  ;;  %v7649_v26 = vld [vmem:[#allocation2 + $0x139] sm:$0xff] }
 0x287   : > { %5388 = vrot.lane.b32.xlu0 %v7550_v8, %s5640_s26  ;;  %v5194_v13 = vpop.permute.xlu1 %5193  ;;  %v2030_v49 = vadd.f32 %v7483_v5, %v1994_v44  ;;  %v1954_v10 = vpop.f32.mrf.mxu3 }
 0x288   : > { %3747 = vmatmul.bf16.gmra.mxu2 %v3405_v55  ;;  %v7646_v53 = vpop.permute.xlu2 %5243  ;;  %v1862_v54 = vpop.f32.mrf.mxu1  ;;  %v5195_v21 = vunpack.i.l.bf16 %v5194_v13  ;;  %v5196_v8 = vunpack.i.h.bf16 %v5194_v13 }
 0x289   : > { %v5179_v37 = vpop.permute.xlu0 %5178  ;;  %v2062_v38 = vmax.f32 %v2030_v49, 0.0  ;;  %v1863_v30 = vadd.f32 %v1862_v54, %v6902_v35  ;;  %v2155_v35 = vld [vmem:[#allocation2 + $0x68] sm:$0xff] }
 0x28a   : > { %v5181_v42 = vunpack.i.h.bf16 %v5179_v37  ;;  %v5180_v27 = vunpack.i.l.bf16 %v5179_v37  ;;  %v2425_v23 = vld [vmem:[#allocation2 + $0x13a] sm:$0xff]  ;;  %v2426_v61 = vld [vmem:[#allocation2 + $0x142] sm:$0xff]  ;;  %v3307_v1 = vsel %vm1262_vm3, %v2282_v34, %v5195_v21  ;;  %v3308_v12 = vsel %vm1262_vm3, %v2283_v3, %v5196_v8 }
 0x28b   : > { %v7651_v39 = vld [vmem:[#allocation2 + $0x141] sm:$0xff]  ;;  %2140 = vst.msk [vmem:[#allocation2 + $0x151] sm:$0xff] %vm1262_vm3, %v2062_v38  ;;  %v1952_v63 = vadd.f32 %v1951_v4, %v1863_v30  ;;  %v3430_v16 = vpack.c.bf16 %v2426_v61, %v2425_v23 }
 0x28c   : > { %v7656_v24 = vpack.i.bf16 %v7651_v39, %v7649_v26  ;;  %v2362_v15 = vld [vmem:[#allocation2 + $0x140] sm:$0xff]  ;;  %v3212_v50 = vsel %vm1262_vm3, %v2155_v35, %v5181_v42  ;;  %v3211_v41 = vsel %vm1262_vm3, %v2154_v62, %v5180_v27 }
 0x28d   : > { %v7658_v60 = vpack.i.bf16 %v2362_v15, %v2361_v28  ;;  %v1995_v47 = vmul.f32 %v7467_v45, %v1952_v63  ;;  %4475 = vmatmul.msk.bf16.gmra.mxu0 %vm1262_vm3, %v3430_v16  ;;  %v3243_v49 = vsel %vm1295_vm2, %v3211_v41, %v5190_v18  ;;  %v7691_v28 = vpack.i.bf16 %v2426_v61, %v2425_v23  ;;  %v7703_v41 = vpop.f32.mrf.mxu0 }
 0x28e   : > { %5423 = vrot.lane.b32.xlu2 %v7656_v24, %s5641_s27  ;;  %5408 = vrot.lane.b32.xlu1 %v7605_v56, %s5641_s27  ;;  %v3244_v56 = vsel %vm1295_vm2, %v3212_v50, %v5191_v52 }
 0x28f   : > { %5413 = vrot.lane.b32.xlu0 %v7658_v60, %s5642_s28  ;;  %v5199_v20 = vpop.permute.xlu1 %5198  ;;  %v2031_v48 = vadd.f32 %v7483_v5, %v1995_v47  ;;  %v1956_v61 = vpop.f32.mrf.mxu3 }
 0x290   : > { %v5201_v33 = vunpack.i.h.bf16 %v5199_v20  ;;  %v5200_v46 = vunpack.i.l.bf16 %v5199_v20  ;;  %v7679_v4 = vpop.permute.xlu2 %5248  ;;  %v1865_v13 = vpop.f32.mrf.mxu1 }
 0x291   : > { %v5204_v55 = vpop.permute.xlu0 %5203  ;;  %v2063_v37 = vmax.f32 %v2031_v48, 0.0  ;;  %v1866_v54 = vadd.f32 %v1865_v13, %v6935_v25 }
 0x292   : > { %v5206_v2 = vunpack.i.h.bf16 %v5204_v55  ;;  %v5205_v44 = vunpack.i.l.bf16 %v5204_v55  ;;  %v3275_v38 = vsel %vm1328_vm4, %v3243_v49, %v5200_v46  ;;  %v3276_v42 = vsel %vm1328_vm4, %v3244_v56, %v5201_v33  ;;  %v7715_v48 = vld [vmem:[#allocation2 + $0x150] sm:$0xff]  ;;  %v2157_v46 = vld [vmem:[#allocation2 + $0x80] sm:$0xff] }
 0x293   : > { %v3407_v21 = vpack.c.bf16 %v3276_v42, %v3275_v38  ;;  %2141 = vst.msk [vmem:[#allocation2 + $0x159] sm:$0xff] %vm1262_vm3, %v2063_v37  ;;  %v1955_v8 = vadd.f32 %v1954_v10, %v1866_v54  ;;  %v5221_v56 = vunpack.i.h.bf16 %v7624_v29  ;;  %v5220_v37 = vunpack.i.l.bf16 %v7624_v29  ;;  %v2284_v42 = vld [vmem:[#allocation2 + $0x91] sm:$0xff] }
 0x294   : > { %v3340_v27 = vsel %vm1295_vm2, %v3308_v12, %v5206_v2  ;;  %v3339_v30 = vsel %vm1295_vm2, %v3307_v1, %v5205_v44  ;;  %v5246_v54 = vunpack.i.h.bf16 %v7646_v53  ;;  %v5245_v38 = vunpack.i.l.bf16 %v7646_v53 }
 0x295   : > { %v3371_v63 = vsel %vm1328_vm4, %v3339_v30, %v5215_v11  ;;  %v3372_v16 = vsel %vm1328_vm4, %v3340_v27, %v5216_v51  ;;  %3663 = vmatmul.bf16.gmra.mxu3 %v3407_v21  ;;  %v1996_v15 = vmul.f32 %v7467_v45, %v1955_v8  ;;  %v7706_v51 = vld [vmem:[#allocation2 + $0x151] sm:$0xff] }
 0x296   : > { %v3408_v25 = vpack.c.bf16 %v3372_v16, %v3371_v63  ;;  %5428 = vrot.lane.b32.xlu2 %v7636_v57, %s5642_s28  ;;  %5433 = vrot.lane.b32.xlu1 %v7691_v28, %s5640_s26  ;;  %v2285_v16 = vld [vmem:[#allocation2 + $0x99] sm:$0xff] }
 0x297   : > { %5418 = vrot.lane.b32.xlu0 %v7603_v31, %s5640_s26  ;;  %v5224_v62 = vpop.permute.xlu1 %5223  ;;  %v2032_v35 = vadd.f32 %v7483_v5, %v1996_v15 }
 0x298   : > { %3752 = vmatmul.bf16.gmra.mxu2 %v3408_v25  ;;  %v7701_v50 = vpop.permute.xlu2 %5273  ;;  %v1867_v23 = vpop.f32.mrf.mxu1  ;;  %v5225_v1 = vunpack.i.l.bf16 %v5224_v62  ;;  %v5226_v13 = vunpack.i.h.bf16 %v5224_v62 }
 0x299   : > { %v5209_v52 = vpop.permute.xlu0 %5208  ;;  %v2064_v34 = vmax.f32 %v2032_v35, 0.0  ;;  %v1868_v18 = vadd.f32 %v1867_v23, %v6971_v17  ;;  %v2156_v17 = vld [vmem:[#allocation2 + $0x78] sm:$0xff] }
 0x29a   : > { %v5211_v47 = vunpack.i.h.bf16 %v5209_v52  ;;  %v5210_v57 = vunpack.i.l.bf16 %v5209_v52  ;;  %v2427_v11 = vld [vmem:[#allocation2 + $0x152] sm:$0xff]  ;;  %v2428_v31 = vld [vmem:[#allocation2 + $0x15a] sm:$0xff]  ;;  %v3309_v27 = vsel %vm1262_vm3, %v2284_v42, %v5225_v1  ;;  %v3310_v62 = vsel %vm1262_vm3, %v2285_v16, %v5226_v13 }
 0x29b   : > { %v7708_v3 = vld [vmem:[#allocation2 + $0x159] sm:$0xff]  ;;  %2142 = vst.msk [vmem:[#allocation2 + $0x169] sm:$0xff] %vm1262_vm3, %v2064_v34  ;;  %v1957_v20 = vadd.f32 %v1956_v61, %v1868_v18  ;;  %v3433_v10 = vpack.c.bf16 %v2428_v31, %v2427_v11  ;;  %v5462_v1 = vpack.i.bf16 %v2428_v31, %v2427_v11  ;;  %v5250_v16 = vunpack.i.l.bf16 %v7679_v4 }
 0x29c   : > { %v7713_v12 = vpack.i.bf16 %v7708_v3, %v7706_v51  ;;  %v7717_v33 = vld [vmem:[#allocation2 + $0x158] sm:$0xff]  ;;  %v3214_v2 = vsel %vm1262_vm3, %v2157_v46, %v5211_v47  ;;  %v3213_v44 = vsel %vm1262_vm3, %v2156_v17, %v5210_v57  ;;  %v7748_v47 = vpop.f32.mrf.mxu0 }
 0x29d   : > { %v7721_v55 = vpack.i.bf16 %v7717_v33, %v7715_v48  ;;  %v1997_v49 = vmul.f32 %v7467_v45, %v1957_v20  ;;  %4476 = vmatmul.msk.bf16.gmra.mxu0 %vm1262_vm3, %v3433_v10  ;;  %v3245_v15 = vsel %vm1295_vm2, %v3213_v44, %v5220_v37 }
 0x29e   : > { %5453 = vrot.lane.b32.xlu2 %v7713_v12, %s5641_s27  ;;  %5438 = vrot.lane.b32.xlu1 %v7658_v60, %s5641_s27  ;;  %v3246_v60 = vsel %vm1295_vm2, %v3214_v2, %v5221_v56 }
 0x29f   : > { %5443 = vrot.lane.b32.xlu0 %v7721_v55, %s5642_s28  ;;  %v5229_v45 = vpop.permute.xlu1 %5228  ;;  %v2033_v30 = vadd.f32 %v7483_v5, %v1997_v49 }
 0x2a0   : > { %v5231_v21 = vunpack.i.h.bf16 %v5229_v45  ;;  %v5230_v8 = vunpack.i.l.bf16 %v5229_v45  ;;  %v7739_v29 = vpop.permute.xlu2 %5278 }
 0x2a1   : > { %v5234_v63 = vpop.permute.xlu0 %5233  ;;  %v2065_v35 = vmax.f32 %v2033_v30, 0.0 }
 0x2a2   : > { %v5236_v25 = vunpack.i.h.bf16 %v5234_v63  ;;  %v5235_v53 = vunpack.i.l.bf16 %v5234_v63  ;;  %v3277_v52 = vsel %vm1328_vm4, %v3245_v15, %v5230_v8  ;;  %v3278_v23 = vsel %vm1328_vm4, %v3246_v60, %v5231_v21  ;;  %v7760_v13 = vld [vmem:[#allocation2 + $0x169] sm:$0xff] }
 0x2a3   : > { %v3410_v34 = vpack.c.bf16 %v3278_v23, %v3277_v52  ;;  %2143 = vst.msk [vmem:[#allocation2 + $0x171] sm:$0xff] %vm1262_vm3, %v2065_v35  ;;  %v2365_v37 = vld [vmem:[#allocation2 + $0x168] sm:$0xff]  ;;  %v5251_v63 = vunpack.i.h.bf16 %v7679_v4  ;;  %v5275_v15 = vunpack.i.l.bf16 %v7701_v50 }
 0x2a4   : > { %v3342_v5 = vsel %vm1295_vm2, %v3310_v62, %v5236_v25  ;;  %v3341_v61 = vsel %vm1295_vm2, %v3309_v27, %v5235_v53  ;;  %v7768_v45 = vpop.f32.mrf.mxu0  ;;  %v5276_v53 = vunpack.i.h.bf16 %v7701_v50  ;;  %v2286_v23 = vld [vmem:[#allocation2 + $0xa9] sm:$0xff] }
 0x2a5   : > { %v3373_v57 = vsel %vm1328_vm4, %v3341_v61, %v5245_v38  ;;  %v3374_v18 = vsel %vm1328_vm4, %v3342_v5, %v5246_v54  ;;  %3668 = vmatmul.bf16.gmra.mxu3 %v3410_v34  ;;  %v2158_v54 = vld [vmem:[#allocation2 + $0x90] sm:$0xff]  ;;  %v2159_v38 = vld [vmem:[#allocation2 + $0x98] sm:$0xff] }
 0x2a6   : > { %v3411_v20 = vpack.c.bf16 %v3374_v18, %v3373_v57  ;;  %5458 = vrot.lane.b32.xlu2 %v7691_v28, %s5642_s28  ;;  %5463 = vrot.lane.b32.xlu1 %v5462_v1, %s5640_s26  ;;  %v2287_v5 = vld [vmem:[#allocation2 + $0xb1] sm:$0xff] }
 0x2a7   : > { %5448 = vrot.lane.b32.xlu0 %v7656_v24, %s5640_s26  ;;  %v5254_v10 = vpop.permute.xlu1 %5253 }
 0x2a8   : > { %3757 = vmatmul.bf16.gmra.mxu2 %v3411_v20  ;;  %v7758_v46 = vpop.permute.xlu2 %5303  ;;  %v5256_v21 = vunpack.i.h.bf16 %v5254_v10  ;;  %v5255_v8 = vunpack.i.l.bf16 %v5254_v10 }
 0x2a9   : > { %v5239_v17 = vpop.permute.xlu0 %5238 }
 0x2aa   : > { %v5241_v2 = vunpack.i.h.bf16 %v5239_v17  ;;  %v5240_v44 = vunpack.i.l.bf16 %v5239_v17  ;;  %v2429_v49 = vld [vmem:[#allocation2 + $0x16a] sm:$0xff]  ;;  %v2430_v11 = vld [vmem:[#allocation2 + $0x172] sm:$0xff]  ;;  %v3311_v57 = vsel %vm1262_vm3, %v2286_v23, %v5255_v8  ;;  %v3312_v18 = vsel %vm1262_vm3, %v2287_v5, %v5256_v21 }
 0x2ab   : > { %v7762_v31 = vld [vmem:[#allocation2 + $0x171] sm:$0xff]  ;;  %v3436_v56 = vpack.c.bf16 %v2430_v11, %v2429_v49 }
 0x2ac   : > { %v7766_v28 = vpack.i.bf16 %v7762_v31, %v7760_v13  ;;  %v2366_v24 = vld [vmem:[#allocation2 + $0x170] sm:$0xff]  ;;  %v3216_v27 = vsel %vm1262_vm3, %v2159_v38, %v5241_v2  ;;  %v3215_v30 = vsel %vm1262_vm3, %v2158_v54, %v5240_v44 }
 0x2ad   : > { %v5472_v42 = vpack.i.bf16 %v2366_v24, %v2365_v37  ;;  %4477 = vmatmul.msk.bf16.gmra.mxu0 %vm1262_vm3, %v3436_v56  ;;  %v3247_v4 = vsel %vm1295_vm2, %v3215_v30, %v5250_v16  ;;  %v7794_v37 = vpack.i.bf16 %v2430_v11, %v2429_v49  ;;  %v2160_v49 = vld [vmem:[#allocation2 + $0xa8] sm:$0xff]  ;;  %v2161_v11 = vld [vmem:[#allocation2 + $0xb0] sm:$0xff]  ;;  %v5280_v16 = vunpack.i.l.bf16 %v7739_v29 }
 0x2ae   : > { %5483 = vrot.lane.b32.xlu2 %v7766_v28, %s5641_s27  ;;  %5468 = vrot.lane.b32.xlu1 %v7721_v55, %s5641_s27  ;;  %v3248_v55 = vsel %vm1295_vm2, %v3216_v27, %v5251_v63 }
 0x2af   : > { %5473 = vrot.lane.b32.xlu0 %v5472_v42, %s5642_s28  ;;  %v5259_v25 = vpop.permute.xlu1 %5258 }
 0x2b0   : > { %v5261_v60 = vunpack.i.h.bf16 %v5259_v25  ;;  %v5260_v62 = vunpack.i.l.bf16 %v5259_v25  ;;  %v7782_v52 = vpop.permute.xlu2 %5308 }
 0x2b1   : > { %v5264_v35 = vpop.permute.xlu0 %5263 }
 0x2b2   : > { %v5266_v61 = vunpack.i.h.bf16 %v5264_v35  ;;  %v5265_v34 = vunpack.i.l.bf16 %v5264_v35  ;;  %v3279_v20 = vsel %vm1328_vm4, %v3247_v4, %v5260_v62  ;;  %v3280_v50 = vsel %vm1328_vm4, %v3248_v55, %v5261_v60  ;;  %v2288_v62 = vld [vmem:[#allocation2 + $0xc1] sm:$0xff]  ;;  %v2289_v35 = vld [vmem:[#allocation2 + $0xc9] sm:$0xff]  ;;  %v7812_v55 = vpop.f32.mrf.mxu3 }
 0x2b3   : > { %v3413_v2 = vpack.c.bf16 %v3280_v50, %v3279_v20  ;;  %v5305_v60 = vunpack.i.l.bf16 %v7758_v46 }
 0x2b4   : > { %v3344_v10 = vsel %vm1295_vm2, %v3312_v18, %v5266_v61  ;;  %v3343_v17 = vsel %vm1295_vm2, %v3311_v57, %v5265_v34 }
 0x2b5   : > { %v3375_v44 = vsel %vm1328_vm4, %v3343_v17, %v5275_v15  ;;  %v3376_v56 = vsel %vm1328_vm4, %v3344_v10, %v5276_v53  ;;  %3673 = vmatmul.bf16.gmra.mxu3 %v3413_v2  ;;  %v5306_v15 = vunpack.i.h.bf16 %v7758_v46 }
 0x2b6   : > { %v3414_v24 = vpack.c.bf16 %v3376_v56, %v3375_v44  ;;  %5488 = vrot.lane.b32.xlu2 %v5462_v1, %s5642_s28  ;;  %5493 = vrot.lane.b32.xlu1 %v7794_v37, %s5640_s26  ;;  %v5281_v1 = vunpack.i.h.bf16 %v7739_v29 }
 0x2b7   : > { %5478 = vrot.lane.b32.xlu0 %v7713_v12, %s5640_s26  ;;  %v5284_v54 = vpop.permute.xlu1 %5283 }
 0x2b8   : > { %3762 = vmatmul.bf16.gmra.mxu2 %v3414_v24  ;;  %v7801_v27 = vpop.permute.xlu2 %5333  ;;  %v5286_v8 = vunpack.i.h.bf16 %v5284_v54  ;;  %v5285_v63 = vunpack.i.l.bf16 %v5284_v54 }
 0x2b9   : > { %v5269_v38 = vpop.permute.xlu0 %5268 }
 0x2ba   : > { %v5271_v30 = vunpack.i.h.bf16 %v5269_v38  ;;  %v5270_v21 = vunpack.i.l.bf16 %v5269_v38  ;;  %v3314_v34 = vsel %vm1262_vm3, %v2289_v35, %v5286_v8  ;;  %v7824_v8 = vpop.f32.mrf.mxu3 }
 0x2bc   : > { %v3218_v25 = vsel %vm1262_vm3, %v2161_v11, %v5271_v30  ;;  %v3217_v12 = vsel %vm1262_vm3, %v2160_v49, %v5270_v21 }
 0x2bd   : > { %v3249_v20 = vsel %vm1295_vm2, %v3217_v12, %v5280_v16  ;;  %v3250_v46 = vsel %vm1295_vm2, %v3218_v25, %v5281_v1  ;;  %v2162_v1 = vld [vmem:[#allocation2 + $0xc0] sm:$0xff]  ;;  %v2163_v16 = vld [vmem:[#allocation2 + $0xc8] sm:$0xff] }
 0x2be   : > { %5498 = vrot.lane.b32.xlu1 %v5472_v42, %s5641_s27  ;;  %v3313_v42 = vsel %vm1262_vm3, %v2288_v62, %v5285_v63  ;;  %v5335_v62 = vunpack.i.l.bf16 %v7801_v27 }
 0x2c0   : > { %v5289_v61 = vpop.permute.xlu1 %5288  ;;  %v7818_v50 = vpop.permute.xlu2 %5338 }
 0x2c1   : > { %v5294_v53 = vpop.permute.xlu0 %5293  ;;  %v5291_v4 = vunpack.i.h.bf16 %v5289_v61  ;;  %v5290_v29 = vunpack.i.l.bf16 %v5289_v61  ;;  %v2291_v61 = vld [vmem:[#allocation2 + $0xe1] sm:$0xff] }
 0x2c2   : > { %v5296_v23 = vunpack.i.h.bf16 %v5294_v53  ;;  %v5295_v5 = vunpack.i.l.bf16 %v5294_v53  ;;  %v5311_v53 = vunpack.i.h.bf16 %v7782_v52 }
 0x2c3   : > { %v3281_v10 = vsel %vm1328_vm4, %v3249_v20, %v5290_v29  ;;  %v3282_v17 = vsel %vm1328_vm4, %v3250_v46, %v5291_v4 }
 0x2c4   : > { %v3345_v57 = vsel %vm1295_vm2, %v3313_v42, %v5295_v5  ;;  %v3346_v18 = vsel %vm1295_vm2, %v3314_v34, %v5296_v23  ;;  %v3416_v56 = vpack.c.bf16 %v3282_v17, %v3281_v10  ;;  %v2290_v5 = vld [vmem:[#allocation2 + $0xd9] sm:$0xff] }
 0x2c5   : > { %v3377_v2 = vsel %vm1328_vm4, %v3345_v57, %v5305_v60  ;;  %v3378_v44 = vsel %vm1328_vm4, %v3346_v18, %v5306_v15  ;;  %v5310_v15 = vunpack.i.l.bf16 %v7782_v52  ;;  %v5336_v60 = vunpack.i.h.bf16 %v7801_v27 }
 0x2c6   : > { %v3417_v24 = vpack.c.bf16 %v3378_v44, %v3377_v2  ;;  %3678 = vmatmul.bf16.gmra.mxu3 %v3416_v56 }
 0x2c8   : > { %3767 = vmatmul.bf16.gmra.mxu2 %v3417_v24  ;;  %v5314_v38 = vpop.permute.xlu1 %5313  ;;  %v7826_v63 = vpop.permute.xlu2 %5363 }
 0x2c9   : > { %v5299_v54 = vpop.permute.xlu0 %5298  ;;  %v5316_v49 = vunpack.i.h.bf16 %v5314_v38  ;;  %v5315_v11 = vunpack.i.l.bf16 %v5314_v38 }
 0x2ca   : > { %v5301_v30 = vunpack.i.h.bf16 %v5299_v54  ;;  %v5300_v21 = vunpack.i.l.bf16 %v5299_v54 }
 0x2cb   : > { %v3316_v57 = vsel %vm1262_vm3, %v2291_v61, %v5316_v49  ;;  %v3315_v18 = vsel %vm1262_vm3, %v2290_v5, %v5315_v11  ;;  %v5340_v5 = vunpack.i.l.bf16 %v7818_v50  ;;  %v5366_v61 = vunpack.i.h.bf16 %v7826_v63 }
 0x2cc   : > { %v3219_v25 = vsel %vm1262_vm3, %v2162_v1, %v5300_v21  ;;  %v3220_v12 = vsel %vm1262_vm3, %v2163_v16, %v5301_v30 }
 0x2cd   : > { %v3251_v20 = vsel %vm1295_vm2, %v3219_v25, %v5310_v15  ;;  %v3252_v52 = vsel %vm1295_vm2, %v3220_v12, %v5311_v53  ;;  %v7848_v53 = vpop.f32.mrf.mxu0 }
 0x2d0   : > { %v5319_v35 = vpop.permute.xlu1 %5318  ;;  %v3644_v24 = vpop.f32.mrf.mxu3 }
 0x2d1   : > { %v5324_v23 = vpop.permute.xlu0 %5323  ;;  %v5321_v42 = vunpack.i.h.bf16 %v5319_v35  ;;  %v5320_v34 = vunpack.i.l.bf16 %v5319_v35  ;;  %v7844_v38 = vpop.permute.xlu2 %5368  ;;  %v2165_v35 = vld [vmem:[#allocation2 + $0xe0] sm:$0xff] }
 0x2d2   : > { %v5326_v4 = vunpack.i.h.bf16 %v5324_v23  ;;  %v5325_v29 = vunpack.i.l.bf16 %v5324_v23 }
 0x2d3   : > { %v3283_v10 = vsel %vm1328_vm4, %v3251_v20, %v5320_v34  ;;  %v3284_v17 = vsel %vm1328_vm4, %v3252_v52, %v5321_v42  ;;  %v2292_v42 = vld [vmem:[#allocation2 + $0xf1] sm:$0xff]  ;;  %v2293_v34 = vld [vmem:[#allocation2 + $0xf9] sm:$0xff] }
 0x2d4   : > { %v3348_v46 = vsel %vm1295_vm2, %v3316_v57, %v5326_v4  ;;  %v3347_v27 = vsel %vm1295_vm2, %v3315_v18, %v5325_v29  ;;  %v3419_v2 = vpack.c.bf16 %v3284_v17, %v3283_v10  ;;  %v5365_v18 = vunpack.i.l.bf16 %v7826_v63 }
 0x2d5   : > { %v3379_v44 = vsel %vm1328_vm4, %v3347_v27, %v5335_v62  ;;  %v3380_v56 = vsel %vm1328_vm4, %v3348_v46, %v5336_v60  ;;  %v5341_v60 = vunpack.i.h.bf16 %v7818_v50  ;;  %v2164_v62 = vld [vmem:[#allocation2 + $0xd8] sm:$0xff] }
 0x2d6   : > { %v3420_v54 = vpack.c.bf16 %v3380_v56, %v3379_v44  ;;  %3683 = vmatmul.bf16.gmra.mxu3 %v3419_v2 }
 0x2d8   : > { %3772 = vmatmul.bf16.gmra.mxu2 %v3420_v54  ;;  %v5344_v30 = vpop.permute.xlu1 %5343  ;;  %v3646_v57 = vpop.f32.mrf.mxu3 }
 0x2d9   : > { %v5329_v21 = vpop.permute.xlu0 %5328  ;;  %v5346_v25 = vunpack.i.h.bf16 %v5344_v30  ;;  %v5345_v12 = vunpack.i.l.bf16 %v5344_v30  ;;  %v7860_v50 = vpop.permute.xlu2 %5393 }
 0x2da   : > { %v5331_v1 = vunpack.i.h.bf16 %v5329_v21  ;;  %v5330_v16 = vunpack.i.l.bf16 %v5329_v21 }
 0x2db   : > { %v3733_v49 = vpop.f32.mrf.mxu2  ;;  %v3318_v20 = vsel %vm1262_vm3, %v2293_v34, %v5346_v25  ;;  %v3317_v52 = vsel %vm1262_vm3, %v2292_v42, %v5345_v12  ;;  %v5575_v25 = vld [vmem:[%s8557_s3] ss:$0 sm:$0xff]  ;;  %v7879_v34 = vpop.f32.mrf.mxu0 }
 0x2dc   : > { %v7846_v11 = vadd.f32 %v3733_v49, %v3644_v24  ;;  %v3222_v4 = vsel %vm1262_vm3, %v2165_v35, %v5331_v1  ;;  %v3221_v29 = vsel %vm1262_vm3, %v2164_v62, %v5330_v16  ;;  %v5574_v24 = vld [vmem:[%s8556_s2] ss:$0 sm:$0xff] }
 0x2dd   : > { %v3253_v30 = vsel %vm1295_vm2, %v3221_v29, %v5340_v5 }
 0x2de   : > { %v1870_v15 = vpop.f32.mrf.mxu1 }
 0x2df   : > { %v1871_v23 = vadd.f32 %v1870_v15, %v6999_v40 }
 0x2e0   : > { %v5349_v40 = vpop.permute.xlu1 %5348 }
 0x2e1   : > { %v1960_v46 = vadd.f32 %v7812_v55, %v1871_v23  ;;  %v5354_v27 = vpop.permute.xlu0 %5353  ;;  %v5351_v10 = vunpack.i.h.bf16 %v5349_v40  ;;  %v5350_v17 = vunpack.i.l.bf16 %v5349_v40  ;;  %v3254_v55 = vsel %vm1295_vm2, %v3222_v4, %v5341_v60 }
 0x2e2   : > { %v5356_v2 = vunpack.i.h.bf16 %v5354_v27  ;;  %v5355_v44 = vunpack.i.l.bf16 %v5354_v27 }
 0x2e3   : > { %v3735_v56 = vpop.f32.mrf.mxu2  ;;  %v1998_v63 = vmul.f32 %v5574_v24, %v1960_v46  ;;  %v3285_v1 = vsel %vm1328_vm4, %v3253_v30, %v5350_v17  ;;  %v3286_v16 = vsel %vm1328_vm4, %v3254_v55, %v5351_v10  ;;  %v7883_v46 = vpop.permute.xlu2 %5398  ;;  %v5370_v55 = vunpack.i.l.bf16 %v7844_v38 }
 0x2e4   : > { %v7865_v54 = vadd.f32 %v3735_v56, %v3646_v57  ;;  %v3350_v21 = vsel %vm1295_vm2, %v3318_v20, %v5356_v2  ;;  %v3349_v49 = vsel %vm1295_vm2, %v3317_v52, %v5355_v44  ;;  %v3422_v15 = vpack.c.bf16 %v3286_v16, %v3285_v1  ;;  %v2166_v44 = vld [vmem:[#allocation2 + $0xf0] sm:$0xff]  ;;  %v2167_v56 = vld [vmem:[#allocation2 + $0xf8] sm:$0xff] }
 0x2e5   : > { %v2034_v12 = vadd.f32 %v5575_v25, %v1998_v63  ;;  %v3381_v62 = vsel %vm1328_vm4, %v3349_v49, %v5365_v18  ;;  %v3382_v23 = vsel %vm1328_vm4, %v3350_v21, %v5366_v61  ;;  %v5396_v21 = vunpack.i.h.bf16 %v7860_v50  ;;  %v2295_v1 = vld [vmem:[#allocation2 + $0x111] sm:$0xff] }
 0x2e6   : > { %v1872_v35 = vpop.f32.mrf.mxu1  ;;  %3688 = vmatmul.bf16.gmra.mxu3 %v3422_v15  ;;  %v3423_v42 = vpack.c.bf16 %v3382_v23, %v3381_v62  ;;  %v5395_v49 = vunpack.i.l.bf16 %v7860_v50  ;;  %v2294_v15 = vld [vmem:[#allocation2 + $0x109] sm:$0xff] }
 0x2e7   : > { %v2066_v60 = vmax.f32 %v2034_v12, 0.0  ;;  %v1873_v5 = vadd.f32 %v1872_v35, %v7020_v19  ;;  %v7894_v12 = vpop.f32.mrf.mxu0 }
 0x2e8   : > { %v3649_v4 = vpop.f32.mrf.mxu3  ;;  %3777 = vmatmul.bf16.gmra.mxu2 %v3423_v42  ;;  %v5374_v57 = vpop.permute.xlu1 %5373 }
 0x2e9   : > { %2144 = vst.msk [vmem:[#allocation2 + $0x181] sm:$0xff] %vm1262_vm3, %v2066_v60  ;;  %v1962_v29 = vadd.f32 %v7824_v8, %v1873_v5  ;;  %v5359_v20 = vpop.permute.xlu0 %5358  ;;  %v5376_v10 = vunpack.i.h.bf16 %v5374_v57  ;;  %v5375_v2 = vunpack.i.l.bf16 %v5374_v57 }
 0x2ea   : > { %v5361_v61 = vunpack.i.h.bf16 %v5359_v20  ;;  %v5360_v40 = vunpack.i.l.bf16 %v5359_v20 }
 0x2eb   : > { %v1999_v52 = vmul.f32 %v5574_v24, %v1962_v29  ;;  %v3738_v18 = vpop.f32.mrf.mxu2  ;;  %v5371_v24 = vunpack.i.h.bf16 %v7844_v38  ;;  %v3320_v62 = vsel %vm1262_vm3, %v2295_v1, %v5376_v10  ;;  %v3319_v5 = vsel %vm1262_vm3, %v2294_v15, %v5375_v2 }
 0x2ec   : > { %v7885_v19 = vadd.f32 %v3738_v18, %v3649_v4  ;;  %v3224_v63 = vsel %vm1262_vm3, %v2167_v56, %v5361_v61  ;;  %v3223_v8 = vsel %vm1262_vm3, %v2166_v44, %v5360_v40 }
 0x2ed   : > { %v2035_v27 = vadd.f32 %v5575_v25, %v1999_v52  ;;  %v3255_v4 = vsel %vm1295_vm2, %v3223_v8, %v5370_v55  ;;  %v3256_v50 = vsel %vm1295_vm2, %v3224_v63, %v5371_v24 }
 0x2ef   : > { %v2067_v17 = vmax.f32 %v2035_v27, 0.0  ;;  %v5424_v27 = vpop.permute.xlu2 %5423 }
 0x2f0   : > { %v3651_v30 = vpop.f32.mrf.mxu3  ;;  %v5379_v16 = vpop.permute.xlu1 %5378  ;;  %v7910_v1 = vld [vmem:[#allocation2 + $0x181] sm:$0xff] }
 0x2f1   : > { %2145 = vst.msk [vmem:[#allocation2 + $0x189] sm:$0xff] %vm1262_vm3, %v2067_v17  ;;  %v5384_v25 = vpop.permute.xlu0 %5383  ;;  %v5381_v35 = vunpack.i.h.bf16 %v5379_v16  ;;  %v5380_v23 = vunpack.i.l.bf16 %v5379_v16  ;;  %v2367_v16 = vld [vmem:[#allocation2 + $0x180] sm:$0xff] }
 0x2f2   : > { %v5386_v60 = vunpack.i.h.bf16 %v5384_v25  ;;  %v5385_v38 = vunpack.i.l.bf16 %v5384_v25 }
 0x2f3   : > { %v3740_v42 = vpop.f32.mrf.mxu2  ;;  %v3287_v20 = vsel %vm1328_vm4, %v3255_v4, %v5380_v23  ;;  %v3288_v52 = vsel %vm1328_vm4, %v3256_v50, %v5381_v35 }
 0x2f4   : > { %v3352_v29 = vsel %vm1295_vm2, %v3320_v62, %v5386_v60  ;;  %v7901_v57 = vadd.f32 %v3740_v42, %v3651_v30  ;;  %v3351_v18 = vsel %vm1295_vm2, %v3319_v5, %v5385_v38  ;;  %v3425_v61 = vpack.c.bf16 %v3288_v52, %v3287_v20  ;;  %v7915_v62 = vpop.f32.mrf.mxu0  ;;  %v2168_v38 = vld [vmem:[#allocation2 + $0x108] sm:$0xff]  ;;  %v2169_v42 = vld [vmem:[#allocation2 + $0x110] sm:$0xff] }
 0x2f5   : > { %v3384_v40 = vsel %vm1328_vm4, %v3352_v29, %v5396_v21  ;;  %v3383_v10 = vsel %vm1328_vm4, %v3351_v18, %v5395_v49  ;;  %v5401_v18 = vunpack.i.h.bf16 %v7883_v46 }
 0x2f6   : > { %3693 = vmatmul.bf16.gmra.mxu3 %v3425_v61  ;;  %v3426_v17 = vpack.c.bf16 %v3384_v40, %v3383_v10  ;;  %v5400_v61 = vunpack.i.l.bf16 %v7883_v46  ;;  %v5426_v40 = vunpack.i.h.bf16 %v5424_v27 }
 0x2f7   : > { %v7922_v4 = vpop.permute.xlu2 %5428 }
 0x2f8   : > { %v3654_v2 = vpop.f32.mrf.mxu3  ;;  %v2431_v44 = vld [vmem:[#allocation2 + $0x182] sm:$0xff]  ;;  %v2432_v56 = vld [vmem:[#allocation2 + $0x18a] sm:$0xff]  ;;  %3782 = vmatmul.bf16.gmra.mxu2 %v3426_v17  ;;  %v5404_v8 = vpop.permute.xlu1 %5403 }
 0x2f9   : > { %v7908_v63 = vld [vmem:[#allocation2 + $0x189] sm:$0xff]  ;;  %v5389_v30 = vpop.permute.xlu0 %5388  ;;  %v3439_v24 = vpack.c.bf16 %v2432_v56, %v2431_v44  ;;  %v5522_v21 = vpack.i.bf16 %v2432_v56, %v2431_v44  ;;  %v5406_v5 = vunpack.i.h.bf16 %v5404_v8  ;;  %v5405_v50 = vunpack.i.l.bf16 %v5404_v8 }
 0x2fa   : > { %v2368_v55 = vld [vmem:[#allocation2 + $0x188] sm:$0xff]  ;;  %v5512_v49 = vpack.i.bf16 %v7908_v63, %v7910_v1  ;;  %v5391_v35 = vunpack.i.h.bf16 %v5389_v30  ;;  %v5390_v23 = vunpack.i.l.bf16 %v5389_v30 }
 0x2fb   : > { %v3743_v25 = vpop.f32.mrf.mxu2  ;;  %4478 = vmatmul.msk.bf16.gmra.mxu0 %vm1262_vm3, %v3439_v24  ;;  %v5502_v15 = vpack.i.bf16 %v2368_v55, %v2367_v16  ;;  %5523 = vrot.lane.b32.xlu1 %v5522_v21, %s5640_s26  ;;  %v3322_v8 = vsel %vm1262_vm3, %v7598_v43, %v5406_v5  ;;  %v3321_v46 = vsel %vm1262_vm3, %v7596_v32, %v5405_v50 }
 0x2fc   : > { %v7917_v60 = vadd.f32 %v3743_v25, %v3654_v2  ;;  %5513 = vrot.lane.b32.xlu2 %v5512_v49, %s5641_s27  ;;  %v3226_v29 = vsel %vm1262_vm3, %v2169_v42, %v5391_v35  ;;  %v3225_v20 = vsel %vm1262_vm3, %v2168_v38, %v5390_v23  ;;  %v5425_v2 = vunpack.i.l.bf16 %v5424_v27  ;;  %v7946_v5 = vpop.f32.mrf.mxu0  ;;  %v2401_v38 = vld [vmem:[#allocation2 + $0x199] sm:$0xff]  ;;  %v2402_v42 = vld [vmem:[#allocation2 + $0x1a1] sm:$0xff] }
 0x2fd   : > { %5503 = vrot.lane.b32.xlu0 %v5502_v15, %s5642_s28  ;;  %v3257_v16 = vsel %vm1295_vm2, %v3225_v20, %v5400_v61  ;;  %v3258_v25 = vsel %vm1295_vm2, %v3226_v29, %v5401_v18  ;;  %v2369_v29 = vld [vmem:[#allocation2 + $0x198] sm:$0xff]  ;;  %v2370_v20 = vld [vmem:[#allocation2 + $0x1a0] sm:$0xff]  ;;  %v5537_v61 = vpack.i.bf16 %v2402_v42, %v2401_v38 }
 0x300   : > { %v7926_v52 = vpop.f32.mrf.mxu3  ;;  %v5409_v10 = vpop.permute.xlu1 %5408 }
 0x301   : > { %v5414_v17 = vpop.permute.xlu0 %5413  ;;  %v5411_v44 = vunpack.i.h.bf16 %v5409_v10  ;;  %v5410_v56 = vunpack.i.l.bf16 %v5409_v10  ;;  %v5454_v10 = vpop.permute.xlu2 %5453 }
 0x302   : > { %v5416_v30 = vunpack.i.h.bf16 %v5414_v17  ;;  %v5415_v24 = vunpack.i.l.bf16 %v5414_v17  ;;  %v5527_v17 = vpack.i.bf16 %v2370_v20, %v2369_v29  ;;  %v5455_v38 = vunpack.i.l.bf16 %v5454_v10 }
 0x303   : > { %v7932_v55 = vpop.f32.mrf.mxu2  ;;  %v3289_v27 = vsel %vm1328_vm4, %v3257_v16, %v5410_v56  ;;  %v3290_v49 = vsel %vm1328_vm4, %v3258_v25, %v5411_v44  ;;  %5533 = vrot.lane.b32.xlu1 %v5502_v15, %s5641_s27 }
 0x304   : > { %v3354_v21 = vsel %vm1295_vm2, %v3322_v8, %v5416_v30  ;;  %v3353_v35 = vsel %vm1295_vm2, %v3321_v46, %v5415_v24  ;;  %5518 = vrot.lane.b32.xlu2 %v7794_v37, %s5642_s28  ;;  %v3428_v43 = vpack.c.bf16 %v3290_v49, %v3289_v27  ;;  %v2170_v8 = vld [vmem:[#allocation2 + $0x120] sm:$0xff]  ;;  %v2171_v24 = vld [vmem:[#allocation2 + $0x128] sm:$0xff]  ;;  %v7958_v16 = vpop.f32.mrf.mxu0  ;;  %v5431_v49 = vunpack.i.h.bf16 %v7922_v4 }
 0x305   : > { %v3386_v23 = vsel %vm1328_vm4, %v3354_v21, %v5426_v40  ;;  %5508 = vrot.lane.b32.xlu0 %v7766_v28, %s5640_s26  ;;  %v3385_v32 = vsel %vm1328_vm4, %v3353_v35, %v5425_v2  ;;  %v3979_v40 = vld [vmem:[%s8561_s7 + $0x18] sm:$0xff]  ;;  %v5430_v35 = vunpack.i.l.bf16 %v7922_v4  ;;  %s323_s26 = sand.u32 1, %s5630_s10  }
 0x306   : > { %3698 = vmatmul.bf16.gmra.mxu3 %v3428_v43  ;;  %v3429_v50 = vpack.c.bf16 %v3386_v23, %v3385_v32  ;;  %v5456_v43 = vunpack.i.h.bf16 %v5454_v10  ;;  %s4221_s22 = scalar_lea.sflag [#allocation4], %s323_s26 }
 0x307   : > { %3995 = vmatpush.msra.mxu3 %v3979_v40 }
 0x308   : > { %v3659_v15 = vpop.f32.mrf.mxu3  ;;  %3787 = vmatmul.bf16.gmra.mxu2 %v3429_v50  ;;  %v5434_v18 = vpop.permute.xlu1 %5433 }
 0x309   : > { %v5419_v37 = vpop.permute.xlu0 %5418  ;;  %v5436_v30 = vunpack.i.h.bf16 %v5434_v18  ;;  %v5435_v25 = vunpack.i.l.bf16 %v5434_v18  ;;  %v5459_v40 = vpop.permute.xlu2 %5458 }
 0x30a   : > { %v5421_v2 = vunpack.i.h.bf16 %v5419_v37  ;;  %v5420_v44 = vunpack.i.l.bf16 %v5419_v37 }
 0x30b   : > { %v3748_v28 = vpop.f32.mrf.mxu2  ;;  %v3324_v20 = vsel %vm1262_vm3, %v7651_v39, %v5436_v30  ;;  %v3323_v4 = vsel %vm1262_vm3, %v7649_v26, %v5435_v25 }
 0x30c   : > { %v7954_v56 = vadd.f32 %v3748_v28, %v3659_v15  ;;  %5538 = vrot.lane.b32.xlu2 %v5537_v61, %s5641_s27  ;;  %v3228_v46 = vsel %vm1262_vm3, %v2171_v24, %v5421_v2  ;;  %v3227_v21 = vsel %vm1262_vm3, %v2170_v8, %v5420_v44  ;;  %v7982_v25 = vpop.f32.mrf.mxu0  ;;  %s4302_s27 = sshll.u32 %s323_s26, 8 }
 0x30d   : > { %5528 = vrot.lane.b32.xlu0 %v5527_v17, %s5642_s28  ;;  %v3259_v37 = vsel %vm1295_vm2, %v3227_v21, %v5430_v35  ;;  %v3260_v61 = vsel %vm1295_vm2, %v3228_v46, %v5431_v49  ;;  %s8382_s28 = scalar_lea.vmem [#allocation3], %s4302_s27 }
 0x30e   : > { %s4233_s25 = sshll.u32 %s8382_s28, 4  ;;  %s4234_s25 = int_to_ptr.vmem [resolvable:$true] %s4233_s25 }
 0x310   : > { %v7962_v27 = vpop.f32.mrf.mxu3  ;;  %v5439_v23 = vpop.permute.xlu1 %5438 }
 0x311   : > { %v5444_v32 = vpop.permute.xlu0 %5443  ;;  %v5441_v42 = vunpack.i.h.bf16 %v5439_v23  ;;  %v5440_v50 = vunpack.i.l.bf16 %v5439_v23  ;;  %v5484_v23 = vpop.permute.xlu2 %5483 }
 0x312   : > { %v5446_v29 = vunpack.i.h.bf16 %v5444_v32  ;;  %v5445_v15 = vunpack.i.l.bf16 %v5444_v32 }
 0x313   : > { %v7968_v18 = vpop.f32.mrf.mxu2  ;;  %v3291_v10 = vsel %vm1328_vm4, %v3259_v37, %v5440_v50  ;;  %v3292_v28 = vsel %vm1328_vm4, %v3260_v61, %v5441_v42  ;;  %v2172_v42 = vld [vmem:[#allocation2 + $0x138] sm:$0xff]  ;;  %v2173_v50 = vld [vmem:[#allocation2 + $0x140] sm:$0xff]  ;;  %v5460_v37 = vunpack.i.l.bf16 %v5459_v40  ;;  %v5486_v61 = vunpack.i.h.bf16 %v5484_v23 }
 0x314   : > { %v3356_v17 = vsel %vm1295_vm2, %v3324_v20, %v5446_v29  ;;  %v3355_v2 = vsel %vm1295_vm2, %v3323_v4, %v5445_v15  ;;  %v3431_v39 = vpack.c.bf16 %v3292_v28, %v3291_v10  ;;  %v5461_v15 = vunpack.i.h.bf16 %v5459_v40 }
 0x315   : > { %v3388_v44 = vsel %vm1328_vm4, %v3356_v17, %v5456_v43  ;;  %v3387_v30 = vsel %vm1328_vm4, %v3355_v2, %v5455_v38  ;;  %v5485_v10 = vunpack.i.l.bf16 %v5484_v23 }
 0x316   : > { %3703 = vmatmul.bf16.gmra.mxu3 %v3431_v39  ;;  %v3432_v8 = vpack.c.bf16 %v3388_v44, %v3387_v30 }
 0x318   : > { %v7980_v24 = vpop.f32.mrf.mxu3  ;;  %3792 = vmatmul.bf16.gmra.mxu2 %v3432_v8  ;;  %v5464_v46 = vpop.permute.xlu1 %5463 }
 0x319   : > { %v5449_v26 = vpop.permute.xlu0 %5448  ;;  %v5466_v32 = vunpack.i.h.bf16 %v5464_v46  ;;  %v5465_v43 = vunpack.i.l.bf16 %v5464_v46 }
 0x31a   : > { %v5451_v49 = vunpack.i.h.bf16 %v5449_v26  ;;  %v5450_v35 = vunpack.i.l.bf16 %v5449_v26 }
 0x31b   : > { %v7984_v21 = vpop.f32.mrf.mxu2  ;;  %v3326_v44 = vsel %vm1262_vm3, %v7708_v3, %v5466_v32  ;;  %v3325_v40 = vsel %vm1262_vm3, %v7706_v51, %v5465_v43 }
 0x31c   : > { %v3230_v38 = vsel %vm1262_vm3, %v2173_v50, %v5451_v49  ;;  %v3229_v29 = vsel %vm1262_vm3, %v2172_v42, %v5450_v35  ;;  %v7996_v49 = vpop.f32.mrf.mxu0 }
 0x31d   : > { %v3261_v46 = vsel %vm1295_vm2, %v3229_v29, %v5460_v37  ;;  %v3262_v26 = vsel %vm1295_vm2, %v3230_v38, %v5461_v15 }
 0x320   : > { %v7988_v20 = vpop.f32.mrf.mxu3  ;;  %v5469_v4 = vpop.permute.xlu1 %5468 }
 0x321   : > { %v5474_v17 = vpop.permute.xlu0 %5473  ;;  %v5471_v28 = vunpack.i.h.bf16 %v5469_v4  ;;  %v5470_v2 = vunpack.i.l.bf16 %v5469_v4 }
 0x322   : > { %v5476_v39 = vunpack.i.h.bf16 %v5474_v17  ;;  %v5475_v30 = vunpack.i.l.bf16 %v5474_v17 }
 0x323   : > { %v7992_v8 = vpop.f32.mrf.mxu2  ;;  %v3293_v23 = vsel %vm1328_vm4, %v3261_v46, %v5470_v2  ;;  %v3294_v42 = vsel %vm1328_vm4, %v3262_v26, %v5471_v28 }
 0x324   : > { %v3358_v35 = vsel %vm1295_vm2, %v3326_v44, %v5476_v39  ;;  %v3357_v3 = vsel %vm1295_vm2, %v3325_v40, %v5475_v30  ;;  %v3434_v32 = vpack.c.bf16 %v3294_v42, %v3293_v23  ;;  %v8010_v28 = vpop.f32.mrf.mxu0  ;;  %v5489_v39 = vpop.permute.xlu2 %5488 }
 0x325   : > { %v3390_v50 = vsel %vm1328_vm4, %v3358_v35, %v5486_v61  ;;  %v3389_v29 = vsel %vm1328_vm4, %v3357_v3, %v5485_v10  ;;  %v5491_v30 = vunpack.i.h.bf16 %v5489_v39  ;;  %v5490_v46 = vunpack.i.l.bf16 %v5489_v39 }
 0x326   : > { %3708 = vmatmul.bf16.gmra.mxu3 %v3434_v32  ;;  %v3435_v38 = vpack.c.bf16 %v3390_v50, %v3389_v29 }
 0x328   : > { %v3669_v15 = vpop.f32.mrf.mxu3  ;;  %3797 = vmatmul.bf16.gmra.mxu2 %v3435_v38  ;;  %v8006_v37 = vpop.permute.xlu1 %5493 }
 0x329   : > { %v5479_v51 = vpop.permute.xlu0 %5478 }
 0x32a   : > { %v5481_v4 = vunpack.i.h.bf16 %v5479_v51  ;;  %v5480_v17 = vunpack.i.l.bf16 %v5479_v51 }
 0x32b   : > { %v3758_v43 = vpop.f32.mrf.mxu2 }
 0x32c   : > { %v8008_v2 = vadd.f32 %v3758_v43, %v3669_v15  ;;  %v3232_v61 = vsel %vm1262_vm3, %v7717_v33, %v5481_v4  ;;  %v3231_v10 = vsel %vm1262_vm3, %v7715_v48, %v5480_v17  ;;  %v8022_v48 = vpop.f32.mrf.mxu0 }
 0x32d   : > { %v3263_v42 = vsel %vm1295_vm2, %v3231_v10, %v5490_v46  ;;  %v3264_v3 = vsel %vm1295_vm2, %v3232_v61, %v5491_v30  ;;  %v3978_v61 = vld [vmem:[%s8561_s7 + $0x10] sm:$0xff] }
 0x32e   : > { %3996 = vmatpush.msra.mxu3 %v3978_v61 }
 0x330   : > { %v3671_v44 = vpop.f32.mrf.mxu3  ;;  %v5499_v26 = vpop.permute.xlu1 %5498 }
 0x331   : > { %v5501_v40 = vunpack.i.h.bf16 %v5499_v26  ;;  %v5500_v35 = vunpack.i.l.bf16 %v5499_v26 }
 0x333   : > { %v3760_v23 = vpop.f32.mrf.mxu2  ;;  %v3295_v50 = vsel %vm1328_vm4, %v3263_v42, %v5500_v35  ;;  %v3296_v33 = vsel %vm1328_vm4, %v3264_v3, %v5501_v40 }
 0x334   : > { %v8018_v32 = vadd.f32 %v3760_v23, %v3671_v44  ;;  %v3437_v29 = vpack.c.bf16 %v3296_v33, %v3295_v50  ;;  %v8026_v4 = vpop.f32.mrf.mxu0 }
 0x336   : > { %3713 = vmatmul.bf16.gmra.mxu3 %v3437_v29 }
 0x338   : > { %v3674_v38 = vpop.f32.mrf.mxu3 }
 0x33b   : > { %v3763_v15 = vpop.f32.mrf.mxu2 }
 0x33c   : > { %v8024_v51 = vadd.f32 %v3763_v15, %v3674_v38  ;;  %v8033_v30 = vpop.f32.mrf.mxu0 }
 0x340   : > { %v3676_v43 = vpop.f32.mrf.mxu3 }
 0x343   : > { %v3765_v17 = vpop.f32.mrf.mxu2 }
 0x344   : > { %v8028_v39 = vadd.f32 %v3765_v17, %v3676_v43  ;;  %v8039_v23 = vpop.f32.mrf.mxu0  ;;  %v2433_v43 = vld [vmem:[#allocation2 + $0x19a] sm:$0xff]  ;;  %v2434_v17 = vld [vmem:[#allocation2 + $0x1a2] sm:$0xff] }
 0x345   : > { %v3442_v61 = vpack.c.bf16 %v2434_v17, %v2433_v43 }
 0x347   : > { %4479 = vmatmul.msk.bf16.gmra.mxu0 %vm1262_vm3, %v3442_v61 }
 0x349   : > { %v3679_v10 = vpop.f32.mrf.mxu3 }
 0x34b   : > { %v3768_v44 = vpop.f32.mrf.mxu2 }
 0x34c   : > { %v8035_v46 = vadd.f32 %v3768_v44, %v3679_v10  ;;  %v8043_v33 = vpop.f32.mrf.mxu0 }
 0x34d   : > { %8798 = vst [vmem:[#allocation29_spill] sm:$0xff] %v8043_v33 }
 0x351   : > { %v3681_v26 = vpop.f32.mrf.mxu3 }
 0x353   : > { %v3770_v40 = vpop.f32.mrf.mxu2 }
 0x354   : > { %v8037_v35 = vadd.f32 %v3770_v40, %v3681_v26  ;;  %v8048_v10 = vpop.f32.mrf.mxu0 }
 0x355   : > { %8800 = vst [vmem:[#allocation39_spill] sm:$0xff] %v8048_v10 }
 0x356   : > { %v5514_v26 = vpop.permute.xlu2 %5513 }
 0x357   : > { %v5516_v61 = vunpack.i.h.bf16 %v5514_v26  ;;  %v5515_v7 = vunpack.i.l.bf16 %v5514_v26 }
 0x359   : > { %v3684_v42 = vpop.f32.mrf.mxu3 }
 0x35b   : > { %v3773_v3 = vpop.f32.mrf.mxu2 }
 0x35c   : > { %v8041_v50 = vadd.f32 %v3773_v3, %v3684_v42  ;;  %v5496_v42 = vunpack.i.h.bf16 %v8006_v37  ;;  %v5495_v3 = vunpack.i.l.bf16 %v8006_v37  ;;  %v8060_v14 = vpop.f32.mrf.mxu0 }
 0x35d   : > { %8802 = vst [vmem:[#allocation45_spill] sm:$0xff] %v8060_v14 }
 0x35e   : > { %v3328_v43 = vsel %vm1262_vm3, %v7762_v31, %v5496_v42  ;;  %v3327_v17 = vsel %vm1262_vm3, %v7760_v13, %v5495_v3  ;;  %v5519_v36 = vpop.permute.xlu2 %5518 }
 0x361   : > { %v3686_v29 = vpop.f32.mrf.mxu3 }
 0x363   : > { %v3775_v38 = vpop.f32.mrf.mxu2 }
 0x364   : > { %v8045_v15 = vadd.f32 %v3775_v38, %v3686_v29 }
 0x366   : > { %8799 = vst [vmem:[#allocation26_spill] sm:$0xff] %v8045_v15 }
 0x369   : > { %v3689_v44 = vpop.f32.mrf.mxu3 }
 0x36b   : > { %v3778_v40 = vpop.f32.mrf.mxu2 }
 0x36c   : > { %v8050_v9 = vadd.f32 %v3778_v40, %v3689_v44 }
 0x36d   : > { %v5524_v6 = vpop.permute.xlu1 %5523 }
 0x36e   : > { %8801 = vst [vmem:[#allocation33_spill] sm:$0xff] %v8050_v9  ;;  %v5521_v9 = vunpack.i.h.bf16 %v5519_v36 }
 0x36f   : > { %v5504_v0 = vpop.permute.xlu0 %5503 }
 0x370   : > { %v5506_v29 = vunpack.i.h.bf16 %v5504_v0  ;;  %v5505_v38 = vunpack.i.l.bf16 %v5504_v0 }
 0x371   : > { %v3691_v59 = vpop.f32.mrf.mxu3 }
 0x372   : > { %v3360_v44 = vsel %vm1295_vm2, %v3328_v43, %v5506_v29  ;;  %v3359_v40 = vsel %vm1295_vm2, %v3327_v17, %v5505_v38  ;;  %v5520_v29 = vunpack.i.l.bf16 %v5519_v36  ;;  %v2176_v43 = vld [vmem:[#allocation2 + $0x168] sm:$0xff]  ;;  %v2177_v38 = vld [vmem:[#allocation2 + $0x170] sm:$0xff]  ;;  %v5539_v36 = vpop.permute.xlu2 %5538 }
 0x373   : > { %v3780_v37 = vpop.f32.mrf.mxu2  ;;  %v3391_v58 = vsel %vm1328_vm4, %v3359_v40, %v5515_v7  ;;  %v3392_v0 = vsel %vm1328_vm4, %v3360_v44, %v5516_v61 }
 0x374   : > { %v8064_v10 = vadd.f32 %v3780_v37, %v3691_v59  ;;  %v3438_v31 = vpack.c.bf16 %v3392_v0, %v3391_v58 }
 0x375   : > { %v5534_v13 = vpop.permute.xlu1 %5533 }
 0x376   : > { %8803 = vst [vmem:[#allocation68_spill] sm:$0xff] %v8064_v10  ;;  %3802 = vmatmul.bf16.gmra.mxu2 %v3438_v31  ;;  %v5536_v14 = vunpack.i.h.bf16 %v5534_v13  ;;  %v5535_v33 = vunpack.i.l.bf16 %v5534_v13  ;;  %v3872_v31 = vpop.f32.mrf.mxu0  ;;  %v5525_v10 = vunpack.i.l.bf16 %v5524_v6 }
 0x377   : > { %v5509_v42 = vpop.permute.xlu0 %5508 }
 0x378   : > { %v5511_v26 = vunpack.i.h.bf16 %v5509_v42  ;;  %v5510_v3 = vunpack.i.l.bf16 %v5509_v42  ;;  %v5526_v42 = vunpack.i.h.bf16 %v5524_v6 }
 0x379   : > { %v3694_v17 = vpop.f32.mrf.mxu3 }
 0x37a   : > { %v3234_v7 = vsel %vm1262_vm3, %v2177_v38, %v5511_v26  ;;  %v3233_v61 = vsel %vm1262_vm3, %v2176_v43, %v5510_v3  ;;  %v5541_v3 = vunpack.i.h.bf16 %v5539_v36  ;;  %v5540_v43 = vunpack.i.l.bf16 %v5539_v36 }
 0x37b   : > { %v3783_v44 = vpop.f32.mrf.mxu2  ;;  %v3265_v59 = vsel %vm1295_vm2, %v3233_v61, %v5520_v29  ;;  %v3266_v58 = vsel %vm1295_vm2, %v3234_v7, %v5521_v9  ;;  %v3330_v9 = vsel %vm1262_vm3, %v7908_v63, %v5526_v42  ;;  %v3976_v63 = vld [vmem:[%s8561_s7] sm:$0xff] }
 0x37c   : > { %v3784_v40 = vadd.f32 %v3783_v44, %v3694_v17  ;;  %v3297_v37 = vsel %vm1328_vm4, %v3265_v59, %v5535_v33  ;;  %v3298_v0 = vsel %vm1328_vm4, %v3266_v58, %v5536_v14  ;;  %v3329_v33 = vsel %vm1262_vm3, %v7910_v1, %v5525_v10 }
 0x37d   : > { %v3440_v15 = vpack.c.bf16 %v3298_v0, %v3297_v37 }
 0x37e   : > { %v8072_v13 = vadd.f32 %v3872_v31, %v3784_v40  ;;  %v8090_v10 = vpop.f32.mrf.mxu0 }
 0x37f   : > { %v5529_v26 = vpop.permute.xlu0 %5528  ;;  %3718 = vmatmul.bf16.gmra.mxu3 %v3440_v15  ;;  %v3977_v15 = vld [vmem:[%s8561_s7 + $0x8] sm:$0xff] }
 0x380   : > { %v5531_v38 = vunpack.i.h.bf16 %v5529_v26  ;;  %v5530_v29 = vunpack.i.l.bf16 %v5529_v26  ;;  %3997 = vmatpush.msra.mxu3 %v3977_v15 }
 0x381   : > { %v8088_v1 = vpop.f32.mrf.mxu3 }
 0x382   : > { %v3362_v14 = vsel %vm1295_vm2, %v3330_v9, %v5531_v38  ;;  %v3361_v17 = vsel %vm1295_vm2, %v3329_v33, %v5530_v29  ;;  %3998 = vmatpush.msra.mxu3 %v3976_v63  ;;  %v8122_v38 = vadd.f32 %v7748_v47, %v7885_v19  ;;  %v8130_v33 = vadd.f32 %v7768_v45, %v7901_v57 }
 0x383   : > { %v3393_v6 = vsel %vm1328_vm4, %v3361_v17, %v5540_v43  ;;  %v3394_v7 = vsel %vm1328_vm4, %v3362_v14, %v5541_v3  ;;  %v8092_v44 = vpop.f32.mrf.mxu2  ;;  %v8114_v3 = vadd.f32 %v7703_v41, %v7865_v54  ;;  %v8118_v43 = vadd.f32 %v7660_v22, %v7846_v11 }
 0x384   : > { %v3441_v61 = vpack.c.bf16 %v3394_v7, %v3393_v6  ;;  %v3746_v41 = vadd.f32 %v7932_v55, %v7926_v52  ;;  %v3905_v11 = vsel %vm1262_vm3, %v8122_v38, 0.0  ;;  %v8140_v47 = vadd.f32 %v7848_v53, %v7917_v60 }
 0x385   : > { %v3903_v9 = vsel %vm1262_vm3, %v8114_v3, 0.0  ;;  %v3902_v22 = vsel %vm1262_vm3, %v8118_v43, 0.0  ;;  %v3907_v45 = vsel %vm1262_vm3, %v8130_v33, 0.0  ;;  %v3751_v52 = vadd.f32 %v7968_v18, %v7962_v27 }
 0x386   : > { %3807 = vmatmul.bf16.gmra.mxu2 %v3441_v61  ;;  %v8096_v58 = vpop.f32.mrf.mxu0  ;;  %v3904_v54 = vadd.f32 %v3903_v9, %v3902_v22  ;;  %v8147_v57 = vadd.f32 %v7879_v34, %v3746_v41  ;;  %v3909_v17 = vsel %vm1262_vm3, %v8140_v47, 0.0  ;;  %v8157_v53 = vadd.f32 %v7894_v12, %v7954_v56 }
 0x387   : > { %v3754_v60 = vadd.f32 %v7984_v21, %v7980_v24  ;;  %v8164_v7 = vadd.f32 %v7915_v62, %v3751_v52  ;;  %v3756_v27 = vadd.f32 %v7992_v8, %v7988_v20  ;;  %v8186_v8 = vadd.f32 %v7982_v25, %v8008_v2 }
 0x388   : > { %v3906_v55 = vadd.f32 %v3905_v11, %v3904_v54  ;;  %v3911_v34 = vsel %vm1262_vm3, %v8147_v57, 0.0  ;;  %v3913_v12 = vsel %vm1262_vm3, %v8157_v53, 0.0  ;;  %v8192_v22 = vadd.f32 %v7996_v49, %v8018_v32 }
 0x389   : > { %v8094_v59 = vpop.f32.mrf.mxu3  ;;  %v8173_v56 = vadd.f32 %v7946_v5, %v3754_v60  ;;  %v3915_v21 = vsel %vm1262_vm3, %v8164_v7, 0.0  ;;  %v8178_v15 = vadd.f32 %v7958_v16, %v3756_v27  ;;  %v3921_v11 = vsel %vm1262_vm3, %v8186_v8, 0.0  ;;  %v8804_v27 = vld [vmem:[#allocation26_spill] sm:$0xff] }
 0x38a   : > { %v3908_v6 = vadd.f32 %v3907_v45, %v3906_v55  ;;  %v8198_v54 = vadd.f32 %v8010_v28, %v8024_v51  ;;  %v3923_v2 = vsel %vm1262_vm3, %v8192_v22, 0.0  ;;  %v8204_v52 = vadd.f32 %v8022_v48, %v8028_v39 }
 0x38b   : > { %v8098_v40 = vpop.f32.mrf.mxu2  ;;  %v3917_v20 = vsel %vm1262_vm3, %v8173_v56, 0.0  ;;  %v3919_v41 = vsel %vm1262_vm3, %v8178_v15, 0.0  ;;  %v8210_v32 = vadd.f32 %v8026_v4, %v8035_v46  ;;  %v8216_v60 = vadd.f32 %v8033_v30, %v8037_v35 }
 0x38c   : > { %v3910_v18 = vadd.f32 %v3909_v17, %v3908_v6  ;;  %v3925_v49 = vsel %vm1262_vm3, %v8198_v54, 0.0  ;;  %v3927_v51 = vsel %vm1262_vm3, %v8204_v52, 0.0 }
 0x38d   : > { %v3929_v39 = vsel %vm1262_vm3, %v8210_v32, 0.0  ;;  %v3931_v46 = vsel %vm1262_vm3, %v8216_v60, 0.0 }
 0x38e   : > { %v8102_v0 = vpop.f32.mrf.mxu0  ;;  %v3912_v24 = vadd.f32 %v3911_v34, %v3910_v18  ;;  %v8222_v34 = vadd.f32 %v8039_v23, %v8041_v50  ;;  %v8805_v18 = vld [vmem:[#allocation29_spill] sm:$0xff] }
 0x390   : > { %v3914_v62 = vadd.f32 %v3913_v12, %v3912_v24  ;;  %v8228_v12 = vadd.f32 %v8805_v18, %v8804_v27  ;;  %v3933_v35 = vsel %vm1262_vm3, %v8222_v34, 0.0 }
 0x391   : > { %v8100_v37 = vpop.f32.mrf.mxu3 }
 0x392   : > { %v3916_v9 = vadd.f32 %v3915_v21, %v3914_v62  ;;  %v8806_v21 = vld [vmem:[#allocation33_spill] sm:$0xff]  ;;  %v8807_v62 = vld [vmem:[#allocation39_spill] sm:$0xff]  ;;  %v3935_v50 = vsel %vm1262_vm3, %v8228_v12, 0.0 }
 0x393   : > { %v8104_v36 = vpop.f32.mrf.mxu2 }
 0x394   : > { %v3918_v16 = vadd.f32 %v3917_v20, %v3916_v9  ;;  %v8234_v20 = vadd.f32 %v8807_v62, %v8806_v21 }
 0x396   : > { %v8108_v42 = vpop.f32.mrf.mxu0  ;;  %v3920_v45 = vadd.f32 %v3919_v41, %v3918_v16  ;;  %v8808_v41 = vld [vmem:[#allocation68_spill] sm:$0xff]  ;;  %v8809_v16 = vld [vmem:[#allocation45_spill] sm:$0xff] }
 0x398   : > { %v3922_v55 = vadd.f32 %v3921_v11, %v3920_v45  ;;  %v8240_v11 = vadd.f32 %v8809_v16, %v8808_v41  ;;  %v3786_v45 = vadd.f32 %v8092_v44, %v8088_v1  ;;  %v3941_v1 = vsel %vm1262_vm3, %v8072_v13, 0.0 }
 0x399   : > { %v8106_v31 = vpop.f32.mrf.mxu3 }
 0x39a   : > { %v3924_v17 = vadd.f32 %v3923_v2, %v3922_v55 }
 0x39b   : > { %v8110_v26 = vpop.f32.mrf.mxu2 }
 0x39c   : > { %v3926_v6 = vadd.f32 %v3925_v49, %v3924_v17  ;;  %v3937_v49 = vsel %vm1262_vm3, %v8234_v20, 0.0  ;;  %v3789_v17 = vadd.f32 %v8098_v40, %v8094_v59  ;;  %v3794_v59 = vadd.f32 %v8110_v26, %v8106_v31 }
 0x39e   : > { %v8142_v19 = vpop.f32.mrf.mxu0  ;;  %v3928_v4 = vadd.f32 %v3927_v51, %v3926_v6  ;;  %v3939_v6 = vsel %vm1262_vm3, %v8240_v11, 0.0  ;;  %v8258_v44 = vadd.f32 %v8096_v58, %v3789_v17  ;;  %v8272_v21 = vadd.f32 %v8108_v42, %v3794_v59 }
 0x3a0   : > { %v3930_v24 = vadd.f32 %v3929_v39, %v3928_v4  ;;  %v8251_v39 = vadd.f32 %v8090_v10, %v3786_v45  ;;  %v3791_v4 = vadd.f32 %v8104_v36, %v8100_v37  ;;  %v3945_v58 = vsel %vm1262_vm3, %v8258_v44, 0.0 }
 0x3a1   : > { %v8124_v29 = vpop.f32.mrf.mxu3 }
 0x3a2   : > { %v3932_v9 = vadd.f32 %v3931_v46, %v3930_v24  ;;  %v3943_v18 = vsel %vm1262_vm3, %v8251_v39, 0.0  ;;  %v8265_v10 = vadd.f32 %v8102_v0, %v3791_v4 }
 0x3a3   : > { %v8151_v14 = vpop.f32.mrf.mxu2 }
 0x3a4   : > { %v3934_v2 = vadd.f32 %v3933_v35, %v3932_v9  ;;  %v3796_v37 = vadd.f32 %v8151_v14, %v8124_v29  ;;  %v3947_v62 = vsel %vm1262_vm3, %v8265_v10, 0.0  ;;  %v3949_v14 = vsel %vm1262_vm3, %v8272_v21, 0.0 }
 0x3a6   : > { %v8180_v63 = vpop.f32.mrf.mxu0  ;;  %v3936_v51 = vadd.f32 %v3935_v50, %v3934_v2  ;;  %v8278_v0 = vadd.f32 %v8142_v19, %v3796_v37 }
 0x3a8   : > { %v3938_v46 = vadd.f32 %v3937_v49, %v3936_v51 }
 0x3a9   : > { %v8168_v61 = vpop.f32.mrf.mxu3 }
 0x3aa   : > { %v3940_v40 = vadd.f32 %v3939_v6, %v3938_v46 }
 0x3ab   : > { %v3798_v5 = vpop.f32.mrf.mxu2 }
 0x3ac   : > { %v3942_v36 = vadd.f32 %v3941_v1, %v3940_v40  ;;  %v3799_v31 = vadd.f32 %v3798_v5, %v8168_v61  ;;  %v3951_v61 = vsel %vm1262_vm3, %v8278_v0, 0.0 }
 0x3ae   : > { %v3889_v28 = vpop.f32.mrf.mxu0  ;;  %v3944_v26 = vadd.f32 %v3943_v18, %v3942_v36  ;;  %v8283_v50 = vadd.f32 %v8180_v63, %v3799_v31 }
 0x3b0   : > { %v3946_v29 = vadd.f32 %v3945_v58, %v3944_v26 }
 0x3b1   : > { %v3711_v25 = vpop.f32.mrf.mxu3 }
 0x3b2   : > { %v3948_v42 = vadd.f32 %v3947_v62, %v3946_v29 }
 0x3b3   : > { %v3800_v48 = vpop.f32.mrf.mxu2 }
 0x3b4   : > { %v3801_v9 = vadd.f32 %v3800_v48, %v3711_v25  ;;  %v3950_v2 = vadd.f32 %v3949_v14, %v3948_v42  ;;  %v3953_v25 = vsel %vm1262_vm3, %v8283_v50, 0.0  ;;  %v3972_v42 = vld [vmem:[%s8559_s5] sm:$0x1] }
 0x3b6   : > { %v3892_v23 = vpop.f32.mrf.mxu0  ;;  %v8287_v5 = vadd.f32 %v3889_v28, %v3801_v9  ;;  %v3952_v63 = vadd.f32 %v3951_v61, %v3950_v2  ;;  %v3974_v61 = vld [vmem:[%s8560_s6] sm:$0x1] }
 0x3b8   : > { %v3955_v28 = vsel %vm1262_vm3, %v8287_v5, 0.0  ;;  %v3954_v51 = vadd.f32 %v3953_v25, %v3952_v63 }
 0x3b9   : > { %v3714_v30 = vpop.f32.mrf.mxu3 }
 0x3be   : > { %v3894_v24 = vpop.f32.mrf.mxu0 }
 0x3c1   : > { %v3716_v27 = vpop.f32.mrf.mxu3 }
 0x3c6   : > { %v3897_v19 = vpop.f32.mrf.mxu0 }
 0x3ce   : > { %v3899_v36 = vpop.f32.mrf.mxu0 }
 0x3f9   : > { %v3803_v55 = vpop.f32.mrf.mxu2 }
 0x3fa   : > { %v3804_v41 = vadd.f32 %v3803_v55, %v3714_v30  ;;  %v4004_v30 = vld [vmem:[%s8562_s8] sm:$0x3] }
 0x3fb   : > { %4481 = vmatpush.msk.msrb.mxu3 %vm4009_vm7, %v4004_v30 }
 0x3fc   : > { %v8291_v48 = vadd.f32 %v3892_v23, %v3804_v41  ;;  %v3956_v23 = vadd.f32 %v3955_v28, %v3954_v51 }
 0x3fe   : > { %v3957_v6 = vsel %vm1262_vm3, %v8291_v48, 0.0 }
 0x3ff   : > { %v3958_v1 = vadd.f32 %v3957_v6, %v3956_v23 }
 0x401   : > { %v3805_v35 = vpop.f32.mrf.mxu2 }
 0x402   : > { %v3719_v16 = vpop.f32.mrf.mxu3  ;;  %v3806_v45 = vadd.f32 %v3805_v35, %v3716_v27 }
 0x404   : > { %v8298_v55 = vadd.f32 %v3894_v24, %v3806_v45 }
 0x406   : > { %v3959_v46 = vsel %vm1262_vm3, %v8298_v55, 0.0 }
 0x407   : > { %v3960_v37 = vadd.f32 %v3959_v46, %v3958_v1 }
 0x409   : > { %v3808_v49 = vpop.f32.mrf.mxu2 }
 0x40a   : > { %v3809_v17 = vadd.f32 %v3808_v49, %v3719_v16  ;;  %v3721_v59 = vpop.f32.mrf.mxu3 }
 0x40c   : > { %v8302_v4 = vadd.f32 %v3897_v19, %v3809_v17 }
 0x40e   : > { %v3961_v27 = vsel %vm1262_vm3, %v8302_v4, 0.0 }
 0x40f   : > { %v3962_v35 = vadd.f32 %v3961_v27, %v3960_v37 }
 0x411   : > { %v3810_v40 = vpop.f32.mrf.mxu2 }
 0x412   : > { %v3811_v18 = vadd.f32 %v3810_v40, %v3721_v59 }
 0x414   : > { %v8308_v24 = vadd.f32 %v3899_v36, %v3811_v18 }
 0x416   : > { %v3963_v58 = vsel %vm1262_vm3, %v8308_v24, 0.0 }
 0x417   : > { %v3964_v31 = vadd.f32 %v3963_v58, %v3962_v35 }
 0x419   : > { %v3965_v26 = vrot.slane %v3964_v31, 4 }
 0x41b   : > { %v3966_v62 = vadd.f32 %v3965_v26, %v3964_v31 }
 0x41d   : > { %v3967_v9 = vrot.slane %v3966_v62, 2 }
 0x41f   : > { %v3968_v29 = vadd.f32 %v3967_v9, %v3966_v62 }
 0x421   : > { %v3969_v14 = vrot.slane %v3968_v29, 1 }
 0x423   : > { %v3970_v41 = vadd.f32 %v3969_v14, %v3968_v29 }
 0x425   : > { %v3971_v16 = vmul.f32 0.00390625, %v3970_v41 }
 0x427   : > { %v3973_v45 = vmul.f32 %v3972_v42, %v3971_v16 }
 0x429   : > { %v3975_v2 = vadd.f32 %v3974_v61, %v3973_v45 }
 0x42b   : > { %4480 = vmatmul.msk.f32.vlgmr.msra.gmra.mxu3 %vm1262_vm3, %v3975_v2 }
 0x4ae   : > { %v4000_v19 = vpop.f32.mrf.mxu3 }
 0x4af   : > { %v4003_v49 = vmax.f32 %v4000_v19, 0.0  ;;  %v8811_v19 = vld [vmem:[#allocation15_spill] sm:$0xff] }
 0x4b1   : > { %4482 = vmatmul.msk.f32.vlgmr.msrb.gmra.mxu3 %vm4005_vm8, %v4003_v49 }
 0x534   : > { %v4030_v25 = vpop.f32.mrf.mxu3 }
 0x535   : > { %v4483_v17 = vmul.f32 -1.442695, %v4030_v25  ;;  %v8812_v25 = vld [vmem:[#allocation8_spill] sm:$0xff] }
 0x537   : > { %5544 = vpow2.f32 %v4483_v17 }
 0x53d   : > { %v5545_v63 = vpop.eup %5544 }
 0x53e   : > { %v4036_v30 = vadd.f32 1.0, %v5545_v63  ;;  %v8813_v63 = vld [vmem:[#allocation9_spill] sm:$0xff] }
 0x540   : > { %5546 = vrcp.f32 %v4036_v30  ;;  %v4048_v1 = vand.u32 2147483648, %v4036_v30  ;;  %vm4042_vm10 = vweird.f32 %v4036_v30  ;;  %v4046_v59 = vand.u32 2147483647, %v4036_v30 }
 0x542   : > { %v4049_v27 = vor.u32 1.1754944e-38, %v4048_v1  ;;  %vm4047_vm12 = vcmp.eq.f32.partialorder %v4046_v59, 8.507059e+37  ;;  %v8815_v59 = vld [vmem:[#allocation13_spill] sm:$0xff] }
 0x546   : > { %v5547_v28 = vpop.eup %5546 }
 0x547   : > { %v4038_v51 = vmul.f32 %v5547_v28, %v4036_v30  ;;  %vm4043_vm9 = vweird.f32 %v5547_v28 }
 0x548   : > { %vm4044_vm11 = vmor %vm4042_vm10, %vm4043_vm9 }
 0x549   : > { %v4039_v6 = vsub.f32 1.0, %v4038_v51 }
 0x54b   : > { %v4040_v23 = vmul.f32 %v5547_v28, %v4039_v6  ;;  %v8814_v6 = vld [vmem:[#allocation12_spill] sm:$0xff] }
 0x54d   : > { %v4041_v46 = vadd.f32 %v5547_v28, %v4040_v23 }
 0x54f   : > { %v4045_v40 = vsel %vm4044_vm11, %v5547_v28, %v4041_v46 }
 0x550   : > { %v4050_v18 = vsel %vm4047_vm12, %v4049_v27, %v4045_v40  ;;  %v8816_v27 = vld [vmem:[#allocation6_spill] sm:$0xff] }
 0x551   : > { %v4052_v37 = vmul.f32 %v4050_v18, %v3972_v42  ;;  %v4053_v35 = vmul.f32 %v4050_v18, %v3974_v61 }
 0x553   : > { %v8319_v36 = vperm.slane %v4052_v37, 0  ;;  %v8329_v9 = vperm.slane %v4053_v35, 0 }
 0x555   : > { %v4057_v58 = vmul.f32 %v8319_v36, %v8118_v43  ;;  %v4058_v31 = vmul.f32 %v8319_v36, %v8114_v3  ;;  %v4059_v26 = vmul.f32 %v8319_v36, %v8122_v38  ;;  %v4060_v62 = vmul.f32 %v8319_v36, %v8130_v33 }
 0x556   : > { %v4061_v29 = vmul.f32 %v8319_v36, %v8140_v47  ;;  %v4062_v14 = vmul.f32 %v8319_v36, %v8147_v57  ;;  %v4063_v43 = vmul.f32 %v8319_v36, %v8157_v53  ;;  %v4064_v33 = vmul.f32 %v8319_v36, %v8164_v7  ;;  %v8810_v7 = vld [vmem:[#allocation14_spill] sm:$0xff] }
 0x557   : > { %v4092_v3 = vadd.f32 %v8329_v9, %v4057_v58  ;;  %v4093_v41 = vadd.f32 %v8329_v9, %v4058_v31  ;;  %v4094_v38 = vadd.f32 %v8329_v9, %v4059_v26  ;;  %v4095_v42 = vadd.f32 %v8329_v9, %v4060_v62  ;;  %v8817_v31 = vld [vmem:[#allocation7_spill] sm:$0xff] }
 0x558   : > { %v4065_v47 = vmul.f32 %v8319_v36, %v8173_v56  ;;  %v4096_v57 = vadd.f32 %v8329_v9, %v4061_v29  ;;  %v4066_v53 = vmul.f32 %v8319_v36, %v8178_v15  ;;  %v4067_v16 = vmul.f32 %v8319_v36, %v8186_v8 }
 0x559   : > { %v4097_v61 = vadd.f32 %v8329_v9, %v4062_v14  ;;  %v4098_v45 = vadd.f32 %v8329_v9, %v4063_v43  ;;  %v4124_v2 = vadd.f32 %v4092_v3, %v8810_v7  ;;  %v4125_v49 = vadd.f32 %v4093_v41, %v8811_v19  ;;  %v8818_v14 = vld [vmem:[#allocation10_spill] sm:$0xff] }
 0x55a   : > { %v4126_v56 = vadd.f32 %v4094_v38, %v8812_v25  ;;  %v4068_v17 = vmul.f32 %v8319_v36, %v8192_v22  ;;  %v4099_v15 = vadd.f32 %v8329_v9, %v4064_v33  ;;  %v4127_v30 = vadd.f32 %v4095_v42, %v8813_v63  ;;  %v8819_v38 = vld [vmem:[#allocation11_spill] sm:$0xff] }
 0x55b   : > { %v4069_v8 = vmul.f32 %v8319_v36, %v8198_v54  ;;  %v4070_v28 = vmul.f32 %v8319_v36, %v8204_v52  ;;  %v4100_v51 = vadd.f32 %v8329_v9, %v4065_v47  ;;  %v4128_v23 = vadd.f32 %v4096_v57, %v8814_v6  ;;  %v8820_v57 = vld [vmem:[#allocation20_spill] sm:$0xff] }
 0x55c   : > { %v4071_v46 = vmul.f32 %v8319_v36, %v8210_v32  ;;  %v4101_v1 = vadd.f32 %v8329_v9, %v4066_v53  ;;  %v4102_v22 = vadd.f32 %v8329_v9, %v4067_v16  ;;  %v4129_v40 = vadd.f32 %v4097_v61, %v8815_v59 }
 0x55d   : > { %v4130_v18 = vadd.f32 %v4098_v45, %v8816_v27  ;;  %v4156_v37 = vmax.f32 %v4124_v2, 0.0  ;;  %v4157_v54 = vmax.f32 %v4125_v49, 0.0  ;;  %v4158_v35 = vmax.f32 %v4126_v56, 0.0  ;;  %v8821_v45 = vld [vmem:[#allocation21_spill] sm:$0xff]  ;;  %v8822_v49 = vld [vmem:[#allocation18_spill] sm:$0xff] }
 0x55e   : > { %v4072_v52 = vmul.f32 %v8319_v36, %v8216_v60  ;;  %v4103_v58 = vadd.f32 %v8329_v9, %v4068_v17  ;;  %v4131_v26 = vadd.f32 %v4099_v15, %v8817_v31  ;;  %v4159_v62 = vmax.f32 %v4127_v30, 0.0  ;;  %v8823_v15 = vld [vmem:[#allocation19_spill] sm:$0xff]  ;;  %v8828_v31 = vld [vmem:[#allocation30_spill] sm:$0xff] }
 0x55f   : > { %v4073_v32 = vmul.f32 %v8319_v36, %v8222_v34  ;;  %v4104_v29 = vadd.f32 %v8329_v9, %v4069_v8  ;;  %v4132_v43 = vadd.f32 %v4100_v51, %v8818_v14  ;;  %v4160_v3 = vmax.f32 %v4128_v23, 0.0  ;;  %4188 = vst.msk [vmem:[%s8382_s28] sm:$0xff] %vm1262_vm3, %v4156_v37 }
 0x560   : > { %v4074_v60 = vmul.f32 %v8319_v36, %v8228_v12  ;;  %v4105_v41 = vadd.f32 %v8329_v9, %v4070_v28  ;;  %v4133_v34 = vadd.f32 %v4101_v1, %v8819_v38  ;;  %v4161_v33 = vmax.f32 %v4129_v40, 0.0  ;;  %4189 = vst.msk [vmem:[%s8382_s28 + $0x8] sm:$0xff] %vm1262_vm3, %v4157_v54  ;;  %v8824_v28 = vld [vmem:[#allocation16_spill] sm:$0xff]  ;;  %v8827_v54 = vld [vmem:[#allocation25_spill] sm:$0xff] }
 0x561   : > { %v4075_v42 = vmul.f32 %v8319_v36, %v8234_v20  ;;  %v4106_v47 = vadd.f32 %v8329_v9, %v4071_v46  ;;  %v4134_v53 = vadd.f32 %v4102_v22, %v8820_v57  ;;  %v4162_v16 = vmax.f32 %v4130_v18, 0.0  ;;  %4190 = vst.msk [vmem:[%s8382_s28 + $0x10] sm:$0xff] %vm1262_vm3, %v4158_v35  ;;  %v8825_v46 = vld [vmem:[#allocation17_spill] sm:$0xff]  ;;  %v8826_v40 = vld [vmem:[#allocation24_spill] sm:$0xff] }
 0x562   : > { %v4076_v12 = vmul.f32 %v8319_v36, %v8240_v11  ;;  %v4107_v61 = vadd.f32 %v8329_v9, %v4072_v52  ;;  %v4135_v7 = vadd.f32 %v4103_v58, %v8821_v45  ;;  %v4163_v2 = vmax.f32 %v4131_v26, 0.0  ;;  %4191 = vst.msk [vmem:[%s8382_s28 + $0x18] sm:$0xff] %vm1262_vm3, %v4159_v62  ;;  %v8833_v45 = vld [vmem:[#allocation41_spill] sm:$0xff] }
 0x563   : > { %v4077_v20 = vmul.f32 %v8319_v36, %v8072_v13  ;;  %v4108_v19 = vadd.f32 %v8329_v9, %v4073_v32  ;;  %v4136_v25 = vadd.f32 %v4104_v29, %v8822_v49  ;;  %v4164_v56 = vmax.f32 %v4132_v43, 0.0  ;;  %4192 = vst.msk [vmem:[%s8382_s28 + $0x20] sm:$0xff] %vm1262_vm3, %v4160_v3  ;;  %v8829_v29 = vld [vmem:[#allocation31_spill] sm:$0xff] }
 0x564   : > { %v4078_v11 = vmul.f32 %v8319_v36, %v8251_v39  ;;  %v4109_v17 = vadd.f32 %v8329_v9, %v4074_v60  ;;  %v4137_v63 = vadd.f32 %v4105_v41, %v8823_v15  ;;  %v4165_v30 = vmax.f32 %v4133_v34, 0.0  ;;  %4193 = vst.msk [vmem:[%s8382_s28 + $0x28] sm:$0xff] %vm1262_vm3, %v4161_v33  ;;  %v8830_v60 = vld [vmem:[#allocation34_spill] sm:$0xff]  ;;  %v8831_v33 = vld [vmem:[#allocation35_spill] sm:$0xff] }
 0x565   : > { %v4079_v13 = vmul.f32 %v8319_v36, %v8258_v44  ;;  %v4110_v8 = vadd.f32 %v8329_v9, %v4075_v42  ;;  %v4138_v51 = vadd.f32 %v4106_v47, %v8824_v28  ;;  %v4166_v6 = vmax.f32 %v4134_v53, 0.0  ;;  %4194 = vst.msk [vmem:[%s8382_s28 + $0x30] sm:$0xff] %vm1262_vm3, %v4162_v16  ;;  %v8832_v53 = vld [vmem:[#allocation40_spill] sm:$0xff] }
 0x566   : > { %v4080_v39 = vmul.f32 %v8319_v36, %v8265_v10  ;;  %v4111_v23 = vadd.f32 %v8329_v9, %v4076_v12  ;;  %v4139_v1 = vadd.f32 %v4107_v61, %v8825_v46  ;;  %v4167_v22 = vmax.f32 %v4135_v7, 0.0  ;;  %4195 = vst.msk [vmem:[%s8382_s28 + $0x38] sm:$0xff] %vm1262_vm3, %v4163_v2 }
 0x567   : > { %v4081_v44 = vmul.f32 %v8319_v36, %v8272_v21  ;;  %v4112_v59 = vadd.f32 %v8329_v9, %v4077_v20  ;;  %v4140_v27 = vadd.f32 %v4108_v19, %v8826_v40  ;;  %v4168_v18 = vmax.f32 %v4136_v25, 0.0  ;;  %4196 = vst.msk [vmem:[%s8382_s28 + $0x40] sm:$0xff] %vm1262_vm3, %v4164_v56  ;;  %v8834_v20 = vld [vmem:[#allocation46_spill] sm:$0xff] }
 0x568   : > { %v4082_v10 = vmul.f32 %v8319_v36, %v8278_v0  ;;  %v4113_v37 = vadd.f32 %v8329_v9, %v4078_v11  ;;  %v4141_v35 = vadd.f32 %v4109_v17, %v8827_v54  ;;  %v4169_v52 = vmax.f32 %v4137_v63, 0.0  ;;  %4197 = vst.msk [vmem:[%s8382_s28 + $0x48] sm:$0xff] %vm1262_vm3, %v4165_v30  ;;  %v8836_v17 = vld [vmem:[#allocation52_spill] sm:$0xff] }
 0x569   : > { %v4083_v21 = vmul.f32 %v8319_v36, %v8283_v50  ;;  %v4114_v58 = vadd.f32 %v8329_v9, %v4079_v13  ;;  %v4142_v26 = vadd.f32 %v4110_v8, %v8828_v31  ;;  %v4170_v62 = vmax.f32 %v4138_v51, 0.0  ;;  %4198 = vst.msk [vmem:[%s8382_s28 + $0x50] sm:$0xff] %vm1262_vm3, %v4166_v6  ;;  %v8837_v13 = vld [vmem:[#allocation53_spill] sm:$0xff]  ;;  %v8838_v51 = vld [vmem:[#allocation59_spill] sm:$0xff] }
 0x56a   : > { %v4084_v0 = vmul.f32 %v8319_v36, %v8287_v5  ;;  %v4115_v32 = vadd.f32 %v8329_v9, %v4080_v39  ;;  %v4143_v14 = vadd.f32 %v4111_v23, %v8829_v29  ;;  %v4171_v43 = vmax.f32 %v4139_v1, 0.0  ;;  %4199 = vst.msk [vmem:[%s8382_s28 + $0x58] sm:$0xff] %vm1262_vm3, %v4167_v22  ;;  %v8839_v23 = vld [vmem:[#allocation60_spill] sm:$0xff] }
 0x56b   : > { %v4085_v50 = vmul.f32 %v8319_v36, %v8291_v48  ;;  %v4116_v3 = vadd.f32 %v8329_v9, %v4081_v44  ;;  %v4144_v41 = vadd.f32 %v4112_v59, %v8830_v60  ;;  %v4172_v38 = vmax.f32 %v4140_v27, 0.0  ;;  %4200 = vst.msk [vmem:[%s8382_s28 + $0x60] sm:$0xff] %vm1262_vm3, %v4168_v18  ;;  %v8841_v59 = vld [vmem:[#allocation32_spill] sm:$0xff] }
 0x56c   : > { %v4086_v5 = vmul.f32 %v8319_v36, %v8298_v55  ;;  %v4117_v34 = vadd.f32 %v8329_v9, %v4082_v10  ;;  %v4145_v42 = vadd.f32 %v4113_v37, %v8831_v33  ;;  %v4173_v47 = vmax.f32 %v4141_v35, 0.0  ;;  %4201 = vst.msk [vmem:[%s8382_s28 + $0x68] sm:$0xff] %vm1262_vm3, %v4169_v52 }
 0x56d   : > { %v4087_v48 = vmul.f32 %v8319_v36, %v8302_v4  ;;  %v4118_v57 = vadd.f32 %v8329_v9, %v4083_v21  ;;  %v4146_v16 = vadd.f32 %v4114_v58, %v8832_v53  ;;  %v4174_v12 = vmax.f32 %v4142_v26, 0.0  ;;  %4202 = vst.msk [vmem:[%s8382_s28 + $0x70] sm:$0xff] %vm1262_vm3, %v4170_v62 }
 0x56e   : > { %v4088_v55 = vmul.f32 %v8319_v36, %v8308_v24  ;;  %v4119_v61 = vadd.f32 %v8329_v9, %v4084_v0  ;;  %v4147_v7 = vadd.f32 %v4115_v32, %v8833_v45  ;;  %v4175_v2 = vmax.f32 %v4143_v14, 0.0  ;;  %4203 = vst.msk [vmem:[%s8382_s28 + $0x78] sm:$0xff] %vm1262_vm3, %v4171_v43  ;;  %v8835_v36 = vld [vmem:[#allocation47_spill] sm:$0xff] }
 0x56f   : > { %v4120_v4 = vadd.f32 %v8329_v9, %v4085_v50  ;;  %v4148_v19 = vadd.f32 %v4116_v3, %v8834_v20  ;;  %v4176_v49 = vmax.f32 %v4144_v41, 0.0  ;;  %4204 = vst.msk [vmem:[%s8382_s28 + $0x80] sm:$0xff] %vm1262_vm3, %v4172_v38  ;;  %v4121_v24 = vadd.f32 %v8329_v9, %v4086_v5 }
 0x570   : > { %v4149_v25 = vadd.f32 %v4117_v34, %v8835_v36  ;;  %v4177_v56 = vmax.f32 %v4145_v42, 0.0  ;;  %4205 = vst.msk [vmem:[%s8382_s28 + $0x88] sm:$0xff] %vm1262_vm3, %v4173_v47  ;;  %v4122_v11 = vadd.f32 %v8329_v9, %v4087_v48  ;;  %v4150_v15 = vadd.f32 %v4118_v57, %v8836_v17 }
 0x571   : > { %v4178_v63 = vmax.f32 %v4146_v16, 0.0  ;;  %4206 = vst.msk [vmem:[%s8382_s28 + $0x90] sm:$0xff] %vm1262_vm3, %v4174_v12  ;;  %v4123_v30 = vadd.f32 %v8329_v9, %v4088_v55  ;;  %v4151_v8 = vadd.f32 %v4119_v61, %v8837_v13  ;;  %v4179_v28 = vmax.f32 %v4147_v7, 0.0  ;;  %v8840_v9 = vld [vmem:[#allocation54_spill] sm:$0xff] }
 0x572   : > { %4207 = vst.msk [vmem:[%s8382_s28 + $0x98] sm:$0xff] %vm1262_vm3, %v4175_v2  ;;  %v4152_v6 = vadd.f32 %v4120_v4, %v8838_v51  ;;  %v4180_v39 = vmax.f32 %v4148_v19, 0.0  ;;  %v4153_v46 = vadd.f32 %v4121_v24, %v8839_v23  ;;  %v4181_v1 = vmax.f32 %v4149_v25, 0.0 }
 0x573   : > { %4208 = vst.msk [vmem:[%s8382_s28 + $0xa0] sm:$0xff] %vm1262_vm3, %v4176_v49  ;;  %v4154_v22 = vadd.f32 %v4122_v11, %v8840_v9  ;;  %v4182_v44 = vmax.f32 %v4150_v15, 0.0  ;;  %v4155_v40 = vadd.f32 %v4123_v30, %v8841_v59  ;;  %v4183_v27 = vmax.f32 %v4151_v8, 0.0 }
 0x574   : > { %4209 = vst.msk [vmem:[%s8382_s28 + $0xa8] sm:$0xff] %vm1262_vm3, %v4177_v56  ;;  %v4184_v18 = vmax.f32 %v4152_v6, 0.0  ;;  %v4185_v10 = vmax.f32 %v4153_v46, 0.0 }
 0x575   : > { %4210 = vst.msk [vmem:[%s8382_s28 + $0xb0] sm:$0xff] %vm1262_vm3, %v4178_v63  ;;  %v4186_v37 = vmax.f32 %v4154_v22, 0.0  ;;  %v4187_v54 = vmax.f32 %v4155_v40, 0.0 }
 0x576   : > { %4211 = vst.msk [vmem:[%s8382_s28 + $0xb8] sm:$0xff] %vm1262_vm3, %v4179_v28 }
 0x577   : > { %4212 = vst.msk [vmem:[%s8382_s28 + $0xc0] sm:$0xff] %vm1262_vm3, %v4180_v39 }
 0x578   : > { %4213 = vst.msk [vmem:[%s8382_s28 + $0xc8] sm:$0xff] %vm1262_vm3, %v4181_v1 }
 0x579   : > { %4214 = vst.msk [vmem:[%s8382_s28 + $0xd0] sm:$0xff] %vm1262_vm3, %v4182_v44 }
 0x57a   : > { %4215 = vst.msk [vmem:[%s8382_s28 + $0xd8] sm:$0xff] %vm1262_vm3, %v4183_v27 }
 0x57b   : > { %4216 = vst.msk [vmem:[%s8382_s28 + $0xe0] sm:$0xff] %vm1262_vm3, %v4184_v18 }
 0x57c   : > { %4217 = vst.msk [vmem:[%s8382_s28 + $0xe8] sm:$0xff] %vm1262_vm3, %v4185_v10 }
 0x57d   : > { %4218 = vst.msk [vmem:[%s8382_s28 + $0xf0] sm:$0xff] %vm1262_vm3, %v4186_v37 }
 0x57e   : > { %4219 = vst.msk [vmem:[%s8382_s28 + $0xf8] sm:$0xff] %vm1262_vm3, %v4187_v54 }
 0x57f   : > { %5603 = shalt.err (!%p5600_p3)
}
 0x580   : > { %s5644_s26 = smov 128   ;;  %s5645_s28 = smov 8  }
 0x581   : > { %4537 = dma.vmem_to_hbm [thread:$0]  (%p5734_p5), %s4234_s25, 4096, %s4236_s21, %s4221_s22, %s5644_s26, %s5644_s26, %s5645_s28  }
 0x582 PF: > { %p4543_p4 = scmp.ge.s32.totalorder %s5638_s12, 2  ;;  %s4250_s17 = sand.u32 1, %s5626_s30  }
 0x583   : > { %s4251_s29 = scalar_lea.sflag [#allocation4], %s4250_s17 }
 0x584   : > { %p4540_p7 = pnand %p4543_p4, %p5738_p6 }
 0x586   : > { %p4541_p8 = pneg %p4540_p7 }
 0x588   : > { %5621 = dma.done.wait (%p4541_p8), %s4251_s29, 4096  }
 0x589   : > { %5623 = vsyncadd (%p4541_p8), %s4251_s29, 4294963200  ;;  %p19_p9 = scmp.ge.s32.totalorder %s5721_s15, 4   ;;  %s8842_s30 = smov %s5630_s10 }
 0x58a   : > { %s8843_s10 = smov %s5634_s11  ;;  %s8844_s11 = smov %s5732_s18 }
 0x58b   : > { %s8845_s12 = smov %s5721_s15  ;;  %21 = sbr.rel (!%p19_p9) target bundleno = 3 (0x3), region = 94 }
 0x590   :  { %4257 = vsyncpa [#allocation4], 1 }
 0x591   :  { %4259 = vsyncpa [#allocation4 + $0x1], 1 }

</bundles_post_ra>
